<compile_context>
chip_gen: v7x
topology: tpu7x:2x2x1
jax: 0.10.0
libtpu: 0.0.40
codegen_flags: <defaults>
</compile_context>

<pallas_src>
import functools

import jax
import jax.numpy as jnp
import numpy as np
from jax import lax
from jax.experimental import pallas as pl
from jax.experimental.pallas import tpu as pltpu

NEG_SLOPE = 0.01          # PyTorch default LeakyReLU slope
BN_EPS = 1e-5
ROW_STRIDE = 16           # padded flat row stride (multiple of 8); must be >= W + 2
TRUNK_DTYPE = jnp.bfloat16


def _leaky_relu(x):
    return jnp.where(x > 0, x, NEG_SLOPE * x)


def _mish(x):
    # x * tanh(softplus(x)); stable softplus with plain exp/log for Mosaic.
    sp = jnp.maximum(x, 0.0) + jnp.log(1.0 + jnp.exp(-jnp.abs(x)))
    return x * jnp.tanh(sp)


# ------------------------------- fused kernel --------------------------------

def _build_kernel(H, W, Cin):
    Hp, S = H + 2, ROW_STRIDE
    assert W + 2 <= S
    NP = Hp * S                                 # rows of one image's padded flat plane
    # 3x3 tap offsets in flat rows, (dy, dx) row-major == weight row-block order.
    offsets = [(dy - 1) * S + (dx - 1) for dy in range(3) for dx in range(3)]

    def kernel(x_ref, extra_ref, mask_ref,
               cw0, csh0, cw1, csh1, cw2, csh2,
               hw3, hsh3, w1p0, w1p1, w1v,
               pw1e, pb1, pw2, pb2,
               vw1e, vb1, vw2, vb2, vw3, vb3,
               logp_ref, val_ref):
        m = mask_ref[...]                       # (NP, 1): 1 at interior rows, 0 at padding

        # conv0 + BN + LeakyReLU: one K=9*Cin matmul (im2col built in wrapper, bf16).
        y0 = jnp.dot(x_ref[...], cw0[...], preferred_element_type=jnp.float32)
        act = _leaky_relu(y0 + csh0[...]) * m   # (NP, 64) f32, padding rows exactly zero

        # conv1/conv2: SAME 3x3 as 9 accumulated K=64 bf16 matmuls; tap shifts are
        # pltpu.roll (XLU) of the activation -- wrapped rows only reach padding
        # output rows, which the mask multiply re-zeroes every stage.
        def conv3x3(src, w_ref, sh_ref):
            acc = jnp.zeros((NP, 64), jnp.float32)
            for idx, off in enumerate(offsets):
                lhs = src if off == 0 else pltpu.roll(src, (-off) % NP, axis=0)
                acc = acc + jnp.dot(lhs.astype(TRUNK_DTYPE),
                                    w_ref[idx * 64:(idx + 1) * 64, :],
                                    preferred_element_type=jnp.float32)
            return _leaky_relu(acc + sh_ref[...]) * m

        act = conv3x3(act, cw1, csh1)
        act = conv3x3(act, cw2, csh2)

        # Fused 1x1 head convs (policy ch0, ch1, value) + folded BN + single Mish.
        head = _mish(jnp.dot(act, hw3[...], preferred_element_type=jnp.float32)
                     + hsh3[...])               # (NP, 3) f32

        # NCHW flatten + concat(extra) folded into fc1: Hadamard with the
        # zero-padded fc1 row blocks + per-image row sum.  Padding rows of the
        # fc1 blocks are zero, so the mish(shift) values there drop out.
        extra = extra_ref[0]                    # (1, E)

        q_pol = head[:, 0:1] * w1p0[...] + head[:, 1:2] * w1p1[...]
        h_pol = (jnp.sum(q_pol, axis=0, keepdims=True)
                 + jnp.dot(extra, pw1e[...], preferred_element_type=jnp.float32)
                 + pb1[...])
        h_pol = _leaky_relu(h_pol)
        logits = jnp.dot(h_pol, pw2[...], preferred_element_type=jnp.float32) + pb2[...]
        z = logits - jnp.max(logits, axis=1, keepdims=True)
        lse = jnp.log(jnp.sum(jnp.exp(z), axis=1, keepdims=True))
        logp_ref[0] = (z - lse).astype(logp_ref.dtype)

        q_val = head[:, 2:3] * w1v[...]
        h_val = (jnp.sum(q_val, axis=0, keepdims=True)
                 + jnp.dot(extra, vw1e[...], preferred_element_type=jnp.float32)
                 + vb1[...])
        h_val = jnp.tanh(h_val)
        h2 = _leaky_relu(jnp.dot(h_val, vw2[...], preferred_element_type=jnp.float32)
                         + vb2[...])
        v = jnp.tanh(jnp.dot(h2, vw3[...], preferred_element_type=jnp.float32) + vb3[...])
        val_ref[0] = v.astype(val_ref.dtype)

    return kernel, NP


def alphazero_forward(kp, x_nchw, extra):
    B, Cin, H, W = x_nchw.shape
    Hp, S = H + 2, ROW_STRIDE
    NP = Hp * S
    num_actions = kp["pw2"].shape[1]
    E = extra.shape[1]

    kernel, _ = _build_kernel(H, W, Cin)

    # One-time glue on the raw input: NCHW -> NHWC -> 9-tap im2col (SAME zero
    # padding) -> scatter into the padded-flat (Hp x ROW_STRIDE) row layout ->
    # cast to bf16.  conv0 then becomes a single K=9*Cin matmul in the kernel.
    xh = jnp.transpose(x_nchw, (0, 2, 3, 1))
    xp = jnp.pad(xh, ((0, 0), (1, 1), (1, 1), (0, 0)))
    cols = jnp.concatenate(
        [xp[:, dy:dy + H, dx:dx + W, :] for dy in range(3) for dx in range(3)],
        axis=-1)                                               # (B, H, W, 9*Cin)
    x_flat = jnp.zeros((B, Hp, S, 9 * Cin), jnp.float32)
    x_flat = x_flat.at[:, 1:H + 1, 1:W + 1, :].set(cols)
    x_flat = x_flat.reshape(B * NP, 9 * Cin).astype(TRUNK_DTYPE)

    extra3 = extra.reshape(B, 1, E).astype(jnp.float32)

    def resident(arr):      # weights: constant index map -> fetched once, stays in VMEM
        return pl.BlockSpec(arr.shape, lambda b, nd=arr.ndim: (0,) * nd)

    weight_names = ["mask", "cw0", "csh0", "cw1", "csh1", "cw2", "csh2",
                    "hw3", "hsh3", "w1p0", "w1p1", "w1v",
                    "pw1e", "pb1", "pw2", "pb2",
                    "vw1e", "vb1", "vw2", "vb2", "vw3", "vb3"]
    weights = [kp[n] for n in weight_names]

    in_specs = ([pl.BlockSpec((NP, 9 * Cin), lambda b: (b, 0)),
                 pl.BlockSpec((1, 1, E), lambda b: (b, 0, 0))]
                + [resident(w) for w in weights])
    out_specs = (pl.BlockSpec((1, 1, num_actions), lambda b: (b, 0, 0)),
                 pl.BlockSpec((1, 1, 1), lambda b: (b, 0, 0)))

    logp, val = pl.pallas_call(
        kernel,
        grid=(B,),
        in_specs=in_specs,
        out_specs=out_specs,
        out_shape=(jax.ShapeDtypeStruct((B, 1, num_actions), jnp.float32),
                   jax.ShapeDtypeStruct((B, 1, 1), jnp.float32)),
        compiler_params=pltpu.CompilerParams(
            dimension_semantics=("parallel",),
            vmem_limit_bytes=32 * 1024 * 1024),
    )(x_flat, extra3, *weights)
    return logp[:, 0, :], val[:, 0, :]


# ------------------------------- parameters -----------------------------------

def init_params(key, board, in_channels, num_actions, extra_dim):
    keys = iter(jax.random.split(key, 64))

    def w(shape, scale=0.1):
        return (scale * jax.random.normal(next(keys), shape)).astype(jnp.float32)

    def bn(c):
        gamma = 1.0 + 0.1 * jax.random.normal(next(keys), (c,))
        beta = 0.1 * jax.random.normal(next(keys), (c,))
        mean = 0.1 * jax.random.normal(next(keys), (c,))
        var = 1.0 + 0.1 * jnp.abs(jax.random.normal(next(keys), (c,)))
        scale = gamma / jnp.sqrt(var + BN_EPS)
        shift = beta - mean * scale
        return (scale.reshape(1, c).astype(jnp.float32),
                shift.reshape(1, c).astype(jnp.float32))

    p = {}
    cin = in_channels
    for i in range(3):
        s, sh = bn(64)
        p[f"conv{i}"] = dict(w=w((9 * cin, 64)), b=w((1, 64), 0.01), scale=s, shift=sh)
        cin = 64
    hw = board * board
    ps, psh = bn(2)
    p["policy"] = dict(cw=w((64, 2)), cb=w((1, 2), 0.01), cscale=ps, cshift=psh,
                       w1=w((2 * hw + extra_dim, 128)), b1=w((1, 128), 0.01),
                       w2=w((128, num_actions)), b2=w((1, num_actions), 0.01))
    vs, vsh = bn(1)
    p["value"] = dict(cw=w((64, 1)), cb=w((1, 1), 0.01), cscale=vs, cshift=vsh,
                      w1=w((hw + extra_dim, 128)), b1=w((1, 128), 0.01),
                      w2=w((128, 64)), b2=w((1, 64), 0.01),
                      w3=w((64, 1)), b3=w((1, 1), 0.01))
    return p


def prepare_params(params, H, W):
    """Fold conv bias + BN into weights/shifts (bf16 trunk weights), fuse the
    three 1x1 head convs, and bake the NCHW flatten into zero-padded
    (HpWp_pad, 128) fc1 row blocks + an interior mask (all computed once)."""
    Hp, S = H + 2, ROW_STRIDE
    HW, NP = H * W, Hp * S

    kp = {}
    for i in range(3):
        cp = params[f"conv{i}"]
        kp[f"cw{i}"] = (cp["w"] * cp["scale"]).astype(TRUNK_DTYPE)       # BN scale folded
        kp[f"csh{i}"] = (cp["b"] * cp["scale"] + cp["shift"]).astype(jnp.float32)

    pp, vp = params["policy"], params["value"]
    # fused 1x1 head convs: columns = [policy ch0, policy ch1, value]
    kp["hw3"] = jnp.concatenate(
        [pp["cw"] * pp["cscale"], vp["cw"] * vp["cscale"]], axis=1).astype(jnp.float32)
    kp["hsh3"] = jnp.concatenate(
        [pp["cb"] * pp["cscale"] + pp["cshift"],
         vp["cb"] * vp["cscale"] + vp["cshift"]], axis=1).astype(jnp.float32)

    # flat row index of interior (y, x) inside one padded plane,
    # (y, x) row-major == torch per-channel flatten order.
    interior = np.array([(y + 1) * S + (x + 1) for y in range(H) for x in range(W)],
                        dtype=np.int32)

    def pad_rows(w_rows):                        # (HW, 128) -> (NP, 128), zero at padding
        full = jnp.zeros((NP, w_rows.shape[1]), jnp.float32)
        return full.at[interior].set(w_rows.astype(jnp.float32))

    kp["w1p0"] = pad_rows(pp["w1"][0:HW])        # policy fc1 rows, channel 0
    kp["w1p1"] = pad_rows(pp["w1"][HW:2 * HW])   # policy fc1 rows, channel 1
    kp["pw1e"] = pp["w1"][2 * HW:].astype(jnp.float32)
    kp["pb1"], kp["pw2"], kp["pb2"] = pp["b1"], pp["w2"], pp["b2"]

    kp["w1v"] = pad_rows(vp["w1"][0:HW])         # value fc1 rows, board features
    kp["vw1e"] = vp["w1"][HW:].astype(jnp.float32)
    kp["vb1"], kp["vw2"], kp["vb2"] = vp["b1"], vp["w2"], vp["b2"]
    kp["vw3"], kp["vb3"] = vp["w3"], vp["b3"]

    mask = np.zeros((NP, 1), np.float32)         # 1 at interior rows, 0 at padding
    mask[interior, 0] = 1.0
    kp["mask"] = jnp.asarray(mask)
    return kp


# ----------------------------- pure-JAX reference -----------------------------

def im2col_3x3(x_nhwc):
    B, H, W, C = x_nhwc.shape
    xp = jnp.pad(x_nhwc, ((0, 0), (1, 1), (1, 1), (0, 0)))
    cols = [xp[:, dy:dy + H, dx:dx + W, :] for dy in range(3) for dx in range(3)]
    return jnp.concatenate(cols, axis=-1).reshape(B * H * W, 9 * C)


def ref_forward(params, x_nchw, extra, trunk_dtype=jnp.float32):
    """Pure-JAX reference.  trunk_dtype=bfloat16 applies the same bf16 rounding
    to the trunk matmul operands (f32 accumulation) as the kernel, so the
    layout/flatten/folding logic can be checked at tight tolerance."""
    hdot = functools.partial(jnp.dot, precision=lax.Precision.HIGHEST)
    B, _, H, W = x_nchw.shape
    x = jnp.transpose(x_nchw, (0, 2, 3, 1))
    for i in range(3):
        cp = params[f"conv{i}"]
        w_fold = (cp["w"] * cp["scale"]).astype(trunk_dtype).astype(jnp.float32)
        sh = cp["b"] * cp["scale"] + cp["shift"]
        cols = im2col_3x3(x).astype(trunk_dtype).astype(jnp.float32)
        y = hdot(cols, w_fold) + sh
        y = jnp.where(y > 0, y, NEG_SLOPE * y)
        x = y.reshape(B, H, W, 64)
    x2d = x.reshape(B * H * W, 64)

    def mish(v):
        return v * jnp.tanh(jax.nn.softplus(v))

    pp = params["policy"]
    ph = mish((hdot(x2d, pp["cw"]) + pp["cb"]) * pp["cscale"] + pp["cshift"])
    pflat = jnp.transpose(ph.reshape(B, H, W, 2), (0, 3, 1, 2)).reshape(B, 2 * H * W)
    pfeat = jnp.concatenate([pflat, extra], axis=1)
    h = hdot(pfeat, pp["w1"]) + pp["b1"]
    h = jnp.where(h > 0, h, NEG_SLOPE * h)
    log_probs = jax.nn.log_softmax(hdot(h, pp["w2"]) + pp["b2"], axis=1)

    vp = params["value"]
    vh = mish((hdot(x2d, vp["cw"]) + vp["cb"]) * vp["cscale"] + vp["cshift"])
    vfeat = jnp.concatenate([vh.reshape(B, H * W), extra], axis=1)
    h = jnp.tanh(hdot(vfeat, vp["w1"]) + vp["b1"])
    h = hdot(h, vp["w2"]) + vp["b2"]
    h = jnp.where(h > 0, h, NEG_SLOPE * h)
    value = jnp.tanh(hdot(h, vp["w3"]) + vp["b3"])
    return log_probs, value


# ----------------------------------- main --------------------------------------

if __name__ == "__main__":
    BATCH, IN_CH, BOARD, NUM_ACTIONS, EXTRA_DIM = 2, 4, 8, 16, 7

    key = jax.random.PRNGKey(0)
    kx, ke, kp_key = jax.random.split(key, 3)
    x = jax.random.normal(kx, (BATCH, IN_CH, BOARD, BOARD), dtype=jnp.float32)
    extra = jax.random.normal(ke, (BATCH, EXTRA_DIM), dtype=jnp.float32)
    params = init_params(kp_key, BOARD, IN_CH, NUM_ACTIONS, EXTRA_DIM)
    kparams = prepare_params(params, BOARD, BOARD)

    fwd = jax.jit(alphazero_forward)
    log_probs, value = fwd(kparams, x, extra)
    jax.block_until_ready((log_probs, value))

    assert log_probs.shape == (BATCH, NUM_ACTIONS)
    assert value.shape == (BATCH, 1)

    # Tight check vs a reference with the same bf16 rounding on trunk matmul
    # operands: validates layout / flatten-order / folding logic.
    lp_m, v_m = ref_forward(params, x, extra, trunk_dtype=TRUNK_DTYPE)
    np.testing.assert_allclose(np.asarray(log_probs), np.asarray(lp_m),
                               atol=5e-3, rtol=5e-3)
    np.testing.assert_allclose(np.asarray(value), np.asarray(v_m),
                               atol=5e-3, rtol=5e-3)

    # Looser sanity check vs the full-f32 HIGHEST-precision reference
    # (bounds the bf16-trunk precision loss).
    lp_f, v_f = ref_forward(params, x, extra, trunk_dtype=jnp.float32)
    np.testing.assert_allclose(np.asarray(log_probs), np.asarray(lp_f),
                               atol=1e-1, rtol=1e-1)
    np.testing.assert_allclose(np.asarray(value), np.asarray(v_f),
                               atol=1e-1, rtol=1e-1)

    print("KERNEL_OK")
</pallas_src>

<mosaic_0001>
module attributes {stable_mosaic.version = 11 : i64} {
  func.func @kernel(%arg0: i32, %arg1: memref<160x36xbf16, #tpu.memory_space<vmem>>, %arg2: memref<1x1x7xf32, #tpu.memory_space<vmem>>, %arg3: memref<160x1xf32, #tpu.memory_space<vmem>>, %arg4: memref<36x64xbf16, #tpu.memory_space<vmem>>, %arg5: memref<1x64xf32, #tpu.memory_space<vmem>>, %arg6: memref<576x64xbf16, #tpu.memory_space<vmem>>, %arg7: memref<1x64xf32, #tpu.memory_space<vmem>>, %arg8: memref<576x64xbf16, #tpu.memory_space<vmem>>, %arg9: memref<1x64xf32, #tpu.memory_space<vmem>>, %arg10: memref<64x3xf32, #tpu.memory_space<vmem>>, %arg11: memref<1x3xf32, #tpu.memory_space<vmem>>, %arg12: memref<160x128xf32, #tpu.memory_space<vmem>>, %arg13: memref<160x128xf32, #tpu.memory_space<vmem>>, %arg14: memref<160x128xf32, #tpu.memory_space<vmem>>, %arg15: memref<7x128xf32, #tpu.memory_space<vmem>>, %arg16: memref<1x128xf32, #tpu.memory_space<vmem>>, %arg17: memref<128x16xf32, #tpu.memory_space<vmem>>, %arg18: memref<1x16xf32, #tpu.memory_space<vmem>>, %arg19: memref<7x128xf32, #tpu.memory_space<vmem>>, %arg20: memref<1x128xf32, #tpu.memory_space<vmem>>, %arg21: memref<128x64xf32, #tpu.memory_space<vmem>>, %arg22: memref<1x64xf32, #tpu.memory_space<vmem>>, %arg23: memref<64x1xf32, #tpu.memory_space<vmem>>, %arg24: memref<1x1xf32, #tpu.memory_space<vmem>>, %arg25: memref<1x1x16xf32, #tpu.memory_space<vmem>>, %arg26: memref<1x1x1xf32, #tpu.memory_space<vmem>>) attributes {dimension_semantics = [#tpu.dimension_semantics<parallel>], iteration_bounds = array<i64: 2>, scalar_prefetch = 0 : i64, scratch_operands = 0 : i64, tpu.core_type = #tpu.core_type<tc>, window_params = [{transform_indices = @transform_0, window_bounds = array<i64: 160, 36>}, {transform_indices = @transform_1, window_bounds = array<i64: 1, 1, 7>}, {pipeline_mode = #tpu.pipeline_mode<synchronous>, transform_indices = @transform_2, window_bounds = array<i64: 160, 1>}, {pipeline_mode = #tpu.pipeline_mode<synchronous>, transform_indices = @transform_3, window_bounds = array<i64: 36, 64>}, {pipeline_mode = #tpu.pipeline_mode<synchronous>, transform_indices = @transform_4, window_bounds = array<i64: 1, 64>}, {pipeline_mode = #tpu.pipeline_mode<synchronous>, transform_indices = @transform_5, window_bounds = array<i64: 576, 64>}, {pipeline_mode = #tpu.pipeline_mode<synchronous>, transform_indices = @transform_6, window_bounds = array<i64: 1, 64>}, {pipeline_mode = #tpu.pipeline_mode<synchronous>, transform_indices = @transform_7, window_bounds = array<i64: 576, 64>}, {pipeline_mode = #tpu.pipeline_mode<synchronous>, transform_indices = @transform_8, window_bounds = array<i64: 1, 64>}, {pipeline_mode = #tpu.pipeline_mode<synchronous>, transform_indices = @transform_9, window_bounds = array<i64: 64, 3>}, {pipeline_mode = #tpu.pipeline_mode<synchronous>, transform_indices = @transform_10, window_bounds = array<i64: 1, 3>}, {pipeline_mode = #tpu.pipeline_mode<synchronous>, transform_indices = @transform_11, window_bounds = array<i64: 160, 128>}, {pipeline_mode = #tpu.pipeline_mode<synchronous>, transform_indices = @transform_12, window_bounds = array<i64: 160, 128>}, {pipeline_mode = #tpu.pipeline_mode<synchronous>, transform_indices = @transform_13, window_bounds = array<i64: 160, 128>}, {pipeline_mode = #tpu.pipeline_mode<synchronous>, transform_indices = @transform_14, window_bounds = array<i64: 7, 128>}, {pipeline_mode = #tpu.pipeline_mode<synchronous>, transform_indices = @transform_15, window_bounds = array<i64: 1, 128>}, {pipeline_mode = #tpu.pipeline_mode<synchronous>, transform_indices = @transform_16, window_bounds = array<i64: 128, 16>}, {pipeline_mode = #tpu.pipeline_mode<synchronous>, transform_indices = @transform_17, window_bounds = array<i64: 1, 16>}, {pipeline_mode = #tpu.pipeline_mode<synchronous>, transform_indices = @transform_18, window_bounds = array<i64: 7, 128>}, {pipeline_mode = #tpu.pipeline_mode<synchronous>, transform_indices = @transform_19, window_bounds = array<i64: 1, 128>}, {pipeline_mode = #tpu.pipeline_mode<synchronous>, transform_indices = @transform_20, window_bounds = array<i64: 128, 64>}, {pipeline_mode = #tpu.pipeline_mode<synchronous>, transform_indices = @transform_21, window_bounds = array<i64: 1, 64>}, {pipeline_mode = #tpu.pipeline_mode<synchronous>, transform_indices = @transform_22, window_bounds = array<i64: 64, 1>}, {pipeline_mode = #tpu.pipeline_mode<synchronous>, transform_indices = @transform_23, window_bounds = array<i64: 1, 1>}, {transform_indices = @transform_24, window_bounds = array<i64: 1, 1, 16>}, {transform_indices = @transform_25, window_bounds = array<i64: 1, 1, 1>}]} {
    %c0 = arith.constant 0 : index
    %c0_0 = arith.constant 0 : index
    %0 = vector.load %arg3[%c0, %c0_0] : memref<160x1xf32, #tpu.memory_space<vmem>>, vector<160x1xf32>
    %c0_1 = arith.constant 0 : index
    %c0_2 = arith.constant 0 : index
    %1 = vector.load %arg1[%c0_1, %c0_2] : memref<160x36xbf16, #tpu.memory_space<vmem>>, vector<160x36xbf16>
    %c0_3 = arith.constant 0 : index
    %c0_4 = arith.constant 0 : index
    %2 = vector.load %arg4[%c0_3, %c0_4] : memref<36x64xbf16, #tpu.memory_space<vmem>>, vector<36x64xbf16>
    %cst = arith.constant dense<0.000000e+00> : vector<160x64xf32>
    %3 = tpu.matmul %1, %2, %cst {dimension_numbers = #tpu.dot_dimension_numbers<[1], [0], [0], [1], [0, 0, 1, 1], [], []>} : vector<160x36xbf16>, vector<36x64xbf16>, vector<160x64xf32> -> vector<160x64xf32>
    %c0_5 = arith.constant 0 : index
    %c0_6 = arith.constant 0 : index
    %4 = vector.load %arg5[%c0_5, %c0_6] : memref<1x64xf32, #tpu.memory_space<vmem>>, vector<1x64xf32>
    %5 = vector.broadcast %4 : vector<1x64xf32> to vector<160x64xf32>
    %6 = arith.addf %3, %5 : vector<160x64xf32>
    %cst_7 = arith.constant 0.000000e+00 : f32
    %7 = vector.broadcast %cst_7 : f32 to vector<160x64xf32>
    %8 = arith.cmpf ogt, %6, %7 : vector<160x64xf32>
    %cst_8 = arith.constant 0.00999999977 : f32
    %9 = vector.broadcast %cst_8 : f32 to vector<160x64xf32>
    %10 = arith.mulf %9, %6 : vector<160x64xf32>
    %11 = arith.select %8, %6, %10 : vector<160x64xi1>, vector<160x64xf32>
    %12 = vector.broadcast %0 : vector<160x1xf32> to vector<160x64xf32>
    %13 = arith.mulf %11, %12 : vector<160x64xf32>
    %cst_9 = arith.constant 0.000000e+00 : f32
    %14 = vector.broadcast %cst_9 : f32 to vector<160x64xf32>
    %c17_i32 = arith.constant 17 : i32
    %15 = tpu.dynamic_rotate %13 by %c17_i32 dim 0 : vector<160x64xf32>, i32 -> vector<160x64xf32>
    %16 = arith.truncf %15 : vector<160x64xf32> to vector<160x64xbf16>
    %c0_10 = arith.constant 0 : index
    %c0_11 = arith.constant 0 : index
    %17 = vector.load %arg6[%c0_10, %c0_11] : memref<576x64xbf16, #tpu.memory_space<vmem>>, vector<64x64xbf16>
    %cst_12 = arith.constant dense<0.000000e+00> : vector<160x64xf32>
    %18 = tpu.matmul %16, %17, %cst_12 {dimension_numbers = #tpu.dot_dimension_numbers<[1], [0], [0], [1], [0, 0, 1, 1], [], []>} : vector<160x64xbf16>, vector<64x64xbf16>, vector<160x64xf32> -> vector<160x64xf32>
    %19 = arith.addf %14, %18 : vector<160x64xf32>
    %c16_i32 = arith.constant 16 : i32
    %20 = tpu.dynamic_rotate %13 by %c16_i32 dim 0 : vector<160x64xf32>, i32 -> vector<160x64xf32>
    %21 = arith.truncf %20 : vector<160x64xf32> to vector<160x64xbf16>
    %c64 = arith.constant 64 : index
    %c0_13 = arith.constant 0 : index
    %22 = vector.load %arg6[%c64, %c0_13] : memref<576x64xbf16, #tpu.memory_space<vmem>>, vector<64x64xbf16>
    %cst_14 = arith.constant dense<0.000000e+00> : vector<160x64xf32>
    %23 = tpu.matmul %21, %22, %cst_14 {dimension_numbers = #tpu.dot_dimension_numbers<[1], [0], [0], [1], [0, 0, 1, 1], [], []>} : vector<160x64xbf16>, vector<64x64xbf16>, vector<160x64xf32> -> vector<160x64xf32>
    %24 = arith.addf %19, %23 : vector<160x64xf32>
    %c15_i32 = arith.constant 15 : i32
    %25 = tpu.dynamic_rotate %13 by %c15_i32 dim 0 : vector<160x64xf32>, i32 -> vector<160x64xf32>
    %26 = arith.truncf %25 : vector<160x64xf32> to vector<160x64xbf16>
    %c128 = arith.constant 128 : index
    %c0_15 = arith.constant 0 : index
    %27 = vector.load %arg6[%c128, %c0_15] : memref<576x64xbf16, #tpu.memory_space<vmem>>, vector<64x64xbf16>
    %cst_16 = arith.constant dense<0.000000e+00> : vector<160x64xf32>
    %28 = tpu.matmul %26, %27, %cst_16 {dimension_numbers = #tpu.dot_dimension_numbers<[1], [0], [0], [1], [0, 0, 1, 1], [], []>} : vector<160x64xbf16>, vector<64x64xbf16>, vector<160x64xf32> -> vector<160x64xf32>
    %29 = arith.addf %24, %28 : vector<160x64xf32>
    %c1_i32 = arith.constant 1 : i32
    %30 = tpu.dynamic_rotate %13 by %c1_i32 dim 0 : vector<160x64xf32>, i32 -> vector<160x64xf32>
    %31 = arith.truncf %30 : vector<160x64xf32> to vector<160x64xbf16>
    %c192 = arith.constant 192 : index
    %c0_17 = arith.constant 0 : index
    %32 = vector.load %arg6[%c192, %c0_17] : memref<576x64xbf16, #tpu.memory_space<vmem>>, vector<64x64xbf16>
    %cst_18 = arith.constant dense<0.000000e+00> : vector<160x64xf32>
    %33 = tpu.matmul %31, %32, %cst_18 {dimension_numbers = #tpu.dot_dimension_numbers<[1], [0], [0], [1], [0, 0, 1, 1], [], []>} : vector<160x64xbf16>, vector<64x64xbf16>, vector<160x64xf32> -> vector<160x64xf32>
    %34 = arith.addf %29, %33 : vector<160x64xf32>
    %35 = arith.truncf %13 : vector<160x64xf32> to vector<160x64xbf16>
    %c256 = arith.constant 256 : index
    %c0_19 = arith.constant 0 : index
    %36 = vector.load %arg6[%c256, %c0_19] : memref<576x64xbf16, #tpu.memory_space<vmem>>, vector<64x64xbf16>
    %cst_20 = arith.constant dense<0.000000e+00> : vector<160x64xf32>
    %37 = tpu.matmul %35, %36, %cst_20 {dimension_numbers = #tpu.dot_dimension_numbers<[1], [0], [0], [1], [0, 0, 1, 1], [], []>} : vector<160x64xbf16>, vector<64x64xbf16>, vector<160x64xf32> -> vector<160x64xf32>
    %38 = arith.addf %34, %37 : vector<160x64xf32>
    %c159_i32 = arith.constant 159 : i32
    %39 = tpu.dynamic_rotate %13 by %c159_i32 dim 0 : vector<160x64xf32>, i32 -> vector<160x64xf32>
    %40 = arith.truncf %39 : vector<160x64xf32> to vector<160x64xbf16>
    %c320 = arith.constant 320 : index
    %c0_21 = arith.constant 0 : index
    %41 = vector.load %arg6[%c320, %c0_21] : memref<576x64xbf16, #tpu.memory_space<vmem>>, vector<64x64xbf16>
    %cst_22 = arith.constant dense<0.000000e+00> : vector<160x64xf32>
    %42 = tpu.matmul %40, %41, %cst_22 {dimension_numbers = #tpu.dot_dimension_numbers<[1], [0], [0], [1], [0, 0, 1, 1], [], []>} : vector<160x64xbf16>, vector<64x64xbf16>, vector<160x64xf32> -> vector<160x64xf32>
    %43 = arith.addf %38, %42 : vector<160x64xf32>
    %c145_i32 = arith.constant 145 : i32
    %44 = tpu.dynamic_rotate %13 by %c145_i32 dim 0 : vector<160x64xf32>, i32 -> vector<160x64xf32>
    %45 = arith.truncf %44 : vector<160x64xf32> to vector<160x64xbf16>
    %c384 = arith.constant 384 : index
    %c0_23 = arith.constant 0 : index
    %46 = vector.load %arg6[%c384, %c0_23] : memref<576x64xbf16, #tpu.memory_space<vmem>>, vector<64x64xbf16>
    %cst_24 = arith.constant dense<0.000000e+00> : vector<160x64xf32>
    %47 = tpu.matmul %45, %46, %cst_24 {dimension_numbers = #tpu.dot_dimension_numbers<[1], [0], [0], [1], [0, 0, 1, 1], [], []>} : vector<160x64xbf16>, vector<64x64xbf16>, vector<160x64xf32> -> vector<160x64xf32>
    %48 = arith.addf %43, %47 : vector<160x64xf32>
    %c144_i32 = arith.constant 144 : i32
    %49 = tpu.dynamic_rotate %13 by %c144_i32 dim 0 : vector<160x64xf32>, i32 -> vector<160x64xf32>
    %50 = arith.truncf %49 : vector<160x64xf32> to vector<160x64xbf16>
    %c448 = arith.constant 448 : index
    %c0_25 = arith.constant 0 : index
    %51 = vector.load %arg6[%c448, %c0_25] : memref<576x64xbf16, #tpu.memory_space<vmem>>, vector<64x64xbf16>
    %cst_26 = arith.constant dense<0.000000e+00> : vector<160x64xf32>
    %52 = tpu.matmul %50, %51, %cst_26 {dimension_numbers = #tpu.dot_dimension_numbers<[1], [0], [0], [1], [0, 0, 1, 1], [], []>} : vector<160x64xbf16>, vector<64x64xbf16>, vector<160x64xf32> -> vector<160x64xf32>
    %53 = arith.addf %48, %52 : vector<160x64xf32>
    %c143_i32 = arith.constant 143 : i32
    %54 = tpu.dynamic_rotate %13 by %c143_i32 dim 0 : vector<160x64xf32>, i32 -> vector<160x64xf32>
    %55 = arith.truncf %54 : vector<160x64xf32> to vector<160x64xbf16>
    %c512 = arith.constant 512 : index
    %c0_27 = arith.constant 0 : index
    %56 = vector.load %arg6[%c512, %c0_27] : memref<576x64xbf16, #tpu.memory_space<vmem>>, vector<64x64xbf16>
    %cst_28 = arith.constant dense<0.000000e+00> : vector<160x64xf32>
    %57 = tpu.matmul %55, %56, %cst_28 {dimension_numbers = #tpu.dot_dimension_numbers<[1], [0], [0], [1], [0, 0, 1, 1], [], []>} : vector<160x64xbf16>, vector<64x64xbf16>, vector<160x64xf32> -> vector<160x64xf32>
    %58 = arith.addf %53, %57 : vector<160x64xf32>
    %c0_29 = arith.constant 0 : index
    %c0_30 = arith.constant 0 : index
    %59 = vector.load %arg7[%c0_29, %c0_30] : memref<1x64xf32, #tpu.memory_space<vmem>>, vector<1x64xf32>
    %60 = vector.broadcast %59 : vector<1x64xf32> to vector<160x64xf32>
    %61 = arith.addf %58, %60 : vector<160x64xf32>
    %cst_31 = arith.constant 0.000000e+00 : f32
    %62 = vector.broadcast %cst_31 : f32 to vector<160x64xf32>
    %63 = arith.cmpf ogt, %61, %62 : vector<160x64xf32>
    %cst_32 = arith.constant 0.00999999977 : f32
    %64 = vector.broadcast %cst_32 : f32 to vector<160x64xf32>
    %65 = arith.mulf %64, %61 : vector<160x64xf32>
    %66 = arith.select %63, %61, %65 : vector<160x64xi1>, vector<160x64xf32>
    %67 = vector.broadcast %0 : vector<160x1xf32> to vector<160x64xf32>
    %68 = arith.mulf %66, %67 : vector<160x64xf32>
    %cst_33 = arith.constant 0.000000e+00 : f32
    %69 = vector.broadcast %cst_33 : f32 to vector<160x64xf32>
    %c17_i32_34 = arith.constant 17 : i32
    %70 = tpu.dynamic_rotate %68 by %c17_i32_34 dim 0 : vector<160x64xf32>, i32 -> vector<160x64xf32>
    %71 = arith.truncf %70 : vector<160x64xf32> to vector<160x64xbf16>
    %c0_35 = arith.constant 0 : index
    %c0_36 = arith.constant 0 : index
    %72 = vector.load %arg8[%c0_35, %c0_36] : memref<576x64xbf16, #tpu.memory_space<vmem>>, vector<64x64xbf16>
    %cst_37 = arith.constant dense<0.000000e+00> : vector<160x64xf32>
    %73 = tpu.matmul %71, %72, %cst_37 {dimension_numbers = #tpu.dot_dimension_numbers<[1], [0], [0], [1], [0, 0, 1, 1], [], []>} : vector<160x64xbf16>, vector<64x64xbf16>, vector<160x64xf32> -> vector<160x64xf32>
    %74 = arith.addf %69, %73 : vector<160x64xf32>
    %c16_i32_38 = arith.constant 16 : i32
    %75 = tpu.dynamic_rotate %68 by %c16_i32_38 dim 0 : vector<160x64xf32>, i32 -> vector<160x64xf32>
    %76 = arith.truncf %75 : vector<160x64xf32> to vector<160x64xbf16>
    %c64_39 = arith.constant 64 : index
    %c0_40 = arith.constant 0 : index
    %77 = vector.load %arg8[%c64_39, %c0_40] : memref<576x64xbf16, #tpu.memory_space<vmem>>, vector<64x64xbf16>
    %cst_41 = arith.constant dense<0.000000e+00> : vector<160x64xf32>
    %78 = tpu.matmul %76, %77, %cst_41 {dimension_numbers = #tpu.dot_dimension_numbers<[1], [0], [0], [1], [0, 0, 1, 1], [], []>} : vector<160x64xbf16>, vector<64x64xbf16>, vector<160x64xf32> -> vector<160x64xf32>
    %79 = arith.addf %74, %78 : vector<160x64xf32>
    %c15_i32_42 = arith.constant 15 : i32
    %80 = tpu.dynamic_rotate %68 by %c15_i32_42 dim 0 : vector<160x64xf32>, i32 -> vector<160x64xf32>
    %81 = arith.truncf %80 : vector<160x64xf32> to vector<160x64xbf16>
    %c128_43 = arith.constant 128 : index
    %c0_44 = arith.constant 0 : index
    %82 = vector.load %arg8[%c128_43, %c0_44] : memref<576x64xbf16, #tpu.memory_space<vmem>>, vector<64x64xbf16>
    %cst_45 = arith.constant dense<0.000000e+00> : vector<160x64xf32>
    %83 = tpu.matmul %81, %82, %cst_45 {dimension_numbers = #tpu.dot_dimension_numbers<[1], [0], [0], [1], [0, 0, 1, 1], [], []>} : vector<160x64xbf16>, vector<64x64xbf16>, vector<160x64xf32> -> vector<160x64xf32>
    %84 = arith.addf %79, %83 : vector<160x64xf32>
    %c1_i32_46 = arith.constant 1 : i32
    %85 = tpu.dynamic_rotate %68 by %c1_i32_46 dim 0 : vector<160x64xf32>, i32 -> vector<160x64xf32>
    %86 = arith.truncf %85 : vector<160x64xf32> to vector<160x64xbf16>
    %c192_47 = arith.constant 192 : index
    %c0_48 = arith.constant 0 : index
    %87 = vector.load %arg8[%c192_47, %c0_48] : memref<576x64xbf16, #tpu.memory_space<vmem>>, vector<64x64xbf16>
    %cst_49 = arith.constant dense<0.000000e+00> : vector<160x64xf32>
    %88 = tpu.matmul %86, %87, %cst_49 {dimension_numbers = #tpu.dot_dimension_numbers<[1], [0], [0], [1], [0, 0, 1, 1], [], []>} : vector<160x64xbf16>, vector<64x64xbf16>, vector<160x64xf32> -> vector<160x64xf32>
    %89 = arith.addf %84, %88 : vector<160x64xf32>
    %90 = arith.truncf %68 : vector<160x64xf32> to vector<160x64xbf16>
    %c256_50 = arith.constant 256 : index
    %c0_51 = arith.constant 0 : index
    %91 = vector.load %arg8[%c256_50, %c0_51] : memref<576x64xbf16, #tpu.memory_space<vmem>>, vector<64x64xbf16>
    %cst_52 = arith.constant dense<0.000000e+00> : vector<160x64xf32>
    %92 = tpu.matmul %90, %91, %cst_52 {dimension_numbers = #tpu.dot_dimension_numbers<[1], [0], [0], [1], [0, 0, 1, 1], [], []>} : vector<160x64xbf16>, vector<64x64xbf16>, vector<160x64xf32> -> vector<160x64xf32>
    %93 = arith.addf %89, %92 : vector<160x64xf32>
    %c159_i32_53 = arith.constant 159 : i32
    %94 = tpu.dynamic_rotate %68 by %c159_i32_53 dim 0 : vector<160x64xf32>, i32 -> vector<160x64xf32>
    %95 = arith.truncf %94 : vector<160x64xf32> to vector<160x64xbf16>
    %c320_54 = arith.constant 320 : index
    %c0_55 = arith.constant 0 : index
    %96 = vector.load %arg8[%c320_54, %c0_55] : memref<576x64xbf16, #tpu.memory_space<vmem>>, vector<64x64xbf16>
    %cst_56 = arith.constant dense<0.000000e+00> : vector<160x64xf32>
    %97 = tpu.matmul %95, %96, %cst_56 {dimension_numbers = #tpu.dot_dimension_numbers<[1], [0], [0], [1], [0, 0, 1, 1], [], []>} : vector<160x64xbf16>, vector<64x64xbf16>, vector<160x64xf32> -> vector<160x64xf32>
    %98 = arith.addf %93, %97 : vector<160x64xf32>
    %c145_i32_57 = arith.constant 145 : i32
    %99 = tpu.dynamic_rotate %68 by %c145_i32_57 dim 0 : vector<160x64xf32>, i32 -> vector<160x64xf32>
    %100 = arith.truncf %99 : vector<160x64xf32> to vector<160x64xbf16>
    %c384_58 = arith.constant 384 : index
    %c0_59 = arith.constant 0 : index
    %101 = vector.load %arg8[%c384_58, %c0_59] : memref<576x64xbf16, #tpu.memory_space<vmem>>, vector<64x64xbf16>
    %cst_60 = arith.constant dense<0.000000e+00> : vector<160x64xf32>
    %102 = tpu.matmul %100, %101, %cst_60 {dimension_numbers = #tpu.dot_dimension_numbers<[1], [0], [0], [1], [0, 0, 1, 1], [], []>} : vector<160x64xbf16>, vector<64x64xbf16>, vector<160x64xf32> -> vector<160x64xf32>
    %103 = arith.addf %98, %102 : vector<160x64xf32>
    %c144_i32_61 = arith.constant 144 : i32
    %104 = tpu.dynamic_rotate %68 by %c144_i32_61 dim 0 : vector<160x64xf32>, i32 -> vector<160x64xf32>
    %105 = arith.truncf %104 : vector<160x64xf32> to vector<160x64xbf16>
    %c448_62 = arith.constant 448 : index
    %c0_63 = arith.constant 0 : index
    %106 = vector.load %arg8[%c448_62, %c0_63] : memref<576x64xbf16, #tpu.memory_space<vmem>>, vector<64x64xbf16>
    %cst_64 = arith.constant dense<0.000000e+00> : vector<160x64xf32>
    %107 = tpu.matmul %105, %106, %cst_64 {dimension_numbers = #tpu.dot_dimension_numbers<[1], [0], [0], [1], [0, 0, 1, 1], [], []>} : vector<160x64xbf16>, vector<64x64xbf16>, vector<160x64xf32> -> vector<160x64xf32>
    %108 = arith.addf %103, %107 : vector<160x64xf32>
    %c143_i32_65 = arith.constant 143 : i32
    %109 = tpu.dynamic_rotate %68 by %c143_i32_65 dim 0 : vector<160x64xf32>, i32 -> vector<160x64xf32>
    %110 = arith.truncf %109 : vector<160x64xf32> to vector<160x64xbf16>
    %c512_66 = arith.constant 512 : index
    %c0_67 = arith.constant 0 : index
    %111 = vector.load %arg8[%c512_66, %c0_67] : memref<576x64xbf16, #tpu.memory_space<vmem>>, vector<64x64xbf16>
    %cst_68 = arith.constant dense<0.000000e+00> : vector<160x64xf32>
    %112 = tpu.matmul %110, %111, %cst_68 {dimension_numbers = #tpu.dot_dimension_numbers<[1], [0], [0], [1], [0, 0, 1, 1], [], []>} : vector<160x64xbf16>, vector<64x64xbf16>, vector<160x64xf32> -> vector<160x64xf32>
    %113 = arith.addf %108, %112 : vector<160x64xf32>
    %c0_69 = arith.constant 0 : index
    %c0_70 = arith.constant 0 : index
    %114 = vector.load %arg9[%c0_69, %c0_70] : memref<1x64xf32, #tpu.memory_space<vmem>>, vector<1x64xf32>
    %115 = vector.broadcast %114 : vector<1x64xf32> to vector<160x64xf32>
    %116 = arith.addf %113, %115 : vector<160x64xf32>
    %cst_71 = arith.constant 0.000000e+00 : f32
    %117 = vector.broadcast %cst_71 : f32 to vector<160x64xf32>
    %118 = arith.cmpf ogt, %116, %117 : vector<160x64xf32>
    %cst_72 = arith.constant 0.00999999977 : f32
    %119 = vector.broadcast %cst_72 : f32 to vector<160x64xf32>
    %120 = arith.mulf %119, %116 : vector<160x64xf32>
    %121 = arith.select %118, %116, %120 : vector<160x64xi1>, vector<160x64xf32>
    %122 = vector.broadcast %0 : vector<160x1xf32> to vector<160x64xf32>
    %123 = arith.mulf %121, %122 : vector<160x64xf32>
    %c0_73 = arith.constant 0 : index
    %c0_74 = arith.constant 0 : index
    %124 = vector.load %arg10[%c0_73, %c0_74] : memref<64x3xf32, #tpu.memory_space<vmem>>, vector<64x3xf32>
    %cst_75 = arith.constant dense<0.000000e+00> : vector<160x3xf32>
    %125 = tpu.matmul %123, %124, %cst_75 {dimension_numbers = #tpu.dot_dimension_numbers<[1], [0], [0], [1], [0, 0, 1, 1], [], []>} : vector<160x64xf32>, vector<64x3xf32>, vector<160x3xf32> -> vector<160x3xf32>
    %c0_76 = arith.constant 0 : index
    %c0_77 = arith.constant 0 : index
    %126 = vector.load %arg11[%c0_76, %c0_77] : memref<1x3xf32, #tpu.memory_space<vmem>>, vector<1x3xf32>
    %127 = vector.broadcast %126 : vector<1x3xf32> to vector<160x3xf32>
    %128 = arith.addf %125, %127 : vector<160x3xf32>
    %cst_78 = arith.constant 0.000000e+00 : f32
    %129 = vector.broadcast %cst_78 : f32 to vector<160x3xf32>
    %130 = arith.maximumf %128, %129 : vector<160x3xf32>
    %131 = math.absf %128 : vector<160x3xf32>
    %cst_79 = arith.constant 0.000000e+00 : f32
    %132 = vector.broadcast %cst_79 : f32 to vector<160x3xf32>
    %133 = arith.subf %132, %131 : vector<160x3xf32>
    %134 = math.exp %133 : vector<160x3xf32>
    %cst_80 = arith.constant 1.000000e+00 : f32
    %135 = vector.broadcast %cst_80 : f32 to vector<160x3xf32>
    %136 = arith.addf %135, %134 : vector<160x3xf32>
    %137 = math.log %136 : vector<160x3xf32>
    %138 = arith.addf %130, %137 : vector<160x3xf32>
    %139 = math.tanh %138 : vector<160x3xf32>
    %140 = arith.mulf %128, %139 : vector<160x3xf32>
    %c0_81 = arith.constant 0 : index
    %c0_82 = arith.constant 0 : index
    %c0_83 = arith.constant 0 : index
    %141 = vector.load %arg2[%c0_81, %c0_82, %c0_83] : memref<1x1x7xf32, #tpu.memory_space<vmem>>, vector<1x1x7xf32>
    %142 = vector.shape_cast %141 : vector<1x1x7xf32> to vector<1x7xf32>
    %143 = vector.extract_strided_slice %140 {offsets = [0, 0], sizes = [160, 1], strides = [1, 1]} : vector<160x3xf32> to vector<160x1xf32>
    %c0_84 = arith.constant 0 : index
    %c0_85 = arith.constant 0 : index
    %144 = vector.load %arg12[%c0_84, %c0_85] : memref<160x128xf32, #tpu.memory_space<vmem>>, vector<160x128xf32>
    %145 = vector.broadcast %143 : vector<160x1xf32> to vector<160x128xf32>
    %146 = arith.mulf %145, %144 : vector<160x128xf32>
    %147 = vector.extract_strided_slice %140 {offsets = [0, 1], sizes = [160, 1], strides = [1, 1]} : vector<160x3xf32> to vector<160x1xf32>
    %c0_86 = arith.constant 0 : index
    %c0_87 = arith.constant 0 : index
    %148 = vector.load %arg13[%c0_86, %c0_87] : memref<160x128xf32, #tpu.memory_space<vmem>>, vector<160x128xf32>
    %149 = vector.broadcast %147 : vector<160x1xf32> to vector<160x128xf32>
    %150 = arith.mulf %149, %148 : vector<160x128xf32>
    %151 = arith.addf %146, %150 : vector<160x128xf32>
    %cst_88 = arith.constant dense<0.000000e+00> : vector<128xf32>
    %152 = vector.multi_reduction <add>, %151, %cst_88 [0] : vector<160x128xf32> to vector<128xf32>
    %153 = vector.shape_cast %152 : vector<128xf32> to vector<1x128xf32>
    %c0_89 = arith.constant 0 : index
    %c0_90 = arith.constant 0 : index
    %154 = vector.load %arg15[%c0_89, %c0_90] : memref<7x128xf32, #tpu.memory_space<vmem>>, vector<7x128xf32>
    %cst_91 = arith.constant dense<0.000000e+00> : vector<1x128xf32>
    %155 = tpu.matmul %142, %154, %cst_91 {dimension_numbers = #tpu.dot_dimension_numbers<[1], [0], [0], [1], [0, 0, 1, 1], [], []>} : vector<1x7xf32>, vector<7x128xf32>, vector<1x128xf32> -> vector<1x128xf32>
    %156 = arith.addf %153, %155 : vector<1x128xf32>
    %c0_92 = arith.constant 0 : index
    %c0_93 = arith.constant 0 : index
    %157 = vector.load %arg16[%c0_92, %c0_93] : memref<1x128xf32, #tpu.memory_space<vmem>>, vector<1x128xf32>
    %158 = arith.addf %156, %157 : vector<1x128xf32>
    %cst_94 = arith.constant 0.000000e+00 : f32
    %159 = vector.broadcast %cst_94 : f32 to vector<1x128xf32>
    %160 = arith.cmpf ogt, %158, %159 : vector<1x128xf32>
    %cst_95 = arith.constant 0.00999999977 : f32
    %161 = vector.broadcast %cst_95 : f32 to vector<1x128xf32>
    %162 = arith.mulf %161, %158 : vector<1x128xf32>
    %163 = arith.select %160, %158, %162 : vector<1x128xi1>, vector<1x128xf32>
    %c0_96 = arith.constant 0 : index
    %c0_97 = arith.constant 0 : index
    %164 = vector.load %arg17[%c0_96, %c0_97] : memref<128x16xf32, #tpu.memory_space<vmem>>, vector<128x16xf32>
    %cst_98 = arith.constant dense<0.000000e+00> : vector<1x16xf32>
    %165 = tpu.matmul %163, %164, %cst_98 {dimension_numbers = #tpu.dot_dimension_numbers<[1], [0], [0], [1], [0, 0, 1, 1], [], []>} : vector<1x128xf32>, vector<128x16xf32>, vector<1x16xf32> -> vector<1x16xf32>
    %c0_99 = arith.constant 0 : index
    %c0_100 = arith.constant 0 : index
    %166 = vector.load %arg18[%c0_99, %c0_100] : memref<1x16xf32, #tpu.memory_space<vmem>>, vector<1x16xf32>
    %167 = arith.addf %165, %166 : vector<1x16xf32>
    %cst_101 = arith.constant dense<0xFF800000> : vector<1xf32>
    %168 = vector.multi_reduction <maximumf>, %167, %cst_101 [1] : vector<1x16xf32> to vector<1xf32>
    %169 = vector.shape_cast %168 : vector<1xf32> to vector<1x1xf32>
    %170 = vector.broadcast %169 : vector<1x1xf32> to vector<1x16xf32>
    %171 = arith.subf %167, %170 : vector<1x16xf32>
    %172 = math.exp %171 : vector<1x16xf32>
    %cst_102 = arith.constant dense<0.000000e+00> : vector<1xf32>
    %173 = vector.multi_reduction <add>, %172, %cst_102 [1] : vector<1x16xf32> to vector<1xf32>
    %174 = vector.shape_cast %173 : vector<1xf32> to vector<1x1xf32>
    %175 = math.log %174 : vector<1x1xf32>
    %176 = vector.broadcast %175 : vector<1x1xf32> to vector<1x16xf32>
    %177 = arith.subf %171, %176 : vector<1x16xf32>
    %c0_103 = arith.constant 0 : index
    %c0_104 = arith.constant 0 : index
    %c0_105 = arith.constant 0 : index
    %178 = vector.load %arg25[%c0_103, %c0_104, %c0_105] : memref<1x1x16xf32, #tpu.memory_space<vmem>>, vector<1x1x16xf32>
    %179 = vector.shape_cast %178 : vector<1x1x16xf32> to vector<1x16xf32>
    %180 = vector.shape_cast %177 : vector<1x16xf32> to vector<1x1x16xf32>
    tpu.vector_store %arg25[%c0_103, %c0_104, %c0_105], %180 {strides = array<i32>} : memref<1x1x16xf32, #tpu.memory_space<vmem>>, vector<1x1x16xf32>,
    %181 = vector.extract_strided_slice %140 {offsets = [0, 2], sizes = [160, 1], strides = [1, 1]} : vector<160x3xf32> to vector<160x1xf32>
    %c0_106 = arith.constant 0 : index
    %c0_107 = arith.constant 0 : index
    %182 = vector.load %arg14[%c0_106, %c0_107] : memref<160x128xf32, #tpu.memory_space<vmem>>, vector<160x128xf32>
    %183 = vector.broadcast %181 : vector<160x1xf32> to vector<160x128xf32>
    %184 = arith.mulf %183, %182 : vector<160x128xf32>
    %cst_108 = arith.constant dense<0.000000e+00> : vector<128xf32>
    %185 = vector.multi_reduction <add>, %184, %cst_108 [0] : vector<160x128xf32> to vector<128xf32>
    %186 = vector.shape_cast %185 : vector<128xf32> to vector<1x128xf32>
    %c0_109 = arith.constant 0 : index
    %c0_110 = arith.constant 0 : index
    %187 = vector.load %arg19[%c0_109, %c0_110] : memref<7x128xf32, #tpu.memory_space<vmem>>, vector<7x128xf32>
    %cst_111 = arith.constant dense<0.000000e+00> : vector<1x128xf32>
    %188 = tpu.matmul %142, %187, %cst_111 {dimension_numbers = #tpu.dot_dimension_numbers<[1], [0], [0], [1], [0, 0, 1, 1], [], []>} : vector<1x7xf32>, vector<7x128xf32>, vector<1x128xf32> -> vector<1x128xf32>
    %189 = arith.addf %186, %188 : vector<1x128xf32>
    %c0_112 = arith.constant 0 : index
    %c0_113 = arith.constant 0 : index
    %190 = vector.load %arg20[%c0_112, %c0_113] : memref<1x128xf32, #tpu.memory_space<vmem>>, vector<1x128xf32>
    %191 = arith.addf %189, %190 : vector<1x128xf32>
    %192 = math.tanh %191 : vector<1x128xf32>
    %c0_114 = arith.constant 0 : index
    %c0_115 = arith.constant 0 : index
    %193 = vector.load %arg21[%c0_114, %c0_115] : memref<128x64xf32, #tpu.memory_space<vmem>>, vector<128x64xf32>
    %cst_116 = arith.constant dense<0.000000e+00> : vector<1x64xf32>
    %194 = tpu.matmul %192, %193, %cst_116 {dimension_numbers = #tpu.dot_dimension_numbers<[1], [0], [0], [1], [0, 0, 1, 1], [], []>} : vector<1x128xf32>, vector<128x64xf32>, vector<1x64xf32> -> vector<1x64xf32>
    %c0_117 = arith.constant 0 : index
    %c0_118 = arith.constant 0 : index
    %195 = vector.load %arg22[%c0_117, %c0_118] : memref<1x64xf32, #tpu.memory_space<vmem>>, vector<1x64xf32>
    %196 = arith.addf %194, %195 : vector<1x64xf32>
    %cst_119 = arith.constant 0.000000e+00 : f32
    %197 = vector.broadcast %cst_119 : f32 to vector<1x64xf32>
    %198 = arith.cmpf ogt, %196, %197 : vector<1x64xf32>
    %cst_120 = arith.constant 0.00999999977 : f32
    %199 = vector.broadcast %cst_120 : f32 to vector<1x64xf32>
    %200 = arith.mulf %199, %196 : vector<1x64xf32>
    %201 = arith.select %198, %196, %200 : vector<1x64xi1>, vector<1x64xf32>
    %c0_121 = arith.constant 0 : index
    %c0_122 = arith.constant 0 : index
    %202 = vector.load %arg23[%c0_121, %c0_122] : memref<64x1xf32, #tpu.memory_space<vmem>>, vector<64x1xf32>
    %cst_123 = arith.constant dense<0.000000e+00> : vector<1x1xf32>
    %203 = tpu.matmul %201, %202, %cst_123 {dimension_numbers = #tpu.dot_dimension_numbers<[1], [0], [0], [1], [0, 0, 1, 1], [], []>} : vector<1x64xf32>, vector<64x1xf32>, vector<1x1xf32> -> vector<1x1xf32>
    %c0_124 = arith.constant 0 : index
    %c0_125 = arith.constant 0 : index
    %204 = vector.load %arg24[%c0_124, %c0_125] : memref<1x1xf32, #tpu.memory_space<vmem>>, vector<1x1xf32>
    %205 = arith.addf %203, %204 : vector<1x1xf32>
    %206 = math.tanh %205 : vector<1x1xf32>
    %c0_126 = arith.constant 0 : index
    %c0_127 = arith.constant 0 : index
    %c0_128 = arith.constant 0 : index
    %207 = vector.load %arg26[%c0_126, %c0_127, %c0_128] : memref<1x1x1xf32, #tpu.memory_space<vmem>>, vector<1x1x1xf32>
    %208 = vector.shape_cast %207 : vector<1x1x1xf32> to vector<1x1xf32>
    %209 = vector.shape_cast %206 : vector<1x1xf32> to vector<1x1x1xf32>
    tpu.vector_store %arg26[%c0_126, %c0_127, %c0_128], %209 {strides = array<i32>} : memref<1x1x1xf32, #tpu.memory_space<vmem>>, vector<1x1x1xf32>,
    return
  }
  func.func @transform_0(%arg0: i32) -> (i32, i32) {
    %c0_i32 = arith.constant 0 : i32
    %c0_i32_0 = arith.constant 0 : i32
    return %arg0, %c0_i32 : i32, i32
  }
  func.func @transform_1(%arg0: i32) -> (i32, i32, i32) {
    %c0_i32 = arith.constant 0 : i32
    %c0_i32_0 = arith.constant 0 : i32
    %c0_i32_1 = arith.constant 0 : i32
    return %arg0, %c0_i32, %c0_i32_0 : i32, i32, i32
  }
  func.func @transform_2(%arg0: i32) -> (i32, i32) {
    %c0_i32 = arith.constant 0 : i32
    %c0_i32_0 = arith.constant 0 : i32
    %c0_i32_1 = arith.constant 0 : i32
    return %c0_i32, %c0_i32_0 : i32, i32
  }
  func.func @transform_3(%arg0: i32) -> (i32, i32) {
    %c0_i32 = arith.constant 0 : i32
    %c0_i32_0 = arith.constant 0 : i32
    %c0_i32_1 = arith.constant 0 : i32
    return %c0_i32, %c0_i32_0 : i32, i32
  }
  func.func @transform_4(%arg0: i32) -> (i32, i32) {
    %c0_i32 = arith.constant 0 : i32
    %c0_i32_0 = arith.constant 0 : i32
    %c0_i32_1 = arith.constant 0 : i32
    return %c0_i32, %c0_i32_0 : i32, i32
  }
  func.func @transform_5(%arg0: i32) -> (i32, i32) {
    %c0_i32 = arith.constant 0 : i32
    %c0_i32_0 = arith.constant 0 : i32
    %c0_i32_1 = arith.constant 0 : i32
    return %c0_i32, %c0_i32_0 : i32, i32
  }
  func.func @transform_6(%arg0: i32) -> (i32, i32) {
    %c0_i32 = arith.constant 0 : i32
    %c0_i32_0 = arith.constant 0 : i32
    %c0_i32_1 = arith.constant 0 : i32
    return %c0_i32, %c0_i32_0 : i32, i32
  }
  func.func @transform_7(%arg0: i32) -> (i32, i32) {
    %c0_i32 = arith.constant 0 : i32
    %c0_i32_0 = arith.constant 0 : i32
    %c0_i32_1 = arith.constant 0 : i32
    return %c0_i32, %c0_i32_0 : i32, i32
  }
  func.func @transform_8(%arg0: i32) -> (i32, i32) {
    %c0_i32 = arith.constant 0 : i32
    %c0_i32_0 = arith.constant 0 : i32
    %c0_i32_1 = arith.constant 0 : i32
    return %c0_i32, %c0_i32_0 : i32, i32
  }
  func.func @transform_9(%arg0: i32) -> (i32, i32) {
    %c0_i32 = arith.constant 0 : i32
    %c0_i32_0 = arith.constant 0 : i32
    %c0_i32_1 = arith.constant 0 : i32
    return %c0_i32, %c0_i32_0 : i32, i32
  }
  func.func @transform_10(%arg0: i32) -> (i32, i32) {
    %c0_i32 = arith.constant 0 : i32
    %c0_i32_0 = arith.constant 0 : i32
    %c0_i32_1 = arith.constant 0 : i32
    return %c0_i32, %c0_i32_0 : i32, i32
  }
  func.func @transform_11(%arg0: i32) -> (i32, i32) {
    %c0_i32 = arith.constant 0 : i32
    %c0_i32_0 = arith.constant 0 : i32
    %c0_i32_1 = arith.constant 0 : i32
    return %c0_i32, %c0_i32_0 : i32, i32
  }
  func.func @transform_12(%arg0: i32) -> (i32, i32) {
    %c0_i32 = arith.constant 0 : i32
    %c0_i32_0 = arith.constant 0 : i32
    %c0_i32_1 = arith.constant 0 : i32
    return %c0_i32, %c0_i32_0 : i32, i32
  }
  func.func @transform_13(%arg0: i32) -> (i32, i32) {
    %c0_i32 = arith.constant 0 : i32
    %c0_i32_0 = arith.constant 0 : i32
    %c0_i32_1 = arith.constant 0 : i32
    return %c0_i32, %c0_i32_0 : i32, i32
  }
  func.func @transform_14(%arg0: i32) -> (i32, i32) {
    %c0_i32 = arith.constant 0 : i32
    %c0_i32_0 = arith.constant 0 : i32
    %c0_i32_1 = arith.constant 0 : i32
    return %c0_i32, %c0_i32_0 : i32, i32
  }
  func.func @transform_15(%arg0: i32) -> (i32, i32) {
    %c0_i32 = arith.constant 0 : i32
    %c0_i32_0 = arith.constant 0 : i32
    %c0_i32_1 = arith.constant 0 : i32
    return %c0_i32, %c0_i32_0 : i32, i32
  }
  func.func @transform_16(%arg0: i32) -> (i32, i32) {
    %c0_i32 = arith.constant 0 : i32
    %c0_i32_0 = arith.constant 0 : i32
    %c0_i32_1 = arith.constant 0 : i32
    return %c0_i32, %c0_i32_0 : i32, i32
  }
  func.func @transform_17(%arg0: i32) -> (i32, i32) {
    %c0_i32 = arith.constant 0 : i32
    %c0_i32_0 = arith.constant 0 : i32
    %c0_i32_1 = arith.constant 0 : i32
    return %c0_i32, %c0_i32_0 : i32, i32
  }
  func.func @transform_18(%arg0: i32) -> (i32, i32) {
    %c0_i32 = arith.constant 0 : i32
    %c0_i32_0 = arith.constant 0 : i32
    %c0_i32_1 = arith.constant 0 : i32
    return %c0_i32, %c0_i32_0 : i32, i32
  }
  func.func @transform_19(%arg0: i32) -> (i32, i32) {
    %c0_i32 = arith.constant 0 : i32
    %c0_i32_0 = arith.constant 0 : i32
    %c0_i32_1 = arith.constant 0 : i32
    return %c0_i32, %c0_i32_0 : i32, i32
  }
  func.func @transform_20(%arg0: i32) -> (i32, i32) {
    %c0_i32 = arith.constant 0 : i32
    %c0_i32_0 = arith.constant 0 : i32
    %c0_i32_1 = arith.constant 0 : i32
    return %c0_i32, %c0_i32_0 : i32, i32
  }
  func.func @transform_21(%arg0: i32) -> (i32, i32) {
    %c0_i32 = arith.constant 0 : i32
    %c0_i32_0 = arith.constant 0 : i32
    %c0_i32_1 = arith.constant 0 : i32
    return %c0_i32, %c0_i32_0 : i32, i32
  }
  func.func @transform_22(%arg0: i32) -> (i32, i32) {
    %c0_i32 = arith.constant 0 : i32
    %c0_i32_0 = arith.constant 0 : i32
    %c0_i32_1 = arith.constant 0 : i32
    return %c0_i32, %c0_i32_0 : i32, i32
  }
  func.func @transform_23(%arg0: i32) -> (i32, i32) {
    %c0_i32 = arith.constant 0 : i32
    %c0_i32_0 = arith.constant 0 : i32
    %c0_i32_1 = arith.constant 0 : i32
    return %c0_i32, %c0_i32_0 : i32, i32
  }
  func.func @transform_24(%arg0: i32) -> (i32, i32, i32) {
    %c0_i32 = arith.constant 0 : i32
    %c0_i32_0 = arith.constant 0 : i32
    %c0_i32_1 = arith.constant 0 : i32
    return %arg0, %c0_i32, %c0_i32_0 : i32, i32, i32
  }
  func.func @transform_25(%arg0: i32) -> (i32, i32, i32) {
    %c0_i32 = arith.constant 0 : i32
    %c0_i32_0 = arith.constant 0 : i32
    %c0_i32_1 = arith.constant 0 : i32
    return %arg0, %c0_i32, %c0_i32_0 : i32, i32, i32
  }
}

</mosaic_0001>

<bundles_post_ra>
// kernel: alphazero_forward.1
= control target key start
LH: loop header
LB: loop body
LE: loop exit
PB: predicated region body
PF: predicated region fallthrough
CT: control target
= control target key end

     0   :  { %s10644_s0 = inlined_call_operand.vmem [shape: bf16[320,36], index: 0, kind: input, shape index: {}]   ;;  %s10645_s1 = inlined_call_operand.vmem [shape: f32[2,1,7], index: 1, kind: input, shape index: {}]   ;;  %s10646_s2 = inlined_call_operand.vmem [shape: f32[160,1], index: 2, kind: input, shape index: {}]   ;;  %s10647_s3 = inlined_call_operand.vmem [shape: bf16[36,64], index: 3, kind: input, shape index: {}]   ;;  %s10648_s4 = inlined_call_operand.vmem [shape: f32[1,64], index: 4, kind: input, shape index: {}]   ;;  %s10649_s5 = inlined_call_operand.vmem [shape: bf16[576,64], index: 5, kind: input, shape index: {}]   ;;  %s10650_s6 = inlined_call_operand.vmem [shape: f32[1,64], index: 6, kind: input, shape index: {}]   ;;  %s10651_s7 = inlined_call_operand.vmem [shape: bf16[576,64], index: 7, kind: input, shape index: {}]   ;;  %s10652_s8 = inlined_call_operand.vmem [shape: f32[1,64], index: 8, kind: input, shape index: {}]   ;;  %s10653_s9 = inlined_call_operand.vmem [shape: f32[64,3], index: 9, kind: input, shape index: {}]   ;;  %s10654_s10 = inlined_call_operand.vmem [shape: f32[1,3], index: 10, kind: input, shape index: {}]   ;;  %s10655_s11 = inlined_call_operand.vmem [shape: f32[160,128], index: 11, kind: input, shape index: {}]   ;;  %s10656_s12 = inlined_call_operand.vmem [shape: f32[160,128], index: 12, kind: input, shape index: {}]   ;;  %s10657_s13 = inlined_call_operand.vmem [shape: f32[160,128], index: 13, kind: input, shape index: {}]   ;;  %s10658_s14 = inlined_call_operand.vmem [shape: f32[7,128], index: 14, kind: input, shape index: {}]   ;;  %s10659_s15 = inlined_call_operand.vmem [shape: f32[1,128], index: 15, kind: input, shape index: {}]   ;;  %s10660_s16 = inlined_call_operand.vmem [shape: f32[128,16], index: 16, kind: input, shape index: {}]   ;;  %s10661_s17 = inlined_call_operand.vmem [shape: f32[1,16], index: 17, kind: input, shape index: {}]   ;;  %s10662_s18 = inlined_call_operand.vmem [shape: f32[7,128], index: 18, kind: input, shape index: {}]   ;;  %s10663_s19 = inlined_call_operand.vmem [shape: f32[1,128], index: 19, kind: input, shape index: {}]   ;;  %s10664_s20 = inlined_call_operand.vmem [shape: f32[128,64], index: 20, kind: input, shape index: {}]   ;;  %s10665_s21 = inlined_call_operand.vmem [shape: f32[1,64], index: 21, kind: input, shape index: {}]   ;;  %s10666_s22 = inlined_call_operand.vmem [shape: f32[64,1], index: 22, kind: input, shape index: {}]   ;;  %s10667_s23 = inlined_call_operand.<no memory space> [shape: f32[1,1], index: 23, kind: input, shape index: {}]   ;;  %s10668_s24 = inlined_call_operand.hbm [shape: f32[2,1,16], index: 24, kind: output, shape index: {0}]   ;;  %s10669_s25 = inlined_call_operand.vmem [shape: f32[2,1,1], index: 25, kind: output, shape index: {1}]  }
   0x1   :  { %10715 = sst [smem:[#allocation23_spill]] %s10644_s0  ;;  %v31_v0 = vstv %s10667_s23 }
   0x2   :  { %10716 = sst [smem:[#allocation24_spill]] %s10645_s1  ;;  %32 = vst [vmem:[#allocation2] sm:$0x1] %v31_v0 }
   0x3   :  { %10717 = sst [smem:[#allocation25_spill]] %s10646_s2 }
   0x4   :  { %10718 = sst [smem:[#allocation26_spill]] %s10647_s3 }
   0x5   :  { %10719 = sst [smem:[#allocation27_spill]] %s10648_s4 }
   0x6   :  { %10720 = sst [smem:[#allocation28_spill]] %s10649_s5 }
   0x7   :  { %10721 = sst [smem:[#allocation29_spill]] %s10650_s6 }
   0x8   :  { %10722 = sst [smem:[#allocation30_spill]] %s10651_s7 }
   0x9   :  { %10723 = sst [smem:[#allocation31_spill]] %s10652_s8 }
   0xa   :  { %10724 = sst [smem:[#allocation32_spill]] %s10653_s9 }
   0xb   :  { %10725 = sst [smem:[#allocation33_spill]] %s10654_s10 }
   0xc   :  { %10726 = sst [smem:[#allocation34_spill]] %s10655_s11 }
   0xd   :  { %10727 = sst [smem:[#allocation35_spill]] %s10658_s14 }
   0xe   :  { %10728 = sst [smem:[#allocation36_spill]] %s10660_s16 }
   0xf   :  { %33 = vsyncpa [#allocation4], 0 }
  0x10   :  { %35 = vsyncpa [#allocation4 + $0x1], 0  ;;  %s8390_s6 = smov 0   ;;  %s8392_s30 = smov 0  }
  0x11   :  { %s8394_s7 = smov 0   ;;  %s8396_s3 = smov 0  }
  0x12 LB: > { %10729 = sst [smem:[#allocation6_spill]] %s8236_s6  ;;  %s8411_s23 = sadd.s32 4294967295, %s8248_s3   ;;  %s8248_s3 = sphi %s8396_s3, %s10869_s3   ;;  %s8244_s7 = sphi %s8394_s7, %s10871_s7   ;;  %s8240_s30 = sphi %s8392_s30, %s10873_s30   ;;  %s8236_s6 = sphi %s8390_s6, %s10872_s6  }
  0x13   : > { %10730 = sst [smem:[#allocation7_spill]] %s8244_s7  ;;  %s6196_s26 = sadd.s32 4294967294, %s8248_s3  }
  0x14   : > { %s8415_s1 = sadd.s32 1, %s8248_s3   ;;  %s562_s8 = sadd.s32 1, %s8244_s7 }
  0x15   : > { %10731 = sst [smem:[#allocation8_spill]] %s8415_s1  ;;  %s559_s27 = ssub.s32 %s8248_s3, %s8415_s1 }
  0x16   : > { %p572_p0 = scmp.ne.s32.totalorder %s8244_s7, %s8240_s30  ;;  %p560_p1 = scmp.eq.s32.totalorder %s559_s27, 0 }
  0x17   : > { %p573_p2 = scmp.eq.s32.totalorder %s8411_s23, 1  ;;  %p578_p3 = scmp.ne.s32.totalorder %s8240_s30, %s8236_s6 }
  0x18   : > { %p579_p4 = scmp.eq.s32.totalorder %s6196_s26, 1  ;;  %p6199_p7 = scmp.ge.s32.totalorder %s8248_s3, 1 }
  0x19   : > { %s8426_s4 = scalar_select %p560_p1, %s8244_s7, %s562_s8  }
  0x1a   : > { %p8428_p5 = por %p573_p2, %p572_p0  ;;  %p8432_p6 = por %p579_p4, %p578_p3 }
  0x1b   : > { %10732 = sst [smem:[#allocation9_spill]] %s8426_s4  ;;  %p704_p8 = scmp.lt.s32.totalorder %s8248_s3, 3 }
  0x1c   : > { %s10734_s9 = scalar_select %p8432_p6, 1, 0 }
  0x1d   : > { %p705_p9 = pnand %p6199_p7, %p704_p8 }
  0x1e   : > { %10735 = sst [smem:[#allocation10_spill]] %s10734_s9 }
  0x1f   : > { %708 = sbr.rel (%p705_p9) target bundleno = 2599 (0xa27), region = 116 }
  0x26   : > { %s10736_s29 = sld [smem:[#allocation26_spill]]  ;;  %s777_s8 = smul.u32 20, %s8411_s23  ;;  %v10681_v6 = vmov 0   ;;  %vm938_vm0 = vcmask 1041408   ;;  %vm907_vm1 = vcmask 293888   ;;  %v1255_v48 = vlaneseq }
  0x27   : > { %s10737_s7 = sld [smem:[#allocation25_spill]]  ;;  %7965 = vset.pattern.permute.xlu0 %v10681_v6  ;;  %7966 = vset.pattern.permute.xlu1 %v10681_v6  ;;  %s10739_s5 = sld [smem:[#allocation23_spill]] }
  0x28   : > { %p778_p10 = scmp.lt.s32.totalorder %s777_s8, 39  ;;  %v8577_v59 = vshrl.u32 %v1255_v48, 7  ;;  %s10798_s27 = sld [smem:[#allocation30_spill]] }
  0x29   : > { %s10799_s4 = sld [smem:[#allocation29_spill]]  ;;  %s10848_s26 = sld [smem:[#allocation32_spill]] }
  0x2a   : > { %s10875_s8 = smov (!%p778_p10, %s777_s8), 39  ;;  %vm1257_vm6 = vcmp.lt.s32.totalorder %v8577_v59, 1  ;;  %vm1669_vm7 = vcmp.lt.s32.totalorder %v8577_v59, 7  ;;  %s10861_s14 = sld [smem:[#allocation35_spill]] }
  0x2b   : > { %s6200_s6 = sshll.u32 %s10875_s8, 2  ;;  %p783_p11 = scmp.lt.s32.totalorder %s8411_s23, 1 }
  0x2c   : > { %v7972_v1 = vld [vmem:[%s10736_s29] sm:$0xff]   ;;  %v7973_v2 = vld [vmem:[%s10736_s29 + $0x8] sm:$0xff]   ;;  %v7974_v5 = vld [vmem:[%s10736_s29 + $0x10] ss:$0 sps:$4 sm:$0x33]   ;;  %s10740_s29 = sld [smem:[#allocation28_spill]] }
  0x2d   : > { %6848 = vmatprep.subr.bf16.mxu0 %v7972_v1  ;;  %s10738_s1 = smov %s10737_s7  ;;  %v808_v3 = vld [vmem:[%s10737_s7 + $0x90] sm:$0xff]  ;;  %v940_v9 = vsel %vm938_vm0, %v7974_v5, 0  ;;  %s8465_s0 = scalar_lea.vmem %s10739_s5, %s6200_s6 }
  0x2e   : > { %6849 = vmatpush3.bf16.msra.mxu0 %v7972_v1  ;;  %v790_v4 = vld [vmem:[%s10738_s1] sm:$0xff]  ;;  %1207 = vperm.xlu0 %7965, %v808_v3   ;;  %v809_v7 = vld [vmem:[%s10738_s1 + $0x98] sm:$0xff]  ;;  %v791_v8 = vld [vmem:[%s10738_s1 + $0x8] sm:$0xff]  ;;  %s10743_s6 = sld [smem:[#allocation27_spill]]  ;;  %s10863_s10 = sld [smem:[#allocation33_spill]] }
  0x2f   : > { %6850 = vmatprep.subr.bf16.mxu0 %v7973_v2  ;;  %1117 = vperm.xlu1 %7966, %v790_v4   ;;  %v792_v10 = vld [vmem:[%s10738_s1 + $0x10] sm:$0xff]  ;;  %v7975_v11 = vld [vmem:[%s8465_s0] sm:$0xff]   ;;  %v793_v12 = vld [vmem:[%s10738_s1 + $0x18] sm:$0xff]  ;;  %s10865_s16 = sld [smem:[#allocation36_spill]]  ;;  %s10866_s11 = sld [smem:[#allocation34_spill]] }
  0x30   : > { %v7976_v13 = vld [vmem:[%s8465_s0 + $0x8] sm:$0xff]   ;;  %6854 = vmatprep.mubr.msk.bf16.mxu0 %vm907_vm1, %v7975_v11  ;;  %v7977_v14 = vld [vmem:[%s8465_s0 + $0x10] sm:$0xff]   ;;  %v794_v15 = vld [vmem:[%s10738_s1 + $0x20] sm:$0xff]  ;;  %s8256_s9 = smov [#allocation3]  }
  0x31   : > { %v795_v16 = vld [vmem:[%s10738_s1 + $0x28] sm:$0xff]  ;;  %v796_v17 = vld [vmem:[%s10738_s1 + $0x30] sm:$0xff]  ;;  %v7978_v18 = vld [vmem:[%s8465_s0 + $0x18] sm:$0xff]   ;;  %s8190_s2 = sshll.u32 %s8256_s9, 4  ;;  %s8191_s2 = int_to_ptr.vmem [resolvable:$false] %s8190_s2 }
  0x32   : > { %6851 = vmatpush3.bf16.msra.mxu0 %v7973_v2  ;;  %1212 = vperm.xlu0 %7965, %v809_v7   ;;  %v7979_v19 = vld [vmem:[%s8465_s0 + $0x20] sm:$0xff]   ;;  %v797_v20 = vld [vmem:[%s10738_s1 + $0x38] sm:$0xff]  ;;  %v799_v22 = vld [vmem:[%s10738_s1 + $0x48] sm:$0xff] }
  0x33   : > { %7919 = vmatprep.subr.msk.bf16.mxu0 %vm938_vm0, %v7974_v5  ;;  %1122 = vperm.xlu1 %7966, %v791_v8   ;;  %v798_v21 = vld [vmem:[%s10738_s1 + $0x40] sm:$0xff]  ;;  %v7980_v23 = vld [vmem:[%s8465_s0 + $0x28] sm:$0xff]   ;;  %v800_v24 = vld [vmem:[%s10738_s1 + $0x50] sm:$0xff] }
  0x34   : > { %v7981_v25 = vld [vmem:[%s8465_s0 + $0x30] sm:$0xff]   ;;  %v801_v26 = vld [vmem:[%s10738_s1 + $0x58] sm:$0xff]  ;;  %v802_v27 = vld [vmem:[%s10738_s1 + $0x60] sm:$0xff] }
  0x35   : > { %v803_v28 = vld [vmem:[%s10738_s1 + $0x68] sm:$0xff]  ;;  %v7982_v29 = vld [vmem:[%s8465_s0 + $0x38] sm:$0xff]   ;;  %v804_v30 = vld [vmem:[%s10738_s1 + $0x70] sm:$0xff] }
  0x36   : > { %6853 = vmatpush3.bf16.msra.mxu0 %v940_v9  ;;  %1127 = vperm.xlu0 %7965, %v792_v10   ;;  %v7983_v31 = vld [vmem:[%s8465_s0 + $0x40] sm:$0xff]   ;;  %v805_v32 = vld [vmem:[%s10738_s1 + $0x78] sm:$0xff]  ;;  %v807_v34 = vld [vmem:[%s10738_s1 + $0x88] sm:$0xff] }
  0x37   : > { %1132 = vperm.xlu1 %7966, %v793_v12   ;;  %v806_v33 = vld [vmem:[%s10738_s1 + $0x80] sm:$0xff]  ;;  %v7984_v35 = vld [vmem:[%s8465_s0 + $0x48] sm:$0xff]   ;;  %v7987_v38 = vld [vmem:[%s10740_s29 + $0x30] sm:$0xff]   ;;  %s10862_s0 = sld [smem:[#allocation24_spill]]  ;;  %s6505_s1 = sshll.u32 %s8411_s23, 4 }
  0x38   : > { %v7985_v36 = vld [vmem:[%s10740_s29 + $0x20] sm:$0xff]   ;;  %v7986_v37 = vld [vmem:[%s10740_s29 + $0x28] sm:$0xff]   ;;  %v7988_v39 = vld [vmem:[%s10740_s29 + $0x38] sm:$0xff]   ;;  %s10604_s7 = scalar_lea.hbm %s10668_s24, %s6505_s1 }
  0x39   : > { %6855 = vmatmul.mubr.msk.bf16.vlgmr.msra.gmra.mrb[0].mxu0 %vm907_vm1, %v7976_v13  ;;  %6874 = vmatprep.subr.bf16.mxu1 %v7985_v36  ;;  %v8550_v40 = vld [vmem:[%s10740_s29] sm:$0xff]   ;;  %v8030_v59 = vld [vmem:[%s10798_s27 + $0x48] sm:$0xff]  }
  0x3a   : > { %6858 = vmatprep.mubr.msk.bf16.mxu0 %vm907_vm1, %v7977_v14  ;;  %1137 = vperm.xlu0 %7965, %v794_v15   ;;  %v8568_v47 = vld [vmem:[%s10743_s6] ss:$0 sm:$0xff]  ;;  %s10019_s6 = scalar_select %p783_p11, %s8411_s23, 1 }
  0x3b   : > { %1142 = vperm.xlu1 %7966, %v795_v16   ;;  %6875 = vmatpush3.bf16.msra.mxu1 %v7985_v36 }
  0x3c   : > { %6876 = vmatprep.subr.bf16.mxu1 %v7986_v37 }
  0x3d   : > { %s10027_s5 = scalar_lea.vmem %s10862_s0, %s10019_s6  ;;  %s770_s0 = sand.u32 1, %s8240_s30  }
  0x3e   : > { %1147 = vperm.xlu0 %7965, %v796_v17  }
  0x3f   : > { %1152 = vperm.xlu1 %7966, %v797_v20   ;;  %6877 = vmatpush3.bf16.msra.mxu1 %v7986_v37 }
  0x40   : > { %6878 = vmatprep.subr.bf16.mxu1 %v7987_v38 }
  0x41   : > { %6859 = vmatmul.mubr.msk.bf16.gmra.mrb[4].mxu0 %vm907_vm1, %v7978_v18 }
  0x42   : > { %6862 = vmatprep.mubr.msk.bf16.mxu0 %vm907_vm1, %v7979_v19  ;;  %1157 = vperm.xlu0 %7965, %v798_v21  }
  0x43   : > { %1162 = vperm.xlu1 %7966, %v799_v22   ;;  %6879 = vmatpush3.bf16.msra.mxu1 %v7987_v38 }
  0x44   : > { %6880 = vmatprep.subr.bf16.mxu1 %v7988_v39 }
  0x46   : > { %1167 = vperm.xlu0 %7965, %v800_v24  }
  0x47   : > { %1172 = vperm.xlu1 %7966, %v801_v26   ;;  %6881 = vmatpush3.bf16.msra.mxu1 %v7988_v39 }
  0x48   : > { %6902 = vmatprep.subr.bf16.mxu1 %v8550_v40 }
  0x49   : > { %6863 = vmatmul.mubr.msk.bf16.gmra.mrb[8].mxu0 %vm907_vm1, %v7980_v23 }
  0x4a   : > { %6866 = vmatprep.mubr.msk.bf16.mxu0 %vm907_vm1, %v7981_v25  ;;  %1177 = vperm.xlu0 %7965, %v802_v27  }
  0x4b   : > { %1182 = vperm.xlu1 %7966, %v803_v28  }
  0x4e   : > { %1187 = vperm.xlu0 %7965, %v804_v30  }
  0x4f   : > { %1192 = vperm.xlu1 %7966, %v805_v32  }
  0x51   : > { %6867 = vmatmul.mubr.msk.bf16.gmra.mrb[12].mxu0 %vm907_vm1, %v7982_v29 }
  0x52   : > { %6870 = vmatprep.mubr.msk.bf16.mxu0 %vm907_vm1, %v7983_v31  ;;  %1197 = vperm.xlu0 %7965, %v806_v33  }
  0x53   : > { %1202 = vperm.xlu1 %7966, %v807_v34  }
  0x59   : > { %6871 = vmatmul.mubr.msk.bf16.gmra.mrb[16].mxu0 %vm907_vm1, %v7984_v35 }
  0xad   : > { %v8553_v41 = vpop.permute.xlu0 %1207 }
  0xae   : > { %10741 = vst [vmem:[#allocation11_spill] sm:$0xff] %v8553_v41  ;;  %v8555_v42 = vpop.permute.xlu1 %1117 }
  0xb1   : > { %v8557_v43 = vpop.permute.xlu0 %1212 }
  0xb2   : > { %10742 = vst [vmem:[#allocation12_spill] sm:$0xff] %v8557_v43  ;;  %v8559_v44 = vpop.permute.xlu1 %1122 }
  0xb5   : > { %v8561_v45 = vpop.permute.xlu0 %1127 }
  0xb6   : > { %v8563_v46 = vpop.permute.xlu1 %1132 }
  0xb9   : > { %v8570_v49 = vpop.permute.xlu0 %1137 }
  0xba   : > { %v8572_v51 = vpop.permute.xlu1 %1142 }
  0xbd   : > { %v8580_v0 = vpop.permute.xlu0 %1147 }
  0xbe   : > { %v8585_v4 = vpop.permute.xlu1 %1152 }
  0xc1   : > { %v8607_v26 = vpop.permute.xlu0 %1157 }
  0xc2   : > { %10744 = vst [vmem:[#allocation13_spill] sm:$0xff] %v8607_v26  ;;  %v8611_v30 = vpop.permute.xlu1 %1162 }
  0xc3   : > { %10745 = vst [vmem:[#allocation14_spill] sm:$0xff] %v8611_v30 }
 0x10c   : > { %v6856_v50 = vpop.f32.mrb[0].mxu0 }
 0x10d   : > { %v985_v52 = vadd.f32 %v6856_v50, %v8568_v47  ;;  %v976_v53 = vpop.f32.mrb[1].mxu0 }
 0x10e   : > { %v977_v54 = vadd.f32 %v8568_v47, %v976_v53  ;;  %v6857_v55 = vpop.f32.mrb[2].mxu0 }
 0x10f   : > { %vm1057_vm2 = vcmp.gt.f32.partialorder %v985_v52, 0.0  ;;  %v1077_v56 = vmul.f32 0.01, %v985_v52  ;;  %v988_v57 = vadd.f32 %v6857_v55, %v8568_v47  ;;  %v979_v58 = vpop.f32.mrb[3].mxu0 }
 0x110   : > { %vm1055_vm3 = vcmp.gt.f32.partialorder %v977_v54, 0.0  ;;  %v1075_v60 = vmul.f32 0.01, %v977_v54  ;;  %v980_v61 = vadd.f32 %v8568_v47, %v979_v58 }
 0x111   : > { %vm1058_vm4 = vcmp.gt.f32.partialorder %v988_v57, 0.0  ;;  %v1078_v62 = vmul.f32 0.01, %v988_v57  ;;  %v1097_v63 = vsel %vm1057_vm2, %v985_v52, %v1077_v56 }
 0x112   : > { %v1095_v1 = vsel %vm1055_vm3, %v977_v54, %v1075_v60  ;;  %vm1056_vm5 = vcmp.gt.f32.partialorder %v980_v61, 0.0  ;;  %v1076_v2 = vmul.f32 0.01, %v980_v61  ;;  %v8583_v3 = vmul.f32 %v8561_v45, %v1097_v63 }
 0x113   : > { %v8588_v5 = vmul.f32 %v8555_v42, %v1095_v1  ;;  %v1098_v7 = vsel %vm1058_vm4, %v988_v57, %v1078_v62  ;;  %v8645_v62 = vpop.permute.xlu0 %1167  ;;  %vm1338_vm4 = vcmask 523264  }
 0x114   : > { %v1096_v8 = vsel %vm1056_vm5, %v980_v61, %v1076_v2  ;;  %v1237_v9 = vrot.slane %v8583_v3, 7  ;;  %v8594_v10 = vmul.f32 %v8563_v46, %v1098_v7  ;;  %v6860_v11 = vpop.f32.mrb[4].mxu0  ;;  %v10682_v14 = vrot.slane %v8583_v3, 1  ;;  %10746 = vst [vmem:[#allocation15_spill] sm:$0xff] %v8645_v62 }
 0x115   : > { %v10684_v12 = vrot.slane %v8588_v5, 7  ;;  %v1216_v13 = vmul.f32 %v8559_v44, %v1096_v8  ;;  %v1001_v15 = vadd.f32 %v6860_v11, %v8568_v47  ;;  %v992_v16 = vpop.f32.mrb[5].mxu0  ;;  %v10683_v17 = vrot.slane %v8588_v5, 1 }
 0x116   : > { %v1238_v18 = vrot.slane %v8594_v10, 7  ;;  %v993_v19 = vadd.f32 %v8568_v47, %v992_v16  ;;  %v6861_v20 = vpop.f32.mrb[6].mxu0  ;;  %v8605_v21 = vpack.c.bf16 %v8594_v10, %v8583_v3 }
 0x117   : > { %v1236_v22 = vrot.slane %v1216_v13, 7  ;;  %v1650_v23 = vrot.slane %v1216_v13, 1  ;;  %vm1061_vm8 = vcmp.gt.f32.partialorder %v1001_v15, 0.0  ;;  %v1081_v24 = vmul.f32 0.01, %v1001_v15  ;;  %v995_v25 = vpop.f32.mrb[7].mxu0 }
 0x118   : > { %vm1059_vm9 = vcmp.gt.f32.partialorder %v993_v19, 0.0  ;;  %v1079_v27 = vmul.f32 0.01, %v993_v19  ;;  %v1004_v28 = vadd.f32 %v6861_v20, %v8568_v47  ;;  %v996_v29 = vadd.f32 %v8568_v47, %v995_v25 }
 0x119   : > { %v8617_v31 = vsel %vm1257_vm6, %v10684_v12, %v1236_v22  ;;  %v1687_v32 = vsel %vm1669_vm7, %v1650_v23, %v10682_v14  ;;  %v1688_v33 = vsel %vm1669_vm7, %v10683_v17, %v1650_v23  ;;  %v1101_v34 = vsel %vm1061_vm8, %v1001_v15, %v1081_v24 }
 0x11a   : > { %v8627_v35 = vpack.c.bf16 %v1687_v32, %v1688_v33  ;;  %v1099_v36 = vsel %vm1059_vm9, %v993_v19, %v1079_v27  ;;  %vm1062_vm10 = vcmp.gt.f32.partialorder %v1004_v28, 0.0  ;;  %v1082_v37 = vmul.f32 0.01, %v1004_v28 }
 0x11b   : > { %v8630_v38 = vmul.f32 %v8570_v49, %v1099_v36  ;;  %vm1060_vm11 = vcmp.gt.f32.partialorder %v996_v29, 0.0  ;;  %v1080_v39 = vmul.f32 0.01, %v996_v29  ;;  %v8633_v48 = vmul.f32 %v8580_v0, %v1101_v34  ;;  %v8672_v34 = vpop.permute.xlu0 %1177 }
 0x11c   : > { %v1102_v50 = vsel %vm1062_vm10, %v1004_v28, %v1082_v37  ;;  %v6864_v52 = vpop.f32.mrb[8].mxu0  ;;  %v8636_v53 = vpack.c.bf16 %v1216_v13, %v8588_v5  ;;  %v1274_v54 = vsel %vm1257_vm6, %v1237_v9, %v1238_v18  ;;  %v1275_v55 = vsel %vm1257_vm6, %v1236_v22, %v1237_v9  ;;  %v8655_v9 = vpop.permute.xlu1 %1172  ;;  %10748 = vst [vmem:[#allocation17_spill] sm:$0xff] %v8672_v34 }
 0x11d   : > { %v1239_v57 = vrot.slane %v8630_v38, 7  ;;  %v1100_v60 = vsel %vm1060_vm11, %v996_v29, %v1080_v39  ;;  %v1008_v61 = vpop.f32.mrb[9].mxu0  ;;  %v1241_v1 = vrot.slane %v8633_v48, 7  ;;  %v8652_v2 = vmul.f32 %v8585_v4, %v1102_v50  ;;  %10747 = vst [vmem:[#allocation16_spill] sm:$0xff] %v8655_v9 }
 0x11e   : > { %v8648_v63 = vmul.f32 %v8572_v51, %v1100_v60  ;;  %v1017_v7 = vadd.f32 %v6864_v52, %v8568_v47  ;;  %v6865_v8 = vpop.f32.mrb[10].mxu0  ;;  %v1009_v11 = vadd.f32 %v8568_v47, %v1008_v61  ;;  %v8659_v16 = vpack.c.bf16 %v1274_v54, %v1275_v55 }
 0x11f   : > { %v1020_v13 = vadd.f32 %v6865_v8, %v8568_v47  ;;  %v1011_v15 = vpop.f32.mrb[11].mxu0  ;;  %v1273_v19 = vsel %vm1257_vm6, %v1238_v18, %v1239_v57  ;;  %v10685_v24 = vrot.slane %v8652_v2, 7  ;;  %v8676_v36 = vpack.c.bf16 %v8652_v2, %v8633_v48  ;;  %v8718_v22 = vpop.permute.xlu0 %1187 }
 0x120   : > { %v1240_v20 = vrot.slane %v8648_v63, 7  ;;  %vm1065_vm12 = vcmp.gt.f32.partialorder %v1017_v7, 0.0  ;;  %v1085_v25 = vmul.f32 0.01, %v1017_v7  ;;  %vm1063_vm13 = vcmp.gt.f32.partialorder %v1009_v11, 0.0  ;;  %v8688_v55 = vpop.permute.xlu1 %1182  ;;  %10750 = vst [vmem:[#allocation19_spill] sm:$0xff] %v8718_v22 }
 0x121   : > { %v1083_v27 = vmul.f32 0.01, %v1009_v11  ;;  %vm1066_vm14 = vcmp.gt.f32.partialorder %v1020_v13, 0.0  ;;  %v1086_v28 = vmul.f32 0.01, %v1020_v13  ;;  %v1012_v29 = vadd.f32 %v8568_v47, %v1011_v15  ;;  %10749 = vst [vmem:[#allocation18_spill] sm:$0xff] %v8688_v55 }
 0x122   : > { %v8670_v32 = vpack.c.bf16 %v8648_v63, %v8630_v38  ;;  %v1105_v33 = vsel %vm1065_vm12, %v1017_v7, %v1085_v25  ;;  %v1272_v37 = vsel %vm1257_vm6, %v1239_v57, %v1240_v20  ;;  %v8699_v57 = vsel %vm1257_vm6, %v1241_v1, %v10685_v24 }
 0x123   : > { %v1103_v18 = vsel %vm1063_vm13, %v1009_v11, %v1083_v27  ;;  %vm1064_vm15 = vcmp.gt.f32.partialorder %v1012_v29, 0.0  ;;  %v1084_v50 = vmul.f32 0.01, %v1012_v29  ;;  %v8686_v52 = vmul.f32 %v8645_v62, %v1105_v33 }
 0x124   : > { %v8683_v39 = vmul.f32 %v8607_v26, %v1103_v18  ;;  %v6868_v54 = vpop.f32.mrb[12].mxu0  ;;  %v1106_v60 = vsel %vm1066_vm14, %v1020_v13, %v1086_v28  ;;  %v8691_v8 = vpack.c.bf16 %v1272_v37, %v1273_v19  ;;  %v8720_v14 = vpop.permute.xlu1 %1192 }
 0x125   : > { %v1033_v61 = vadd.f32 %v6868_v54, %v8568_v47  ;;  %v1024_v7 = vpop.f32.mrb[13].mxu0  ;;  %v1104_v13 = vsel %vm1064_vm15, %v1012_v29, %v1084_v50  ;;  %v8709_v18 = vmul.f32 %v8655_v9, %v1106_v60  ;;  %10751 = vst [vmem:[#allocation20_spill] sm:$0xff] %v8720_v14 }
 0x126   : > { %v6869_v27 = vpop.f32.mrb[14].mxu0  ;;  %v8705_v28 = vmul.f32 %v8611_v30, %v1104_v13  ;;  %v1025_v54 = vadd.f32 %v8568_v47, %v1024_v7 }
 0x127   : > { %vm1069_vm0 = vcmp.gt.f32.partialorder %v1033_v61, 0.0  ;;  %v1027_v33 = vpop.f32.mrb[15].mxu0  ;;  %v1089_v37 = vmul.f32 0.01, %v1033_v61  ;;  %v1036_v6 = vadd.f32 %v6869_v27, %v8568_v47  ;;  %v8732_v17 = vpack.c.bf16 %v8709_v18, %v8686_v52 }
 0x128   : > { %v1028_v11 = vadd.f32 %v8568_v47, %v1027_v33  ;;  %vm1067_vm1 = vcmp.gt.f32.partialorder %v1025_v54, 0.0  ;;  %v1087_v60 = vmul.f32 0.01, %v1025_v54  ;;  %v8725_v33 = vpack.c.bf16 %v8705_v28, %v8683_v39 }
 0x129   : > { %vm1070_vm2 = vcmp.gt.f32.partialorder %v1036_v6, 0.0  ;;  %v1090_v23 = vmul.f32 0.01, %v1036_v6  ;;  %v1109_v27 = vsel %vm1069_vm0, %v1033_v61, %v1089_v37 }
 0x12a   : > { %vm1068_vm3 = vcmp.gt.f32.partialorder %v1028_v11, 0.0  ;;  %v1088_v7 = vmul.f32 0.01, %v1028_v11  ;;  %v1107_v50 = vsel %vm1067_vm1, %v1025_v54, %v1087_v60  ;;  %v8728_v13 = vmul.f32 %v8718_v22, %v1109_v27 }
 0x12b   : > { %v1110_v56 = vsel %vm1070_vm2, %v1036_v6, %v1090_v23  ;;  %v8735_v12 = vmul.f32 %v8672_v34, %v1107_v50 }
 0x12c   : > { %v6872_v58 = vpop.f32.mrb[16].mxu0  ;;  %v1108_v19 = vsel %vm1068_vm3, %v1028_v11, %v1088_v7  ;;  %v8738_v61 = vmul.f32 %v8720_v14, %v1110_v56  ;;  %v10765_v9 = vrot.slane %v8728_v13, 7 }
 0x12d   : > { %v1049_v37 = vadd.f32 %v6872_v58, %v8568_v47  ;;  %v1040_v25 = vpop.f32.mrb[17].mxu0  ;;  %v8743_v60 = vmul.f32 %v8688_v55, %v1108_v19  ;;  %v1247_v50 = vrot.slane %v8735_v12, 7  ;;  %v1271_v19 = vsel %vm1257_vm6, %v1240_v20, %v1241_v1 }
 0x12e   : > { %v1041_v23 = vadd.f32 %v8568_v47, %v1040_v25  ;;  %v6873_v27 = vpop.f32.mrb[18].mxu0  ;;  %v8761_v11 = vpack.c.bf16 %v8738_v61, %v8728_v13  ;;  %v8778_v55 = vpack.c.bf16 %v8699_v57, %v1271_v19  ;;  %v8791_v57 = vpop.permute.xlu1 %1202 }
 0x12f   : > { %v1043_v58 = vpop.f32.mrb[19].mxu0  ;;  %v1248_v54 = vrot.slane %v8743_v60, 7  ;;  %vm1073_vm5 = vcmp.gt.f32.partialorder %v1049_v37, 0.0  ;;  %v1093_v24 = vmul.f32 0.01, %v1049_v37  ;;  %v1052_v25 = vadd.f32 %v6873_v27, %v8568_v47  ;;  %10755 = vst [vmem:[#allocation22_spill] sm:$0xff] %v8791_v57 }
 0x130   : > { %vm1071_vm8 = vcmp.gt.f32.partialorder %v1041_v23, 0.0  ;;  %v1091_v6 = vmul.f32 0.01, %v1041_v23  ;;  %v1044_v15 = vadd.f32 %v8568_v47, %v1043_v58  ;;  %v8757_v56 = vpack.c.bf16 %v8743_v60, %v8735_v12 }
 0x131   : > { %v1113_v29 = vsel %vm1073_vm5, %v1049_v37, %v1093_v24  ;;  %vm1074_vm9 = vcmp.gt.f32.partialorder %v1052_v25, 0.0  ;;  %v1094_v47 = vmul.f32 0.01, %v1052_v25  ;;  %v8772_v24 = vpop.permute.xlu0 %1197 }
 0x132   : > { %v8770_v27 = vmul.f32 %v8553_v41, %v1113_v29  ;;  %10752 = vst [vmem:[#allocation21_spill] sm:$0xff] %v8772_v24  ;;  %v1111_v37 = vsel %vm1071_vm8, %v1041_v23, %v1091_v6  ;;  %vm1072_vm10 = vcmp.gt.f32.partialorder %v1044_v15, 0.0  ;;  %v1092_v7 = vmul.f32 0.01, %v1044_v15 }
 0x133   : > { %v8775_v58 = vmul.f32 %v8772_v24, %v1111_v37  ;;  %v1114_v20 = vsel %vm1074_vm9, %v1052_v25, %v1094_v47  ;;  %v10753_v29 = vrot.slane %v8705_v28, 7  ;;  %v10754_v41 = vrot.slane %v8683_v39, 7 }
 0x134   : > { %v1253_v1 = vrot.slane %v8770_v27, 7  ;;  %v1234_v37 = vmul.f32 %v8557_v43, %v1114_v20  ;;  %v1112_v19 = vsel %vm1072_vm10, %v1044_v15, %v1092_v7  ;;  %v10757_v47 = vrot.slane %v8652_v2, 7 }
 0x135   : > { %v1268_v6 = vsel %vm1257_vm6, %v10754_v41, %v10753_v29  ;;  %v1251_v24 = vrot.slane %v8775_v58, 7  ;;  %v8794_v14 = vmul.f32 %v8791_v57, %v1112_v19  ;;  %v10756_v25 = vmov %v10754_v41 }
 0x136   : > { %v1269_v34 = vsel %vm1257_vm6, %v10757_v47, %v10756_v25  ;;  %v10758_v41 = vrot.slane %v8709_v18, 7  ;;  %v10759_v29 = vrot.slane %v8686_v52, 7  ;;  %v10761_v15 = vrot.slane %v8705_v28, 7 }
 0x137   : > { %v1254_v19 = vrot.slane %v1234_v37, 7  ;;  %v1665_v57 = vrot.slane %v8775_v58, 1  ;;  %v8816_v43 = vpack.c.bf16 %v1234_v37, %v8770_v27  ;;  %v8818_v25 = vpack.c.bf16 %v1268_v6, %v1269_v34 }
 0x138   : > { %v1266_v20 = vsel %vm1257_vm6, %v10759_v29, %v10758_v41  ;;  %v10760_v23 = vmov %v10759_v29  ;;  %v1668_v47 = vrot.slane %v1234_v37, 1  ;;  %v1252_v22 = vrot.slane %v8794_v14, 7  ;;  %v7990_v41 = vld [vmem:[%s10740_s29 + $0x8] sm:$0xff]  }
 0x139   : > { %v1267_v7 = vsel %vm1257_vm6, %v10761_v15, %v10760_v23  ;;  %v8826_v29 = vpack.c.bf16 %v8794_v14, %v8775_v58  ;;  %v10762_v15 = vrot.slane %v8588_v5, 7  ;;  %6882 = vmatprep.mubr.msk.bf16.mxu1 %vm1338_vm4, %v8816_v43  ;;  %v1258_v34 = vsel %vm1257_vm6, %v1253_v1, %v1254_v19 }
 0x13a   : > { %v8828_v23 = vpack.c.bf16 %v1266_v20, %v1267_v7  ;;  %v1264_v6 = vsel %vm1257_vm6, %v1247_v50, %v1248_v54  ;;  %v10763_v37 = vrot.slane %v8709_v18, 7  ;;  %6883 = vmatmul.mubr.msk.bf16.vlgmr.msra.gmra.mrb[0].mxu1 %vm1338_vm4, %v8636_v53  ;;  %v1259_v7 = vsel %vm1257_vm6, %v1252_v22, %v1253_v1 }
 0x13b   : > { %v1277_v30 = vsel %vm1257_vm6, %v1254_v19, %v10762_v15  ;;  %v10764_v19 = vrot.slane %v8738_v61, 7  ;;  %6903 = vmatpush3.bf16.msra.mxu1 %v8550_v40  ;;  %6886 = vmatprep.mubr.msk.bf16.mxu1 %vm1338_vm4, %v8605_v21 }
 0x13c   : > { %v1265_v58 = vsel %vm1257_vm6, %v10763_v37, %v1247_v50  ;;  %v8845_v20 = vpack.c.bf16 %v8617_v31, %v1277_v30  ;;  %v1666_v50 = vrot.slane %v8794_v14, 1  ;;  %v8863_v30 = vpack.c.bf16 %v1258_v34, %v1259_v7  ;;  %6904 = vmatprep.subr.bf16.mxu1 %v7990_v41  ;;  %v7991_v14 = vld [vmem:[%s10740_s29 + $0x10] sm:$0xff]  }
 0x13d   : > { %v8851_v15 = vpack.c.bf16 %v1264_v6, %v1265_v58  ;;  %v1262_v26 = vsel %vm1257_vm6, %v10765_v9, %v10764_v19  ;;  %v10766_v31 = vmov %v10765_v9  ;;  %v1260_v6 = vsel %vm1257_vm6, %v1251_v24, %v1252_v22 }
 0x13e   : > { %v1263_v1 = vsel %vm1257_vm6, %v1248_v54, %v10766_v31  ;;  %v10767_v40 = vmov %v10764_v19  ;;  %v10768_v37 = vrot.slane %v8770_v27, 1  ;;  %v10769_v58 = vrot.slane %v8588_v5, 1 }
 0x13f   : > { %v8874_v9 = vpack.c.bf16 %v1262_v26, %v1263_v1  ;;  %v1261_v34 = vsel %vm1257_vm6, %v10767_v40, %v1251_v24  ;;  %v10770_v26 = vrot.slane %v8630_v38, 1  ;;  %v10771_v31 = vrot.slane %v8594_v10, 1  ;;  %6905 = vmatpush3.bf16.msra.mxu1 %v7990_v41 }
 0x140   : > { %v1670_v54 = vsel %vm1669_vm7, %v10768_v37, %v1668_v47  ;;  %v1689_v22 = vsel %vm1669_vm7, %v1668_v47, %v10769_v58  ;;  %v8888_v7 = vpack.c.bf16 %v1260_v6, %v1261_v34  ;;  %v10773_v40 = vrot.slane %v8583_v3, 1  ;;  %6906 = vmatprep.subr.bf16.mxu1 %v7991_v14 }
 0x141   : > { %v8890_v19 = vpack.c.bf16 %v1689_v22, %v1670_v54  ;;  %v1685_v24 = vsel %vm1669_vm7, %v10771_v31, %v10770_v26  ;;  %v10772_v1 = vmov %v10771_v31  ;;  %v10774_v47 = vrot.slane %v8633_v48, 1  ;;  %v7992_v48 = vld [vmem:[%s10740_s29 + $0x18] sm:$0xff]  }
 0x142   : > { %v1686_v5 = vsel %vm1669_vm7, %v10773_v40, %v10772_v1  ;;  %v10775_v6 = vrot.slane %v8648_v63, 1  ;;  %v10777_v58 = vmov %v10770_v26  ;;  %v10778_v3 = vrot.slane %v8683_v39, 1  ;;  %6887 = vmatmul.mubr.msk.bf16.gmra.mrb[4].mxu1 %vm1338_vm4, %v8670_v32 }
 0x143   : > { %v8904_v37 = vpack.c.bf16 %v1685_v24, %v1686_v5  ;;  %v10779_v22 = vrot.slane %v8652_v2, 1  ;;  %v10781_v1 = vmov %v10774_v47  ;;  %v10782_v63 = vrot.slane %v8686_v52, 1  ;;  %6890 = vmatprep.mubr.msk.bf16.mxu1 %vm1338_vm4, %v8676_v36  ;;  %6907 = vmatpush3.bf16.msra.mxu1 %v7991_v14  ;;  %v7997_v14 = vld [vmem:[%s10740_s29 + $0x60] sm:$0xff]  }
 0x144   : > { %v1683_v34 = vsel %vm1669_vm7, %v10775_v6, %v10774_v47  ;;  %v10776_v54 = vmov %v10775_v6  ;;  %v10783_v40 = vrot.slane %v8705_v28, 1  ;;  %v10785_v41 = vmov %v10778_v3  ;;  %6908 = vmatprep.subr.bf16.mxu1 %v7992_v48 }
 0x145   : > { %v1684_v10 = vsel %vm1669_vm7, %v10777_v58, %v10776_v54  ;;  %v1681_v26 = vsel %vm1669_vm7, %v10779_v22, %v10778_v3  ;;  %v10780_v24 = vmov %v10779_v22  ;;  %v10786_v54 = vrot.slane %v8735_v12, 1 }
 0x146   : > { %v8924_v31 = vpack.c.bf16 %v1683_v34, %v1684_v10  ;;  %v1682_v38 = vsel %vm1669_vm7, %v10781_v1, %v10780_v24  ;;  %v1679_v5 = vsel %vm1669_vm7, %v10783_v40, %v10782_v63  ;;  %v10784_v47 = vmov %v10783_v40 }
 0x147   : > { %v1680_v6 = vsel %vm1669_vm7, %v10785_v41, %v10784_v47  ;;  %v8947_v2 = vpack.c.bf16 %v1681_v26, %v1682_v38  ;;  %v10787_v58 = vrot.slane %v8709_v18, 1  ;;  %v10789_v10 = vmov %v10782_v63  ;;  %6909 = vmatpush3.bf16.msra.mxu1 %v7992_v48  ;;  %v7998_v48 = vld [vmem:[%s10740_s29 + $0x68] sm:$0xff]  }
 0x148   : > { %v8949_v34 = vpack.c.bf16 %v1679_v5, %v1680_v6  ;;  %v10790_v26 = vrot.slane %v8728_v13, 1  ;;  %v10791_v24 = vrot.slane %v8743_v60, 1  ;;  %v10793_v63 = vmov %v10786_v54  ;;  %v7993_v13 = vld [vmem:[%s10740_s29 + $0x40] sm:$0xff]  }
 0x149   : > { %v1677_v28 = vsel %vm1669_vm7, %v10787_v58, %v10786_v54  ;;  %v10788_v39 = vmov %v10787_v58  ;;  %v10794_v52 = vrot.slane %v8738_v61, 1  ;;  %v10797_v60 = vrot.slane %v8770_v27, 1  ;;  %6930 = vmatprep.subr.bf16.mxu1 %v7993_v13  ;;  %v7994_v27 = vld [vmem:[%s10740_s29 + $0x48] sm:$0xff]  }
 0x14a   : > { %v1678_v3 = vsel %vm1669_vm7, %v10789_v10, %v10788_v39  ;;  %v1675_v1 = vsel %vm1669_vm7, %v10791_v24, %v10790_v26  ;;  %v10792_v38 = vmov %v10791_v24  ;;  %v10796_v41 = vmov %v10790_v26  ;;  %6891 = vmatmul.mubr.msk.bf16.gmra.mrb[8].mxu1 %vm1338_vm4, %v8725_v33  ;;  %v8000_v39 = vld [vmem:[%s10740_s29 + $0x78] sm:$0xff]   ;;  %v8001_v10 = vld [vmem:[%s10740_s29 + $0x80] sm:$0xff]   ;;  %v8003_v26 = vld [vmem:[%s10740_s29 + $0x90] sm:$0xff]  }
 0x14b   : > { %v8963_v22 = vpack.c.bf16 %v1677_v28, %v1678_v3  ;;  %v1676_v18 = vsel %vm1669_vm7, %v10793_v63, %v10792_v38  ;;  %v1673_v40 = vsel %vm1669_vm7, %v10794_v52, %v1665_v57  ;;  %v10795_v47 = vmov %v10794_v52  ;;  %6894 = vmatprep.mubr.msk.bf16.mxu1 %vm1338_vm4, %v8732_v17  ;;  %v7999_v28 = vld [vmem:[%s10740_s29 + $0x70] sm:$0xff]   ;;  %v8002_v3 = vld [vmem:[%s10740_s29 + $0x88] sm:$0xff]   ;;  %v8004_v24 = vld [vmem:[%s10740_s29 + $0x98] sm:$0xff]  }
 0x14c   : > { %v8983_v5 = vpack.c.bf16 %v1675_v1, %v1676_v18  ;;  %v1674_v12 = vsel %vm1669_vm7, %v10796_v41, %v10795_v47  ;;  %v1671_v6 = vsel %vm1669_vm7, %v1666_v50, %v10797_v60  ;;  %v1672_v54 = vsel %vm1669_vm7, %v1665_v57, %v1666_v50  ;;  %v7995_v57 = vld [vmem:[%s10740_s29 + $0x50] sm:$0xff]   ;;  %v7996_v50 = vld [vmem:[%s10740_s29 + $0x58] sm:$0xff]   ;;  %v8005_v1 = vld [vmem:[%s10740_s29 + $0xa0] sm:$0xff]  }
 0x14d   : > { %v8999_v58 = vpack.c.bf16 %v1673_v40, %v1674_v12  ;;  %v9001_v61 = vpack.c.bf16 %v1671_v6, %v1672_v54  ;;  %v8006_v38 = vld [vmem:[%s10740_s29 + $0xa8] sm:$0xff]   ;;  %v8007_v63 = vld [vmem:[%s10740_s29 + $0xb0] sm:$0xff]   ;;  %v8008_v18 = vld [vmem:[%s10740_s29 + $0xb8] sm:$0xff]  }
 0x14e   : > { %v8009_v52 = vld [vmem:[%s10740_s29 + $0xc0] sm:$0xff]   ;;  %v8010_v40 = vld [vmem:[%s10740_s29 + $0xc8] sm:$0xff]   ;;  %v8011_v47 = vld [vmem:[%s10740_s29 + $0xd0] sm:$0xff]  }
 0x14f   : > { %v8012_v41 = vld [vmem:[%s10740_s29 + $0xd8] sm:$0xff]   ;;  %v8013_v12 = vld [vmem:[%s10740_s29 + $0xe0] sm:$0xff]   ;;  %v8014_v60 = vld [vmem:[%s10740_s29 + $0xe8] sm:$0xff]  }
 0x150   : > { %v8015_v6 = vld [vmem:[%s10740_s29 + $0xf0] sm:$0xff]  }
 0x152   : > { %6895 = vmatmul.mubr.msk.bf16.gmra.mrb[12].mxu1 %vm1338_vm4, %v8757_v56 }
 0x153   : > { %6898 = vmatprep.mubr.msk.bf16.mxu1 %vm1338_vm4, %v8761_v11 }
 0x15a   : > { %6899 = vmatmul.mubr.msk.bf16.gmra.mrb[16].mxu1 %vm1338_vm4, %v8826_v29 }
 0x15b   : > { %6910 = vmatprep.mubr.msk.bf16.mxu1 %vm1338_vm4, %v8863_v30 }
 0x162   : > { %6911 = vmatmul.mubr.msk.bf16.vlgmr.msra.gmra.mrb[0].mxu1 %vm1338_vm4, %v8845_v20 }
 0x163   : > { %6931 = vmatpush3.bf16.msra.mxu1 %v7993_v13  ;;  %6914 = vmatprep.mubr.msk.bf16.mxu1 %vm1338_vm4, %v8659_v16 }
 0x164   : > { %6932 = vmatprep.subr.bf16.mxu1 %v7994_v27 }
 0x167   : > { %6933 = vmatpush3.bf16.msra.mxu1 %v7994_v27 }
 0x168   : > { %6934 = vmatprep.subr.bf16.mxu1 %v7995_v57 }
 0x16a   : > { %6915 = vmatmul.mubr.msk.bf16.gmra.mrb[4].mxu1 %vm1338_vm4, %v8691_v8 }
 0x16b   : > { %6918 = vmatprep.mubr.msk.bf16.mxu1 %vm1338_vm4, %v8778_v55  ;;  %6935 = vmatpush3.bf16.msra.mxu1 %v7995_v57 }
 0x16c   : > { %6936 = vmatprep.subr.bf16.mxu1 %v7996_v50 }
 0x16f   : > { %6937 = vmatpush3.bf16.msra.mxu1 %v7996_v50 }
 0x170   : > { %6958 = vmatprep.subr.bf16.mxu1 %v7997_v14 }
 0x172   : > { %6919 = vmatmul.mubr.msk.bf16.gmra.mrb[8].mxu1 %vm1338_vm4, %v8818_v25 }
 0x173   : > { %6922 = vmatprep.mubr.msk.bf16.mxu1 %vm1338_vm4, %v8828_v23 }
 0x17a   : > { %6923 = vmatmul.mubr.msk.bf16.gmra.mrb[12].mxu1 %vm1338_vm4, %v8851_v15 }
 0x17b   : > { %6926 = vmatprep.mubr.msk.bf16.mxu1 %vm1338_vm4, %v8874_v9 }
 0x182   : > { %6927 = vmatmul.mubr.msk.bf16.gmra.mrb[16].mxu1 %vm1338_vm4, %v8888_v7 }
 0x183   : > { %6938 = vmatprep.mubr.msk.bf16.mxu1 %vm1338_vm4, %v8890_v19 }
 0x18a   : > { %6939 = vmatmul.mubr.msk.bf16.vlgmr.msra.gmra.mrb[0].mxu1 %vm1338_vm4, %v8627_v35 }
 0x18b   : > { %6959 = vmatpush3.bf16.msra.mxu1 %v7997_v14  ;;  %6942 = vmatprep.mubr.msk.bf16.mxu1 %vm1338_vm4, %v8904_v37 }
 0x18c   : > { %6960 = vmatprep.subr.bf16.mxu1 %v7998_v48 }
 0x18f   : > { %6961 = vmatpush3.bf16.msra.mxu1 %v7998_v48 }
 0x190   : > { %6962 = vmatprep.subr.bf16.mxu1 %v7999_v28 }
 0x192   : > { %6943 = vmatmul.mubr.msk.bf16.gmra.mrb[4].mxu1 %vm1338_vm4, %v8924_v31 }
 0x193   : > { %6946 = vmatprep.mubr.msk.bf16.mxu1 %vm1338_vm4, %v8947_v2  ;;  %6963 = vmatpush3.bf16.msra.mxu1 %v7999_v28 }
 0x194   : > { %6964 = vmatprep.subr.bf16.mxu1 %v8000_v39 }
 0x197   : > { %6965 = vmatpush3.bf16.msra.mxu1 %v8000_v39 }
 0x198   : > { %6986 = vmatprep.subr.bf16.mxu1 %v8001_v10 }
 0x19a   : > { %6947 = vmatmul.mubr.msk.bf16.gmra.mrb[8].mxu1 %vm1338_vm4, %v8949_v34 }
 0x19b   : > { %6950 = vmatprep.mubr.msk.bf16.mxu1 %vm1338_vm4, %v8963_v22 }
 0x1a2   : > { %6951 = vmatmul.mubr.msk.bf16.gmra.mrb[12].mxu1 %vm1338_vm4, %v8983_v5 }
 0x1a3   : > { %6954 = vmatprep.mubr.msk.bf16.mxu1 %vm1338_vm4, %v8999_v58 }
 0x1aa   : > { %6955 = vmatmul.mubr.msk.bf16.gmra.mrb[16].mxu1 %vm1338_vm4, %v9001_v61 }
 0x1ab   : > { %6966 = vmatprep.mubr.msk.bf16.mxu1 %vm1338_vm4, %v8845_v20 }
 0x1b2   : > { %6967 = vmatmul.mubr.msk.bf16.vlgmr.msra.gmra.mrb[0].mxu1 %vm1338_vm4, %v8659_v16 }
 0x1b3   : > { %6987 = vmatpush3.bf16.msra.mxu1 %v8001_v10  ;;  %6970 = vmatprep.mubr.msk.bf16.mxu1 %vm1338_vm4, %v8691_v8 }
 0x1b4   : > { %6988 = vmatprep.subr.bf16.mxu1 %v8002_v3 }
 0x1b7   : > { %6989 = vmatpush3.bf16.msra.mxu1 %v8002_v3 }
 0x1b8   : > { %6990 = vmatprep.subr.bf16.mxu1 %v8003_v26 }
 0x1ba   : > { %6971 = vmatmul.mubr.msk.bf16.gmra.mrb[4].mxu1 %vm1338_vm4, %v8778_v55 }
 0x1bb   : > { %6974 = vmatprep.mubr.msk.bf16.mxu1 %vm1338_vm4, %v8818_v25  ;;  %6991 = vmatpush3.bf16.msra.mxu1 %v8003_v26 }
 0x1bc   : > { %6992 = vmatprep.subr.bf16.mxu1 %v8004_v24 }
 0x1bf   : > { %6993 = vmatpush3.bf16.msra.mxu1 %v8004_v24 }
 0x1c0   : > { %7014 = vmatprep.subr.bf16.mxu1 %v8005_v1 }
 0x1c2   : > { %6975 = vmatmul.mubr.msk.bf16.gmra.mrb[8].mxu1 %vm1338_vm4, %v8828_v23 }
 0x1c3   : > { %6978 = vmatprep.mubr.msk.bf16.mxu1 %vm1338_vm4, %v8851_v15 }
 0x1ca   : > { %6979 = vmatmul.mubr.msk.bf16.gmra.mrb[12].mxu1 %vm1338_vm4, %v8874_v9 }
 0x1cb   : > { %6982 = vmatprep.mubr.msk.bf16.mxu1 %vm1338_vm4, %v8888_v7 }
 0x1d2   : > { %6983 = vmatmul.mubr.msk.bf16.gmra.mrb[16].mxu1 %vm1338_vm4, %v8863_v30 }
 0x1d3   : > { %6994 = vmatprep.mubr.msk.bf16.mxu1 %vm1338_vm4, %v8636_v53 }
 0x1da   : > { %6995 = vmatmul.mubr.msk.bf16.vlgmr.msra.gmra.mrb[0].mxu1 %vm1338_vm4, %v8605_v21 }
 0x1db   : > { %7015 = vmatpush3.bf16.msra.mxu1 %v8005_v1  ;;  %6998 = vmatprep.mubr.msk.bf16.mxu1 %vm1338_vm4, %v8670_v32 }
 0x1dc   : > { %7016 = vmatprep.subr.bf16.mxu1 %v8006_v38 }
 0x1df   : > { %7017 = vmatpush3.bf16.msra.mxu1 %v8006_v38 }
 0x1e0   : > { %7018 = vmatprep.subr.bf16.mxu1 %v8007_v63 }
 0x1e2   : > { %6999 = vmatmul.mubr.msk.bf16.gmra.mrb[4].mxu1 %vm1338_vm4, %v8676_v36 }
 0x1e3   : > { %7002 = vmatprep.mubr.msk.bf16.mxu1 %vm1338_vm4, %v8725_v33  ;;  %7019 = vmatpush3.bf16.msra.mxu1 %v8007_v63 }
 0x1e4   : > { %7020 = vmatprep.subr.bf16.mxu1 %v8008_v18 }
 0x1e7   : > { %7021 = vmatpush3.bf16.msra.mxu1 %v8008_v18 }
 0x1e8   : > { %7042 = vmatprep.subr.bf16.mxu1 %v8009_v52 }
 0x1ea   : > { %7003 = vmatmul.mubr.msk.bf16.gmra.mrb[8].mxu1 %vm1338_vm4, %v8732_v17 }
 0x1eb   : > { %7006 = vmatprep.mubr.msk.bf16.mxu1 %vm1338_vm4, %v8757_v56 }
 0x1f2   : > { %7007 = vmatmul.mubr.msk.bf16.gmra.mrb[12].mxu1 %vm1338_vm4, %v8761_v11 }
 0x1f3   : > { %7010 = vmatprep.mubr.msk.bf16.mxu1 %vm1338_vm4, %v8826_v29 }
 0x1fa   : > { %7011 = vmatmul.mubr.msk.bf16.gmra.mrb[16].mxu1 %vm1338_vm4, %v8816_v43 }
 0x1fb   : > { %7022 = vmatprep.mubr.msk.bf16.mxu1 %vm1338_vm4, %v8627_v35 }
 0x202   : > { %7023 = vmatmul.mubr.msk.bf16.vlgmr.msra.gmra.mrb[0].mxu1 %vm1338_vm4, %v8904_v37 }
 0x203   : > { %7043 = vmatpush3.bf16.msra.mxu1 %v8009_v52  ;;  %7026 = vmatprep.mubr.msk.bf16.mxu1 %vm1338_vm4, %v8924_v31 }
 0x204   : > { %7044 = vmatprep.subr.bf16.mxu1 %v8010_v40 }
 0x207   : > { %7045 = vmatpush3.bf16.msra.mxu1 %v8010_v40 }
 0x208   : > { %7046 = vmatprep.subr.bf16.mxu1 %v8011_v47 }
 0x20a   : > { %7027 = vmatmul.mubr.msk.bf16.gmra.mrb[4].mxu1 %vm1338_vm4, %v8947_v2 }
 0x20b   : > { %7030 = vmatprep.mubr.msk.bf16.mxu1 %vm1338_vm4, %v8949_v34  ;;  %7047 = vmatpush3.bf16.msra.mxu1 %v8011_v47 }
 0x20c   : > { %7048 = vmatprep.subr.bf16.mxu1 %v8012_v41 }
 0x20f   : > { %7049 = vmatpush3.bf16.msra.mxu1 %v8012_v41 }
 0x210   : > { %7070 = vmatprep.subr.bf16.mxu1 %v8013_v12 }
 0x212   : > { %7031 = vmatmul.mubr.msk.bf16.gmra.mrb[8].mxu1 %vm1338_vm4, %v8963_v22 }
 0x213   : > { %7034 = vmatprep.mubr.msk.bf16.mxu1 %vm1338_vm4, %v8983_v5 }
 0x21a   : > { %7035 = vmatmul.mubr.msk.bf16.gmra.mrb[12].mxu1 %vm1338_vm4, %v8999_v58 }
 0x21b   : > { %7038 = vmatprep.mubr.msk.bf16.mxu1 %vm1338_vm4, %v9001_v61 }
 0x222   : > { %7039 = vmatmul.mubr.msk.bf16.gmra.mrb[16].mxu1 %vm1338_vm4, %v8890_v19 }
 0x223   : > { %7050 = vmatprep.mubr.msk.bf16.mxu1 %vm1338_vm4, %v8659_v16  ;;  %v8016_v16 = vld [vmem:[%s10740_s29 + $0xf8] sm:$0xff]  }
 0x22a   : > { %7051 = vmatmul.mubr.msk.bf16.vlgmr.msra.gmra.mrb[0].mxu1 %vm1338_vm4, %v8691_v8  ;;  %v8018_v8 = vld [vmem:[%s10740_s29 + $0x108] sm:$0xff]  }
 0x22b   : > { %7071 = vmatpush3.bf16.msra.mxu1 %v8013_v12  ;;  %7054 = vmatprep.mubr.msk.bf16.mxu1 %vm1338_vm4, %v8778_v55  ;;  %v8017_v55 = vld [vmem:[%s10740_s29 + $0x100] sm:$0xff]  }
 0x22c   : > { %7072 = vmatprep.subr.bf16.mxu1 %v8014_v60 }
 0x22f   : > { %7073 = vmatpush3.bf16.msra.mxu1 %v8014_v60 }
 0x230   : > { %7074 = vmatprep.subr.bf16.mxu1 %v8015_v6 }
 0x232   : > { %7055 = vmatmul.mubr.msk.bf16.gmra.mrb[4].mxu1 %vm1338_vm4, %v8818_v25  ;;  %v8019_v25 = vld [vmem:[%s10740_s29 + $0x110] sm:$0xff]  }
 0x233   : > { %7058 = vmatprep.mubr.msk.bf16.mxu1 %vm1338_vm4, %v8828_v23  ;;  %7075 = vmatpush3.bf16.msra.mxu1 %v8015_v6 }
 0x234   : > { %7076 = vmatprep.subr.bf16.mxu1 %v8016_v16 }
 0x237   : > { %7077 = vmatpush3.bf16.msra.mxu1 %v8016_v16 }
 0x238   : > { %7098 = vmatprep.subr.bf16.mxu1 %v8017_v55 }
 0x23a   : > { %7059 = vmatmul.mubr.msk.bf16.gmra.mrb[8].mxu1 %vm1338_vm4, %v8851_v15 }
 0x23b   : > { %7062 = vmatprep.mubr.msk.bf16.mxu1 %vm1338_vm4, %v8874_v9 }
 0x242   : > { %7063 = vmatmul.mubr.msk.bf16.gmra.mrb[12].mxu1 %vm1338_vm4, %v8888_v7 }
 0x243   : > { %7066 = vmatprep.mubr.msk.bf16.mxu1 %vm1338_vm4, %v8863_v30 }
 0x24a   : > { %7067 = vmatmul.mubr.msk.bf16.gmra.mrb[16].mxu1 %vm1338_vm4, %v8845_v20 }
 0x24b   : > { %7078 = vmatprep.mubr.msk.bf16.mxu1 %vm1338_vm4, %v8605_v21  ;;  %v8020_v21 = vld [vmem:[%s10740_s29 + $0x118] sm:$0xff]  }
 0x252   : > { %7079 = vmatmul.mubr.msk.bf16.vlgmr.msra.gmra.mrb[0].mxu1 %vm1338_vm4, %v8670_v32  ;;  %v9272_v32 = vld [vmem:[%s10798_s27] sm:$0xff]  }
 0x253   : > { %7099 = vmatpush3.bf16.msra.mxu1 %v8017_v55  ;;  %7082 = vmatprep.mubr.msk.bf16.mxu1 %vm1338_vm4, %v8676_v36  ;;  %v9278_v36 = vld [vmem:[%s10799_s4] ss:$0 sm:$0xff]  ;;  %s10849_s4 = sld [smem:[#allocation31_spill]] }
 0x254   : > { %7100 = vmatprep.subr.bf16.mxu1 %v8018_v8 }
 0x257   : > { %7101 = vmatpush3.bf16.msra.mxu1 %v8018_v8 }
 0x258   : > { %7102 = vmatprep.subr.bf16.mxu1 %v8019_v25 }
 0x25a   : > { %7083 = vmatmul.mubr.msk.bf16.gmra.mrb[4].mxu1 %vm1338_vm4, %v8725_v33 }
 0x25b   : > { %7086 = vmatprep.mubr.msk.bf16.mxu1 %vm1338_vm4, %v8732_v17  ;;  %7103 = vmatpush3.bf16.msra.mxu1 %v8019_v25  ;;  %v8022_v17 = vld [vmem:[%s10798_s27 + $0x28] sm:$0xff]  }
 0x25c   : > { %7104 = vmatprep.subr.bf16.mxu1 %v8020_v21 }
 0x25f   : > { %7105 = vmatpush3.bf16.msra.mxu1 %v8020_v21 }
 0x262   : > { %7087 = vmatmul.mubr.msk.bf16.gmra.mrb[8].mxu1 %vm1338_vm4, %v8757_v56 }
 0x263   : > { %7090 = vmatprep.mubr.msk.bf16.mxu1 %vm1338_vm4, %v8761_v11 }
 0x26a   : > { %7091 = vmatmul.mubr.msk.bf16.gmra.mrb[12].mxu1 %vm1338_vm4, %v8826_v29 }
 0x26b   : > { %7094 = vmatprep.mubr.msk.bf16.mxu1 %vm1338_vm4, %v8816_v43  ;;  %v8021_v43 = vld [vmem:[%s10798_s27 + $0x20] sm:$0xff]  }
 0x26c   : > { %7126 = vmatprep.subr.bf16.mxu0 %v8021_v43 }
 0x26d   : > { %7127 = vmatpush3.bf16.msra.mxu0 %v8021_v43 }
 0x26e   : > { %7128 = vmatprep.subr.bf16.mxu0 %v8022_v17 }
 0x271   : > { %7129 = vmatpush3.bf16.msra.mxu0 %v8022_v17 }
 0x272   : > { %7095 = vmatmul.mubr.msk.bf16.gmra.mrb[16].mxu1 %vm1338_vm4, %v8636_v53  ;;  %v8023_v53 = vld [vmem:[%s10798_s27 + $0x30] sm:$0xff]  }
 0x273   : > { %7106 = vmatprep.mubr.msk.bf16.mxu1 %vm1338_vm4, %v8904_v37  ;;  %7130 = vmatprep.subr.bf16.mxu0 %v8023_v53 }
 0x275   : > { %7131 = vmatpush3.bf16.msra.mxu0 %v8023_v53 }
 0x27a   : > { %7107 = vmatmul.mubr.msk.bf16.vlgmr.msra.gmra.mrb[0].mxu1 %vm1338_vm4, %v8924_v31 }
 0x27b   : > { %7110 = vmatprep.mubr.msk.bf16.mxu1 %vm1338_vm4, %v8947_v2 }
 0x282   : > { %7111 = vmatmul.mubr.msk.bf16.gmra.mrb[4].mxu1 %vm1338_vm4, %v8949_v34 }
 0x283   : > { %7114 = vmatprep.mubr.msk.bf16.mxu1 %vm1338_vm4, %v8963_v22 }
 0x28a   : > { %7115 = vmatmul.mubr.msk.bf16.gmra.mrb[8].mxu1 %vm1338_vm4, %v8983_v5 }
 0x28b   : > { %7118 = vmatprep.mubr.msk.bf16.mxu1 %vm1338_vm4, %v8999_v58 }
 0x292   : > { %7119 = vmatmul.mubr.msk.bf16.gmra.mrb[12].mxu1 %vm1338_vm4, %v9001_v61 }
 0x293   : > { %7122 = vmatprep.mubr.msk.bf16.mxu1 %vm1338_vm4, %v8890_v19 }
 0x29a   : > { %7123 = vmatmul.mubr.msk.bf16.gmra.mrb[16].mxu1 %vm1338_vm4, %v8627_v35  ;;  %v8024_v35 = vld [vmem:[%s10798_s27 + $0x38] sm:$0xff]  }
 0x29b   : > { %7132 = vmatprep.subr.bf16.mxu0 %v8024_v35 }
 0x29c   : > { %7133 = vmatpush3.bf16.msra.mxu0 %v8024_v35 }
 0x29d   : > { %7154 = vmatprep.subr.bf16.mxu0 %v9272_v32 }
 0x34d   : > { %v7108_v33 = vpop.f32.mrb[0].mxu1 }
 0x34e   : > { %v2894_v11 = vadd.f32 %v7108_v33, %v9278_v36  ;;  %v2786_v56 = vpop.f32.mrb[1].mxu1 }
 0x34f   : > { %v2892_v29 = vadd.f32 %v9278_v36, %v2786_v56  ;;  %v7109_v23 = vpop.f32.mrb[2].mxu1 }
 0x350   : > { %vm2914_vm11 = vcmp.gt.f32.partialorder %v2894_v11, 0.0  ;;  %v2934_v20 = vmul.f32 0.01, %v2894_v11  ;;  %v2895_v15 = vadd.f32 %v7109_v23, %v9278_v36  ;;  %v2789_v30 = vpop.f32.mrb[3].mxu1 }
 0x351   : > { %vm2912_vm12 = vcmp.gt.f32.partialorder %v2892_v29, 0.0  ;;  %v2932_v9 = vmul.f32 0.01, %v2892_v29  ;;  %v2893_v7 = vadd.f32 %v9278_v36, %v2789_v30 }
 0x352   : > { %v2954_v19 = vsel %vm2914_vm11, %v2894_v11, %v2934_v20  ;;  %vm2915_vm13 = vcmp.gt.f32.partialorder %v2895_v15, 0.0  ;;  %v2935_v37 = vmul.f32 0.01, %v2895_v15 }
 0x353   : > { %v2974_v31 = vmul.f32 %v2954_v19, %v8561_v45  ;;  %v2952_v2 = vsel %vm2912_vm12, %v2892_v29, %v2932_v9  ;;  %vm2913_vm14 = vcmp.gt.f32.partialorder %v2893_v7, 0.0  ;;  %v2933_v34 = vmul.f32 0.01, %v2893_v7 }
 0x354   : > { %v9286_v22 = vmul.f32 %v2952_v2, %v8555_v42  ;;  %v2955_v5 = vsel %vm2915_vm13, %v2895_v15, %v2935_v37 }
 0x355   : > { %v2994_v54 = vrot.slane %v2974_v31, 7  ;;  %v3404_v58 = vrot.slane %v2974_v31, 1  ;;  %v9289_v61 = vmul.f32 %v2955_v5, %v8563_v46  ;;  %v2953_v13 = vsel %vm2913_vm14, %v2893_v7, %v2933_v34  ;;  %v7112_v27 = vpop.f32.mrb[4].mxu1 }
 0x356   : > { %v10710_v57 = vrot.slane %v9286_v22, 7  ;;  %v10709_v50 = vrot.slane %v9286_v22, 1  ;;  %v2973_v14 = vmul.f32 %v2953_v13, %v8559_v44  ;;  %v2898_v48 = vadd.f32 %v7112_v27, %v9278_v36  ;;  %v2802_v28 = vpop.f32.mrb[5].mxu1 }
 0x357   : > { %v2995_v39 = vrot.slane %v9289_v61, 7  ;;  %v10708_v10 = vrot.slane %v9289_v61, 1  ;;  %v2896_v3 = vadd.f32 %v9278_v36, %v2802_v28  ;;  %v7113_v26 = vpop.f32.mrb[6].mxu1  ;;  %v9299_v24 = vpack.c.bf16 %v9289_v61, %v2974_v31 }
 0x358   : > { %v2993_v1 = vrot.slane %v2973_v14, 7  ;;  %v9302_v38 = vpack.c.bf16 %v2973_v14, %v9286_v22  ;;  %v3403_v63 = vrot.slane %v2973_v14, 1  ;;  %vm2918_vm15 = vcmp.gt.f32.partialorder %v2898_v48, 0.0  ;;  %v2805_v18 = vpop.f32.mrb[7].mxu1  ;;  %v10804_v14 = vld [vmem:[#allocation17_spill] sm:$0xff] }
 0x359   : > { %v2938_v52 = vmul.f32 0.01, %v2898_v48  ;;  %vm2916_vm0 = vcmp.gt.f32.partialorder %v2896_v3, 0.0  ;;  %v2936_v40 = vmul.f32 0.01, %v2896_v3  ;;  %v2899_v47 = vadd.f32 %v7113_v26, %v9278_v36 }
 0x35a   : > { %v9309_v41 = vsel %vm1257_vm6, %v10710_v57, %v2993_v1  ;;  %v3439_v12 = vsel %vm1669_vm7, %v3403_v63, %v3404_v58  ;;  %v3440_v60 = vsel %vm1669_vm7, %v10709_v50, %v3403_v63  ;;  %v2897_v6 = vadd.f32 %v9278_v36, %v2805_v18  ;;  %v10800_v63 = vld [vmem:[#allocation13_spill] sm:$0xff]  ;;  %v10806_v57 = vld [vmem:[#allocation18_spill] sm:$0xff] }
 0x35b   : > { %v9318_v16 = vpack.c.bf16 %v3439_v12, %v3440_v60  ;;  %v2958_v55 = vsel %vm2918_vm15, %v2898_v48, %v2938_v52  ;;  %v2956_v8 = vsel %vm2916_vm0, %v2896_v3, %v2936_v40  ;;  %vm2919_vm1 = vcmp.gt.f32.partialorder %v2899_v47, 0.0 }
 0x35c   : > { %v9321_v25 = vmul.f32 %v2958_v55, %v8580_v0  ;;  %v9324_v21 = vmul.f32 %v2956_v8, %v8570_v49  ;;  %v2939_v43 = vmul.f32 0.01, %v2899_v47  ;;  %vm2917_vm2 = vcmp.gt.f32.partialorder %v2897_v6, 0.0 }
 0x35d   : > { %v2937_v17 = vmul.f32 0.01, %v2897_v6  ;;  %v7116_v53 = vpop.f32.mrb[8].mxu1  ;;  %v3028_v35 = vsel %vm1257_vm6, %v2994_v54, %v2995_v39  ;;  %v3029_v33 = vsel %vm1257_vm6, %v2993_v1, %v2994_v54  ;;  %v9336_v11 = vsel %vm1669_vm7, %v3404_v58, %v10708_v10 }
 0x35e   : > { %v2998_v56 = vrot.slane %v9321_v25, 7  ;;  %v2996_v23 = vrot.slane %v9324_v21, 7  ;;  %v2818_v20 = vpop.f32.mrb[9].mxu1  ;;  %v2959_v15 = vsel %vm2919_vm1, %v2899_v47, %v2939_v43  ;;  %v2902_v9 = vadd.f32 %v7116_v53, %v9278_v36 }
 0x35f   : > { %v2957_v30 = vsel %vm2917_vm2, %v2897_v6, %v2937_v17  ;;  %v2900_v7 = vadd.f32 %v9278_v36, %v2818_v20  ;;  %v7117_v19 = vpop.f32.mrb[10].mxu1  ;;  %v9344_v37 = vmul.f32 %v2959_v15, %v8585_v4  ;;  %v9350_v5 = vpack.c.bf16 %v3028_v35, %v3029_v33  ;;  %v10801_v33 = vld [vmem:[#allocation16_spill] sm:$0xff]  ;;  %v10803_v17 = vld [vmem:[#allocation19_spill] sm:$0xff] }
 0x360   : > { %v9347_v31 = vmul.f32 %v2957_v30, %v8572_v51  ;;  %v2903_v2 = vadd.f32 %v7117_v19, %v9278_v36  ;;  %v2821_v34 = vpop.f32.mrb[11].mxu1  ;;  %vm2922_vm3 = vcmp.gt.f32.partialorder %v2902_v9, 0.0  ;;  %v2942_v54 = vmul.f32 0.01, %v2902_v9 }
 0x361   : > { %vm2920_vm5 = vcmp.gt.f32.partialorder %v2900_v7, 0.0  ;;  %v2940_v58 = vmul.f32 0.01, %v2900_v7  ;;  %v10711_v27 = vrot.slane %v9344_v37, 7  ;;  %v2901_v52 = vadd.f32 %v9278_v36, %v2821_v34 }
 0x362   : > { %v2997_v48 = vrot.slane %v9347_v31, 7  ;;  %v2962_v28 = vsel %vm2922_vm3, %v2902_v9, %v2942_v54  ;;  %vm2923_vm8 = vcmp.gt.f32.partialorder %v2903_v2, 0.0  ;;  %v2943_v26 = vmul.f32 0.01, %v2903_v2 }
 0x363   : > { %v2960_v3 = vsel %vm2920_vm5, %v2900_v7, %v2940_v58  ;;  %v9357_v1 = vmul.f32 %v2962_v28, %v8645_v62  ;;  %v9365_v40 = vpack.c.bf16 %v9347_v31, %v9324_v21  ;;  %v9369_v60 = vpack.c.bf16 %v9344_v37, %v9321_v25  ;;  %v10802_v28 = vld [vmem:[#allocation14_spill] sm:$0xff] }
 0x364   : > { %v9360_v18 = vmul.f32 %v2960_v3, %v10800_v63  ;;  %v2963_v47 = vsel %vm2923_vm8, %v2903_v2, %v2943_v26  ;;  %v3026_v6 = vsel %vm1257_vm6, %v2996_v23, %v2997_v48  ;;  %v3027_v55 = vsel %vm1257_vm6, %v2995_v39, %v2996_v23 }
 0x365   : > { %v7120_v12 = vpop.f32.mrb[12].mxu1  ;;  %v9384_v20 = vmul.f32 %v2963_v47, %v10801_v33  ;;  %vm2921_vm9 = vcmp.gt.f32.partialorder %v2901_v52, 0.0  ;;  %v2941_v15 = vmul.f32 0.01, %v2901_v52  ;;  %v9389_v19 = vpack.c.bf16 %v3026_v6, %v3027_v55 }
 0x366   : > { %v10712_v53 = vrot.slane %v9360_v18, 7  ;;  %v2834_v35 = vpop.f32.mrb[13].mxu1  ;;  %v2906_v30 = vadd.f32 %v7120_v12, %v9278_v36  ;;  %v3024_v2 = vsel %vm1257_vm6, %v2998_v56, %v10711_v27  ;;  %v10810_v33 = vrot.slane %v9360_v18, 7 }
 0x367   : > { %v7121_v9 = vpop.f32.mrb[14].mxu1  ;;  %v2904_v7 = vadd.f32 %v9278_v36, %v2834_v35  ;;  %v2961_v58 = vsel %vm2921_vm9, %v2901_v52, %v2941_v15  ;;  %v9405_v55 = vpack.c.bf16 %v9384_v20, %v9357_v1  ;;  %v10811_v62 = vrot.slane %v9344_v37, 7 }
 0x368   : > { %v2907_v39 = vadd.f32 %v7121_v9, %v9278_v36  ;;  %v2837_v23 = vpop.f32.mrb[15].mxu1  ;;  %vm2926_vm10 = vcmp.gt.f32.partialorder %v2906_v30, 0.0  ;;  %v9400_v3 = vmul.f32 %v2961_v58, %v10802_v28  ;;  %v2946_v26 = vmul.f32 0.01, %v2906_v30 }
 0x369   : > { %vm2924_vm11 = vcmp.gt.f32.partialorder %v2904_v7, 0.0  ;;  %v2944_v47 = vmul.f32 0.01, %v2904_v7  ;;  %v2905_v6 = vadd.f32 %v9278_v36, %v2837_v23  ;;  %v10805_v23 = vld [vmem:[#allocation20_spill] sm:$0xff] }
 0x36a   : > { %vm2927_vm12 = vcmp.gt.f32.partialorder %v2907_v39, 0.0  ;;  %v2947_v12 = vmul.f32 0.01, %v2907_v39  ;;  %v3001_v9 = vrot.slane %v9400_v3, 7  ;;  %v2966_v52 = vsel %vm2926_vm10, %v2906_v30, %v2946_v26 }
 0x36b   : > { %v2964_v15 = vsel %vm2924_vm11, %v2904_v7, %v2944_v47  ;;  %v9410_v58 = vmul.f32 %v2966_v52, %v10803_v17  ;;  %vm2925_vm13 = vcmp.gt.f32.partialorder %v2905_v6, 0.0  ;;  %v2945_v13 = vmul.f32 0.01, %v2905_v6  ;;  %v10808_v17 = vld [vmem:[#allocation21_spill] sm:$0xff] }
 0x36c   : > { %v9413_v34 = vmul.f32 %v2964_v15, %v10804_v14  ;;  %v2967_v8 = vsel %vm2927_vm12, %v2907_v39, %v2947_v12  ;;  %v9421_v30 = vpack.c.bf16 %v9400_v3, %v9360_v18 }
 0x36d   : > { %v7124_v29 = vpop.f32.mrb[16].mxu1  ;;  %v9416_v10 = vmul.f32 %v2967_v8, %v10805_v23  ;;  %v2965_v15 = vsel %vm2925_vm13, %v2905_v6, %v2945_v13  ;;  %v3025_v13 = vsel %vm1257_vm6, %v2997_v48, %v2998_v56  ;;  %v3022_v6 = vsel %vm1257_vm6, %v10712_v53, %v3001_v9 }
 0x36e   : > { %v2910_v50 = vadd.f32 %v7124_v29, %v9278_v36  ;;  %v2850_v35 = vpop.f32.mrb[17].mxu1  ;;  %v3004_v39 = vrot.slane %v9413_v34, 7  ;;  %v9430_v43 = vmul.f32 %v2965_v15, %v10806_v57  ;;  %v10807_v15 = vld [vmem:[#allocation11_spill] sm:$0xff]  ;;  %v9458_v48 = vpack.c.bf16 %v3024_v2, %v3025_v13  ;;  %v10812_v13 = vld [vmem:[#allocation22_spill] sm:$0xff] }
 0x36f   : > { %v7125_v12 = vpop.f32.mrb[18].mxu1  ;;  %v2908_v7 = vadd.f32 %v9278_v36, %v2850_v35  ;;  %v9437_v27 = vpack.c.bf16 %v9416_v10, %v9410_v58  ;;  %v3023_v2 = vsel %vm1257_vm6, %v10811_v62, %v10810_v33 }
 0x370   : > { %vm2930_vm14 = vcmp.gt.f32.partialorder %v2910_v50, 0.0  ;;  %v2853_v29 = vpop.f32.mrb[19].mxu1  ;;  %v2950_v54 = vmul.f32 0.01, %v2910_v50  ;;  %v2911_v26 = vadd.f32 %v7125_v12, %v9278_v36  ;;  %v9456_v56 = vpack.c.bf16 %v9430_v43, %v9413_v34 }
 0x371   : > { %v2909_v47 = vadd.f32 %v9278_v36, %v2853_v29  ;;  %v3005_v36 = vrot.slane %v9430_v43, 7  ;;  %vm2928_vm15 = vcmp.gt.f32.partialorder %v2908_v7, 0.0  ;;  %v2948_v8 = vmul.f32 0.01, %v2908_v7 }
 0x372   : > { %v2970_v12 = vsel %vm2930_vm14, %v2910_v50, %v2950_v54  ;;  %vm2931_vm0 = vcmp.gt.f32.partialorder %v2911_v26, 0.0  ;;  %v2951_v52 = vmul.f32 0.01, %v2911_v26  ;;  %v9475_v35 = vpack.c.bf16 %v3022_v6, %v3023_v2 }
 0x373   : > { %v9452_v29 = vmul.f32 %v2970_v12, %v10807_v15  ;;  %vm2929_vm1 = vcmp.gt.f32.partialorder %v2909_v47, 0.0  ;;  %v2949_v23 = vmul.f32 0.01, %v2909_v47  ;;  %v2968_v50 = vsel %vm2928_vm15, %v2908_v7, %v2948_v8  ;;  %v10809_v15 = vld [vmem:[#allocation12_spill] sm:$0xff] }
 0x374   : > { %v2971_v54 = vsel %vm2931_vm0, %v2911_v26, %v2951_v52  ;;  %v9463_v12 = vmul.f32 %v2968_v50, %v10808_v17  ;;  %v10813_v7 = vrot.slane %v9384_v20, 7  ;;  %v10814_v26 = vrot.slane %v9357_v1, 7 }
 0x375   : > { %v3010_v53 = vrot.slane %v9452_v29, 7  ;;  %v2991_v57 = vmul.f32 %v2971_v54, %v10809_v15  ;;  %v2969_v14 = vsel %vm2929_vm1, %v2909_v47, %v2949_v23  ;;  %v3420_v52 = vrot.slane %v9452_v29, 1 }
 0x376   : > { %v9473_v28 = vmul.f32 %v2969_v14, %v10812_v13  ;;  %v3020_v8 = vsel %vm1257_vm6, %v10814_v26, %v10813_v7  ;;  %v10815_v23 = vmov %v10814_v26  ;;  %v3008_v62 = vrot.slane %v9463_v12, 7  ;;  %v8026_v26 = vld [vmem:[%s10798_s27 + $0x8] sm:$0xff]  }
 0x377   : > { %v3021_v47 = vsel %vm1257_vm6, %v3001_v9, %v10815_v23  ;;  %v3418_v14 = vrot.slane %v9463_v12, 1  ;;  %v3011_v33 = vrot.slane %v2991_v57, 7  ;;  %v3421_v6 = vrot.slane %v2991_v57, 1 }
 0x378   : > { %v3009_v50 = vrot.slane %v9473_v28, 7  ;;  %v9492_v54 = vpack.c.bf16 %v2991_v57, %v9452_v29  ;;  %v9496_v2 = vpack.c.bf16 %v9473_v28, %v9463_v12  ;;  %v10816_v7 = vrot.slane %v9286_v22, 7 }
 0x379   : > { %v3012_v23 = vsel %vm1257_vm6, %v3010_v53, %v3011_v33  ;;  %v9507_v15 = vpack.c.bf16 %v3020_v8, %v3021_v47  ;;  %v3018_v57 = vsel %vm1257_vm6, %v3004_v39, %v3005_v36  ;;  %v10818_v8 = vrot.slane %v9416_v10, 7 }
 0x37a   : > { %v3031_v9 = vsel %vm1257_vm6, %v3011_v33, %v10816_v7  ;;  %7134 = vmatprep.mubr.msk.bf16.mxu0 %vm1338_vm4, %v9492_v54  ;;  %v3013_v12 = vsel %vm1257_vm6, %v3009_v50, %v3010_v53  ;;  %v10817_v7 = vrot.slane %v9384_v20, 7  ;;  %v10819_v47 = vrot.slane %v9410_v58, 7 }
 0x37b   : > { %v9512_v29 = vpack.c.bf16 %v9309_v41, %v3031_v9  ;;  %7135 = vmatmul.mubr.msk.bf16.vlgmr.msra.gmra.mrb[20].mxu0 %vm1338_vm4, %v9302_v38  ;;  %v9530_v41 = vpack.c.bf16 %v3012_v23, %v3013_v12  ;;  %v10824_v12 = vrot.slane %v9289_v61, 1 }
 0x37c   : > { %v3019_v13 = vsel %vm1257_vm6, %v10817_v7, %v3004_v39  ;;  %v3016_v33 = vsel %vm1257_vm6, %v10819_v47, %v10818_v8  ;;  %v10820_v53 = vmov %v10819_v47  ;;  %v3014_v39 = vsel %vm1257_vm6, %v3008_v62, %v3009_v50  ;;  %7155 = vmatpush3.bf16.msra.mxu0 %v9272_v32  ;;  %7138 = vmatprep.mubr.msk.bf16.mxu0 %vm1338_vm4, %v9299_v24 }
 0x37d   : > { %v9532_v9 = vpack.c.bf16 %v3018_v57, %v3019_v13  ;;  %v3017_v17 = vsel %vm1257_vm6, %v3005_v36, %v10820_v53  ;;  %v3419_v7 = vrot.slane %v9473_v28, 1  ;;  %v10821_v13 = vrot.slane %v9416_v10, 7  ;;  %7156 = vmatprep.subr.bf16.mxu0 %v8026_v26  ;;  %v8027_v28 = vld [vmem:[%s10798_s27 + $0x10] sm:$0xff]  }
 0x37e   : > { %v9544_v8 = vpack.c.bf16 %v3016_v33, %v3017_v17  ;;  %v3422_v36 = vsel %vm1669_vm7, %v3420_v52, %v3421_v6  ;;  %v10822_v32 = vrot.slane %v9286_v22, 1  ;;  %v10823_v57 = vrot.slane %v9324_v21, 1 }
 0x37f   : > { %v3015_v23 = vsel %vm1257_vm6, %v10821_v13, %v3008_v62  ;;  %v10825_v47 = vrot.slane %v9321_v25, 1  ;;  %v10826_v33 = vrot.slane %v9347_v31, 1  ;;  %v10833_v21 = vrot.slane %v9357_v1, 1 }
 0x380   : > { %v9555_v50 = vpack.c.bf16 %v3014_v39, %v3015_v23  ;;  %v3441_v17 = vsel %vm1669_vm7, %v3421_v6, %v10822_v32  ;;  %v3437_v62 = vsel %vm1669_vm7, %v10824_v12, %v10823_v57  ;;  %v10828_v13 = vmov %v10823_v57  ;;  %7157 = vmatpush3.bf16.msra.mxu0 %v8026_v26  ;;  %v8028_v26 = vld [vmem:[%s10798_s27 + $0x18] sm:$0xff]  }
 0x381   : > { %v3435_v53 = vsel %vm1669_vm7, %v10826_v33, %v10825_v47  ;;  %v9573_v39 = vpack.c.bf16 %v3441_v17, %v3422_v36  ;;  %v9576_v22 = vpack.c.bf16 %v3437_v62, %v9336_v11  ;;  %v10827_v6 = vmov %v10826_v33  ;;  %7158 = vmatprep.subr.bf16.mxu0 %v8027_v28 }
 0x382   : > { %v3436_v61 = vsel %vm1669_vm7, %v10828_v13, %v10827_v6  ;;  %v10829_v23 = vrot.slane %v9360_v18, 1  ;;  %v10830_v32 = vrot.slane %v9344_v37, 1  ;;  %v10832_v11 = vmov %v10825_v47 }
 0x383   : > { %v9590_v12 = vpack.c.bf16 %v3435_v53, %v3436_v61  ;;  %v10834_v17 = vrot.slane %v9400_v3, 1  ;;  %v10837_v6 = vrot.slane %v9413_v34, 1  ;;  %v10838_v13 = vrot.slane %v9384_v20, 1  ;;  %7139 = vmatmul.mubr.msk.bf16.gmra.mrb[24].mxu0 %vm1338_vm4, %v9365_v40 }
 0x384   : > { %v3433_v57 = vsel %vm1669_vm7, %v10830_v32, %v10829_v23  ;;  %v10831_v36 = vmov %v10830_v32  ;;  %v10836_v33 = vmov %v10829_v23  ;;  %v10840_v3 = vmov %v10833_v21  ;;  %7142 = vmatprep.mubr.msk.bf16.mxu0 %vm1338_vm4, %v9369_v60  ;;  %7159 = vmatpush3.bf16.msra.mxu0 %v8027_v28  ;;  %v8035_v28 = vld [vmem:[%s10798_s27 + $0x70] sm:$0xff]  }
 0x385   : > { %v3434_v31 = vsel %vm1669_vm7, %v10832_v11, %v10831_v36  ;;  %v3431_v62 = vsel %vm1669_vm7, %v10834_v17, %v10833_v21  ;;  %v10835_v47 = vmov %v10834_v17  ;;  %v3429_v61 = vsel %vm1669_vm7, %v10838_v13, %v10837_v6  ;;  %7160 = vmatprep.subr.bf16.mxu0 %v8028_v26 }
 0x386   : > { %v3432_v53 = vsel %vm1669_vm7, %v10836_v33, %v10835_v47  ;;  %v9610_v37 = vpack.c.bf16 %v3433_v57, %v3434_v31  ;;  %v10839_v23 = vmov %v10838_v13  ;;  %v10841_v57 = vrot.slane %v9410_v58, 1  ;;  %v8031_v58 = vld [vmem:[%s10798_s27 + $0x50] sm:$0xff]  }
 0x387   : > { %v9612_v25 = vpack.c.bf16 %v3431_v62, %v3432_v53  ;;  %v3430_v18 = vsel %vm1669_vm7, %v10840_v3, %v10839_v23  ;;  %v10842_v36 = vrot.slane %v9430_v43, 1  ;;  %v10844_v1 = vmov %v10837_v6  ;;  %v8037_v23 = vld [vmem:[%s10798_s27 + $0x80] sm:$0xff]   ;;  %v8038_v3 = vld [vmem:[%s10798_s27 + $0x88] sm:$0xff]  }
 0x388   : > { %v9629_v32 = vpack.c.bf16 %v3429_v61, %v3430_v18  ;;  %v10845_v21 = vrot.slane %v9416_v10, 1  ;;  %v10847_v33 = vmov %v10841_v57  ;;  %v3423_v43 = vsel %vm1669_vm7, %v3419_v7, %v3420_v52  ;;  %v8029_v10 = vld [vmem:[%s10798_s27 + $0x40] sm:$0xff]   ;;  %7161 = vmatpush3.bf16.msra.mxu0 %v8028_v26  ;;  %v8032_v52 = vld [vmem:[%s10798_s27 + $0x58] sm:$0xff]   ;;  %v8039_v18 = vld [vmem:[%s10798_s27 + $0x90] sm:$0xff]  }
 0x389   : > { %v3427_v11 = vsel %vm1669_vm7, %v10842_v36, %v10841_v57  ;;  %v10843_v20 = vmov %v10842_v36  ;;  %v3424_v34 = vsel %vm1669_vm7, %v3418_v14, %v3419_v7  ;;  %7182 = vmatprep.subr.bf16.mxu0 %v8029_v10  ;;  %v8034_v7 = vld [vmem:[%s10798_s27 + $0x68] sm:$0xff]   ;;  %v8036_v61 = vld [vmem:[%s10798_s27 + $0x78] sm:$0xff]   ;;  %v8041_v57 = vld [vmem:[%s10798_s27 + $0xa0] sm:$0xff]  }
 0x38a   : > { %v3428_v31 = vsel %vm1669_vm7, %v10844_v1, %v10843_v20  ;;  %v3425_v17 = vsel %vm1669_vm7, %v10845_v21, %v3418_v14  ;;  %v10846_v47 = vmov %v10845_v21  ;;  %v9663_v13 = vpack.c.bf16 %v3423_v43, %v3424_v34  ;;  %v8033_v14 = vld [vmem:[%s10798_s27 + $0x60] sm:$0xff]   ;;  %v8040_v26 = vld [vmem:[%s10798_s27 + $0x98] sm:$0xff]   ;;  %v8042_v36 = vld [vmem:[%s10798_s27 + $0xa8] sm:$0xff]  }
 0x38b   : > { %v9647_v62 = vpack.c.bf16 %v3427_v11, %v3428_v31  ;;  %v3426_v53 = vsel %vm1669_vm7, %v10847_v33, %v10846_v47  ;;  %7143 = vmatmul.mubr.msk.bf16.gmra.mrb[28].mxu0 %vm1338_vm4, %v9421_v30  ;;  %v8043_v11 = vld [vmem:[%s10798_s27 + $0xb0] sm:$0xff]   ;;  %v8044_v20 = vld [vmem:[%s10798_s27 + $0xb8] sm:$0xff]   ;;  %v8045_v1 = vld [vmem:[%s10798_s27 + $0xc0] sm:$0xff]  }
 0x38c   : > { %v9661_v6 = vpack.c.bf16 %v3425_v17, %v3426_v53  ;;  %7146 = vmatprep.mubr.msk.bf16.mxu0 %vm1338_vm4, %v9405_v55  ;;  %v8046_v31 = vld [vmem:[%s10798_s27 + $0xc8] sm:$0xff]   ;;  %v8047_v21 = vld [vmem:[%s10798_s27 + $0xd0] sm:$0xff]   ;;  %v8048_v17 = vld [vmem:[%s10798_s27 + $0xd8] sm:$0xff]  }
 0x38d   : > { %v8049_v47 = vld [vmem:[%s10798_s27 + $0xe0] sm:$0xff]   ;;  %v4745_v53 = vld [vmem:[%s10848_s26 + $0x8] sm:$0xff]  ;;  %v4746_v43 = vld [vmem:[%s10848_s26 + $0x10] sm:$0xff] }
 0x38e   : > { %v4744_v33 = vld [vmem:[%s10848_s26] sm:$0xff] }
 0x38f   : > { %v7523_v34 = vpack.c.bf16 %v4745_v53, %v4744_v33 }
 0x391   : > { %7524 = vmatprep.subr.bf16.mxu1 %v7523_v34 }
 0x392   : > { %7526 = vmatpush3.bf16.msra.mxu1 %v7523_v34 }
 0x393   : > { %7147 = vmatmul.mubr.msk.bf16.gmra.mrb[32].mxu0 %vm1338_vm4, %v9456_v56 }
 0x394   : > { %7150 = vmatprep.mubr.msk.bf16.mxu0 %vm1338_vm4, %v9437_v27 }
 0x39b   : > { %7151 = vmatmul.mubr.msk.bf16.gmra.mrb[36].mxu0 %vm1338_vm4, %v9496_v2 }
 0x39c   : > { %7162 = vmatprep.mubr.msk.bf16.mxu0 %vm1338_vm4, %v9530_v41 }
 0x3a3   : > { %7163 = vmatmul.mubr.msk.bf16.vlgmr.msra.gmra.mrb[20].mxu0 %vm1338_vm4, %v9512_v29 }
 0x3a4   : > { %7183 = vmatpush3.bf16.msra.mxu0 %v8029_v10  ;;  %7166 = vmatprep.mubr.msk.bf16.mxu0 %vm1338_vm4, %v9350_v5  ;;  %v4747_v10 = vld [vmem:[%s10848_s26 + $0x18] sm:$0xff] }
 0x3a5   : > { %7184 = vmatprep.subr.bf16.mxu0 %v8030_v59 }
 0x3a8   : > { %7185 = vmatpush3.bf16.msra.mxu0 %v8030_v59  ;;  %v7527_v59 = vpack.c.bf16 %v4747_v10, %v4746_v43 }
 0x3a9   : > { %7186 = vmatprep.subr.bf16.mxu0 %v8031_v58 }
 0x3aa   : > { %7528 = vmatprep.subr.bf16.mxu1 %v7527_v59 }
 0x3ab   : > { %7167 = vmatmul.mubr.msk.bf16.gmra.mrb[24].mxu0 %vm1338_vm4, %v9389_v19  ;;  %7530 = vmatpush3.bf16.msra.mxu1 %v7527_v59 }
 0x3ac   : > { %7170 = vmatprep.mubr.msk.bf16.mxu0 %vm1338_vm4, %v9458_v48  ;;  %7187 = vmatpush3.bf16.msra.mxu0 %v8031_v58  ;;  %v4748_v58 = vld [vmem:[%s10848_s26 + $0x20] sm:$0xff] }
 0x3ad   : > { %7188 = vmatprep.subr.bf16.mxu0 %v8032_v52 }
 0x3b0   : > { %7189 = vmatpush3.bf16.msra.mxu0 %v8032_v52  ;;  %v4749_v52 = vld [vmem:[%s10848_s26 + $0x28] sm:$0xff] }
 0x3b1   : > { %7210 = vmatprep.subr.bf16.mxu0 %v8033_v14 }
 0x3b3   : > { %7171 = vmatmul.mubr.msk.bf16.gmra.mrb[28].mxu0 %vm1338_vm4, %v9475_v35 }
 0x3b4   : > { %7174 = vmatprep.mubr.msk.bf16.mxu0 %vm1338_vm4, %v9507_v15 }
 0x3bb   : > { %7175 = vmatmul.mubr.msk.bf16.gmra.mrb[32].mxu0 %vm1338_vm4, %v9532_v9 }
 0x3bc   : > { %7178 = vmatprep.mubr.msk.bf16.mxu0 %vm1338_vm4, %v9544_v8 }
 0x3c3   : > { %7179 = vmatmul.mubr.msk.bf16.gmra.mrb[36].mxu0 %vm1338_vm4, %v9555_v50 }
 0x3c4   : > { %7190 = vmatprep.mubr.msk.bf16.mxu0 %vm1338_vm4, %v9573_v39 }
 0x3cb   : > { %7191 = vmatmul.mubr.msk.bf16.vlgmr.msra.gmra.mrb[20].mxu0 %vm1338_vm4, %v9318_v16 }
 0x3cc   : > { %7211 = vmatpush3.bf16.msra.mxu0 %v8033_v14  ;;  %7194 = vmatprep.mubr.msk.bf16.mxu0 %vm1338_vm4, %v9576_v22  ;;  %v7531_v14 = vpack.c.bf16 %v4749_v52, %v4748_v58 }
 0x3cd   : > { %7212 = vmatprep.subr.bf16.mxu0 %v8034_v7 }
 0x3ce   : > { %7532 = vmatprep.subr.bf16.mxu1 %v7531_v14 }
 0x3cf   : > { %7534 = vmatpush3.bf16.msra.mxu1 %v7531_v14 }
 0x3d0   : > { %7213 = vmatpush3.bf16.msra.mxu0 %v8034_v7  ;;  %v8050_v7 = vld [vmem:[%s10798_s27 + $0xe8] sm:$0xff]  }
 0x3d1   : > { %7214 = vmatprep.subr.bf16.mxu0 %v8035_v28 }
 0x3d3   : > { %7195 = vmatmul.mubr.msk.bf16.gmra.mrb[24].mxu0 %vm1338_vm4, %v9590_v12 }
 0x3d4   : > { %7198 = vmatprep.mubr.msk.bf16.mxu0 %vm1338_vm4, %v9610_v37  ;;  %7215 = vmatpush3.bf16.msra.mxu0 %v8035_v28  ;;  %v8051_v28 = vld [vmem:[%s10798_s27 + $0xf0] sm:$0xff]  }
 0x3d5   : > { %7216 = vmatprep.subr.bf16.mxu0 %v8036_v61 }
 0x3d8   : > { %7217 = vmatpush3.bf16.msra.mxu0 %v8036_v61 }
 0x3d9   : > { %7238 = vmatprep.subr.bf16.mxu0 %v8037_v23 }
 0x3db   : > { %7199 = vmatmul.mubr.msk.bf16.gmra.mrb[28].mxu0 %vm1338_vm4, %v9612_v25 }
 0x3dc   : > { %7202 = vmatprep.mubr.msk.bf16.mxu0 %vm1338_vm4, %v9629_v32 }
 0x3e3   : > { %7203 = vmatmul.mubr.msk.bf16.gmra.mrb[32].mxu0 %vm1338_vm4, %v9647_v62 }
 0x3e4   : > { %7206 = vmatprep.mubr.msk.bf16.mxu0 %vm1338_vm4, %v9661_v6 }
 0x3eb   : > { %7207 = vmatmul.mubr.msk.bf16.gmra.mrb[36].mxu0 %vm1338_vm4, %v9663_v13 }
 0x3ec   : > { %7218 = vmatprep.mubr.msk.bf16.mxu0 %vm1338_vm4, %v9512_v29 }
 0x3f3   : > { %7219 = vmatmul.mubr.msk.bf16.vlgmr.msra.gmra.mrb[20].mxu0 %vm1338_vm4, %v9350_v5 }
 0x3f4   : > { %7239 = vmatpush3.bf16.msra.mxu0 %v8037_v23  ;;  %7222 = vmatprep.mubr.msk.bf16.mxu0 %vm1338_vm4, %v9389_v19 }
 0x3f5   : > { %7240 = vmatprep.subr.bf16.mxu0 %v8038_v3 }
 0x3f8   : > { %7241 = vmatpush3.bf16.msra.mxu0 %v8038_v3 }
 0x3f9   : > { %7242 = vmatprep.subr.bf16.mxu0 %v8039_v18 }
 0x3fb   : > { %7223 = vmatmul.mubr.msk.bf16.gmra.mrb[24].mxu0 %vm1338_vm4, %v9458_v48 }
 0x3fc   : > { %7226 = vmatprep.mubr.msk.bf16.mxu0 %vm1338_vm4, %v9475_v35  ;;  %7243 = vmatpush3.bf16.msra.mxu0 %v8039_v18 }
 0x3fd   : > { %7244 = vmatprep.subr.bf16.mxu0 %v8040_v26 }
 0x400   : > { %7245 = vmatpush3.bf16.msra.mxu0 %v8040_v26 }
 0x401   : > { %7266 = vmatprep.subr.bf16.mxu0 %v8041_v57 }
 0x403   : > { %7227 = vmatmul.mubr.msk.bf16.gmra.mrb[28].mxu0 %vm1338_vm4, %v9507_v15 }
 0x404   : > { %7230 = vmatprep.mubr.msk.bf16.mxu0 %vm1338_vm4, %v9532_v9 }
 0x40b   : > { %7231 = vmatmul.mubr.msk.bf16.gmra.mrb[32].mxu0 %vm1338_vm4, %v9544_v8 }
 0x40c   : > { %7234 = vmatprep.mubr.msk.bf16.mxu0 %vm1338_vm4, %v9555_v50 }
 0x413   : > { %7235 = vmatmul.mubr.msk.bf16.gmra.mrb[36].mxu0 %vm1338_vm4, %v9530_v41 }
 0x414   : > { %7246 = vmatprep.mubr.msk.bf16.mxu0 %vm1338_vm4, %v9302_v38 }
 0x41b   : > { %7247 = vmatmul.mubr.msk.bf16.vlgmr.msra.gmra.mrb[20].mxu0 %vm1338_vm4, %v9299_v24 }
 0x41c   : > { %7267 = vmatpush3.bf16.msra.mxu0 %v8041_v57  ;;  %7250 = vmatprep.mubr.msk.bf16.mxu0 %vm1338_vm4, %v9365_v40 }
 0x41d   : > { %7268 = vmatprep.subr.bf16.mxu0 %v8042_v36 }
 0x420   : > { %7269 = vmatpush3.bf16.msra.mxu0 %v8042_v36 }
 0x421   : > { %7270 = vmatprep.subr.bf16.mxu0 %v8043_v11 }
 0x423   : > { %7251 = vmatmul.mubr.msk.bf16.gmra.mrb[24].mxu0 %vm1338_vm4, %v9369_v60 }
 0x424   : > { %7254 = vmatprep.mubr.msk.bf16.mxu0 %vm1338_vm4, %v9421_v30  ;;  %7271 = vmatpush3.bf16.msra.mxu0 %v8043_v11 }
 0x425   : > { %7272 = vmatprep.subr.bf16.mxu0 %v8044_v20 }
 0x428   : > { %7273 = vmatpush3.bf16.msra.mxu0 %v8044_v20 }
 0x429   : > { %7294 = vmatprep.subr.bf16.mxu0 %v8045_v1 }
 0x42b   : > { %7255 = vmatmul.mubr.msk.bf16.gmra.mrb[28].mxu0 %vm1338_vm4, %v9405_v55 }
 0x42c   : > { %7258 = vmatprep.mubr.msk.bf16.mxu0 %vm1338_vm4, %v9456_v56 }
 0x433   : > { %7259 = vmatmul.mubr.msk.bf16.gmra.mrb[32].mxu0 %vm1338_vm4, %v9437_v27 }
 0x434   : > { %7262 = vmatprep.mubr.msk.bf16.mxu0 %vm1338_vm4, %v9496_v2 }
 0x43b   : > { %7263 = vmatmul.mubr.msk.bf16.gmra.mrb[36].mxu0 %vm1338_vm4, %v9492_v54 }
 0x43c   : > { %7274 = vmatprep.mubr.msk.bf16.mxu0 %vm1338_vm4, %v9318_v16 }
 0x443   : > { %7275 = vmatmul.mubr.msk.bf16.vlgmr.msra.gmra.mrb[20].mxu0 %vm1338_vm4, %v9576_v22 }
 0x444   : > { %7295 = vmatpush3.bf16.msra.mxu0 %v8045_v1  ;;  %7278 = vmatprep.mubr.msk.bf16.mxu0 %vm1338_vm4, %v9590_v12 }
 0x445   : > { %7296 = vmatprep.subr.bf16.mxu0 %v8046_v31 }
 0x448   : > { %7297 = vmatpush3.bf16.msra.mxu0 %v8046_v31 }
 0x449   : > { %7298 = vmatprep.subr.bf16.mxu0 %v8047_v21 }
 0x44b   : > { %7279 = vmatmul.mubr.msk.bf16.gmra.mrb[24].mxu0 %vm1338_vm4, %v9610_v37 }
 0x44c   : > { %7282 = vmatprep.mubr.msk.bf16.mxu0 %vm1338_vm4, %v9612_v25  ;;  %7299 = vmatpush3.bf16.msra.mxu0 %v8047_v21 }
 0x44d   : > { %7300 = vmatprep.subr.bf16.mxu0 %v8048_v17 }
 0x450   : > { %7301 = vmatpush3.bf16.msra.mxu0 %v8048_v17 }
 0x451   : > { %7322 = vmatprep.subr.bf16.mxu0 %v8049_v47 }
 0x453   : > { %7283 = vmatmul.mubr.msk.bf16.gmra.mrb[28].mxu0 %vm1338_vm4, %v9629_v32 }
 0x454   : > { %7286 = vmatprep.mubr.msk.bf16.mxu0 %vm1338_vm4, %v9647_v62 }
 0x45b   : > { %7287 = vmatmul.mubr.msk.bf16.gmra.mrb[32].mxu0 %vm1338_vm4, %v9661_v6 }
 0x45c   : > { %7290 = vmatprep.mubr.msk.bf16.mxu0 %vm1338_vm4, %v9663_v13 }
 0x463   : > { %7291 = vmatmul.mubr.msk.bf16.gmra.mrb[36].mxu0 %vm1338_vm4, %v9573_v39 }
 0x464   : > { %7302 = vmatprep.mubr.msk.bf16.mxu0 %vm1338_vm4, %v9350_v5  ;;  %v8052_v5 = vld [vmem:[%s10798_s27 + $0xf8] sm:$0xff]  }
 0x46b   : > { %7303 = vmatmul.mubr.msk.bf16.vlgmr.msra.gmra.mrb[20].mxu0 %vm1338_vm4, %v9389_v19  ;;  %v8053_v19 = vld [vmem:[%s10798_s27 + $0x100] sm:$0xff]  }
 0x46c   : > { %7323 = vmatpush3.bf16.msra.mxu0 %v8049_v47  ;;  %7306 = vmatprep.mubr.msk.bf16.mxu0 %vm1338_vm4, %v9458_v48 }
 0x46d   : > { %7324 = vmatprep.subr.bf16.mxu0 %v8050_v7 }
 0x470   : > { %7325 = vmatpush3.bf16.msra.mxu0 %v8050_v7 }
 0x471   : > { %7326 = vmatprep.subr.bf16.mxu0 %v8051_v28 }
 0x473   : > { %7307 = vmatmul.mubr.msk.bf16.gmra.mrb[24].mxu0 %vm1338_vm4, %v9475_v35  ;;  %v8054_v35 = vld [vmem:[%s10798_s27 + $0x108] sm:$0xff]  }
 0x474   : > { %7310 = vmatprep.mubr.msk.bf16.mxu0 %vm1338_vm4, %v9507_v15  ;;  %7327 = vmatpush3.bf16.msra.mxu0 %v8051_v28  ;;  %v8055_v15 = vld [vmem:[%s10798_s27 + $0x110] sm:$0xff]  }
 0x475   : > { %7328 = vmatprep.subr.bf16.mxu0 %v8052_v5 }
 0x478   : > { %7329 = vmatpush3.bf16.msra.mxu0 %v8052_v5 }
 0x479   : > { %7350 = vmatprep.subr.bf16.mxu0 %v8053_v19 }
 0x47b   : > { %7311 = vmatmul.mubr.msk.bf16.gmra.mrb[28].mxu0 %vm1338_vm4, %v9532_v9 }
 0x47c   : > { %7314 = vmatprep.mubr.msk.bf16.mxu0 %vm1338_vm4, %v9544_v8 }
 0x483   : > { %7315 = vmatmul.mubr.msk.bf16.gmra.mrb[32].mxu0 %vm1338_vm4, %v9555_v50 }
 0x484   : > { %7318 = vmatprep.mubr.msk.bf16.mxu0 %vm1338_vm4, %v9530_v41 }
 0x48b   : > { %7319 = vmatmul.mubr.msk.bf16.gmra.mrb[36].mxu0 %vm1338_vm4, %v9512_v29 }
 0x48c   : > { %7330 = vmatprep.mubr.msk.bf16.mxu0 %vm1338_vm4, %v9299_v24  ;;  %v8056_v24 = vld [vmem:[%s10798_s27 + $0x118] sm:$0xff]  }
 0x493   : > { %7331 = vmatmul.mubr.msk.bf16.vlgmr.msra.gmra.mrb[20].mxu0 %vm1338_vm4, %v9365_v40 }
 0x494   : > { %7351 = vmatpush3.bf16.msra.mxu0 %v8053_v19  ;;  %7334 = vmatprep.mubr.msk.bf16.mxu0 %vm1338_vm4, %v9369_v60  ;;  %v9948_v60 = vld [vmem:[%s10849_s4] ss:$0 sm:$0xff] }
 0x495   : > { %7352 = vmatprep.subr.bf16.mxu0 %v8054_v35 }
 0x498   : > { %7353 = vmatpush3.bf16.msra.mxu0 %v8054_v35 }
 0x499   : > { %7354 = vmatprep.subr.bf16.mxu0 %v8055_v15 }
 0x49b   : > { %7335 = vmatmul.mubr.msk.bf16.gmra.mrb[24].mxu0 %vm1338_vm4, %v9421_v30 }
 0x49c   : > { %7338 = vmatprep.mubr.msk.bf16.mxu0 %vm1338_vm4, %v9405_v55  ;;  %7355 = vmatpush3.bf16.msra.mxu0 %v8055_v15 }
 0x49d   : > { %7356 = vmatprep.subr.bf16.mxu0 %v8056_v24 }
 0x4a0   : > { %7357 = vmatpush3.bf16.msra.mxu0 %v8056_v24  ;;  %v10850_v24 = vld [vmem:[#allocation14_spill] sm:$0xff] }
 0x4a3   : > { %7339 = vmatmul.mubr.msk.bf16.gmra.mrb[28].mxu0 %vm1338_vm4, %v9456_v56 }
 0x4a4   : > { %7342 = vmatprep.mubr.msk.bf16.mxu0 %vm1338_vm4, %v9437_v27  ;;  %v4751_v27 = vld [vmem:[%s10848_s26 + $0x38] sm:$0xff] }
 0x4ab   : > { %7343 = vmatmul.mubr.msk.bf16.gmra.mrb[32].mxu0 %vm1338_vm4, %v9496_v2 }
 0x4ac   : > { %7346 = vmatprep.mubr.msk.bf16.mxu0 %vm1338_vm4, %v9492_v54 }
 0x4b3   : > { %7347 = vmatmul.mubr.msk.bf16.gmra.mrb[36].mxu0 %vm1338_vm4, %v9302_v38  ;;  %v4750_v38 = vld [vmem:[%s10848_s26 + $0x30] sm:$0xff] }
 0x4b4   : > { %7358 = vmatprep.mubr.msk.bf16.mxu0 %vm1338_vm4, %v9576_v22  ;;  %v7535_v40 = vpack.c.bf16 %v4751_v27, %v4750_v38 }
 0x4b6   : > { %7536 = vmatprep.subr.bf16.mxu1 %v7535_v40 }
 0x4b7   : > { %7538 = vmatpush3.bf16.msra.mxu1 %v7535_v40 }
 0x4bb   : > { %7359 = vmatmul.mubr.msk.bf16.vlgmr.msra.gmra.mrb[20].mxu0 %vm1338_vm4, %v9590_v12 }
 0x4bc   : > { %7362 = vmatprep.mubr.msk.bf16.mxu0 %vm1338_vm4, %v9610_v37 }
 0x4c3   : > { %7363 = vmatmul.mubr.msk.bf16.gmra.mrb[24].mxu0 %vm1338_vm4, %v9612_v25 }
 0x4c4   : > { %7366 = vmatprep.mubr.msk.bf16.mxu0 %vm1338_vm4, %v9629_v32 }
 0x4cb   : > { %7367 = vmatmul.mubr.msk.bf16.gmra.mrb[28].mxu0 %vm1338_vm4, %v9647_v62 }
 0x4cc   : > { %7370 = vmatprep.mubr.msk.bf16.mxu0 %vm1338_vm4, %v9661_v6 }
 0x4d3   : > { %7371 = vmatmul.mubr.msk.bf16.gmra.mrb[32].mxu0 %vm1338_vm4, %v9663_v13 }
 0x4d4   : > { %7374 = vmatprep.mubr.msk.bf16.mxu0 %vm1338_vm4, %v9573_v39 }
 0x4db   : > { %7375 = vmatmul.mubr.msk.bf16.gmra.mrb[36].mxu0 %vm1338_vm4, %v9318_v16 }
 0x58e   : > { %v7360_v55 = vpop.f32.mrb[20].mxu0 }
 0x58f   : > { %v4646_v30 = vadd.f32 %v7360_v55, %v9948_v60  ;;  %v4538_v16 = vpop.f32.mrb[21].mxu0 }
 0x590   : > { %v4644_v56 = vadd.f32 %v9948_v60, %v4538_v16  ;;  %v7361_v48 = vpop.f32.mrb[22].mxu0 }
 0x591   : > { %v4686_v54 = vmul.f32 0.01, %v4646_v30  ;;  %v4647_v2 = vadd.f32 %v7361_v48, %v9948_v60  ;;  %v4541_v29 = vpop.f32.mrb[23].mxu0  ;;  %vm4666_vm6 = vcmp.gt.f32.partialorder %v4646_v30, 0.0 }
 0x592   : > { %vm4664_vm7 = vcmp.gt.f32.partialorder %v4644_v56, 0.0  ;;  %v4684_v41 = vmul.f32 0.01, %v4644_v56  ;;  %v4645_v9 = vadd.f32 %v9948_v60, %v4541_v29 }
 0x593   : > { %v4687_v50 = vmul.f32 0.01, %v4647_v2  ;;  %v4706_v22 = vsel %vm4666_vm6, %v4646_v30, %v4686_v54  ;;  %vm4667_vm3 = vcmp.gt.f32.partialorder %v4647_v2, 0.0 }
 0x594   : > { %v4704_v8 = vsel %vm4664_vm7, %v4644_v56, %v4684_v41  ;;  %vm4665_vm2 = vcmp.gt.f32.partialorder %v4645_v9, 0.0  ;;  %v4685_v39 = vmul.f32 0.01, %v4645_v9  ;;  %v4726_v13 = vmul.f32 %v4706_v22, %v8561_v45  ;;  %v10852_v41 = vld [vmem:[#allocation16_spill] sm:$0xff] }
 0x595   : > { %v4724_v12 = vmul.f32 %v4704_v8, %v8555_v42  ;;  %v4707_v61 = vsel %vm4667_vm3, %v4647_v2, %v4687_v50 }
 0x596   : > { %v4705_v37 = vsel %vm4665_vm2, %v4645_v9, %v4685_v39  ;;  %v7364_v25 = vpop.f32.mrb[24].mxu0  ;;  %v4727_v36 = vmul.f32 %v4707_v61, %v8563_v46 }
 0x597   : > { %v4725_v32 = vmul.f32 %v4705_v37, %v8559_v44  ;;  %v4650_v62 = vadd.f32 %v7364_v25, %v9948_v60  ;;  %v4554_v6 = vpop.f32.mrb[25].mxu0  ;;  %7394 = vmatprep.mubr.msk.f32.mxu1 %vm1338_vm4, %v4724_v12  ;;  %v10853_v12 = vld [vmem:[#allocation17_spill] sm:$0xff] }
 0x598   : > { %v4648_v23 = vadd.f32 %v9948_v60, %v4554_v6  ;;  %v7365_v3 = vpop.f32.mrb[26].mxu0 }
 0x599   : > { %v4690_v18 = vmul.f32 0.01, %v4650_v62  ;;  %v4651_v26 = vadd.f32 %v7365_v3, %v9948_v60  ;;  %v4557_v42 = vpop.f32.mrb[27].mxu0  ;;  %7395 = vmatmul.mubr.msk.f32.vlgmr.msra.gmra.mrb[20].mxu1 %vm1338_vm4, %v4725_v32  ;;  %vm4670_vm5 = vcmp.gt.f32.partialorder %v4650_v62, 0.0 }
 0x59a   : > { %vm4668_vm8 = vcmp.gt.f32.partialorder %v4648_v23, 0.0  ;;  %v4688_v44 = vmul.f32 0.01, %v4648_v23  ;;  %v4649_v57 = vadd.f32 %v9948_v60, %v4557_v42  ;;  %7397 = vmatprep.mubr.msk.f32.mxu1 %vm1338_vm4, %v4726_v13 }
 0x59b   : > { %v4691_v11 = vmul.f32 0.01, %v4651_v26  ;;  %v4710_v1 = vsel %vm4670_vm5, %v4650_v62, %v4690_v18  ;;  %vm4671_vm10 = vcmp.gt.f32.partialorder %v4651_v26, 0.0  ;;  %v10854_v62 = vld [vmem:[#allocation18_spill] sm:$0xff] }
 0x59c   : > { %v4708_v45 = vsel %vm4668_vm8, %v4648_v23, %v4688_v44  ;;  %vm4669_vm9 = vcmp.gt.f32.partialorder %v4649_v57, 0.0  ;;  %v4689_v20 = vmul.f32 0.01, %v4649_v57  ;;  %v4730_v46 = vmul.f32 %v4710_v1, %v8580_v0  ;;  %v10855_v23 = vld [vmem:[#allocation19_spill] sm:$0xff] }
 0x59d   : > { %v4728_v31 = vmul.f32 %v4708_v45, %v8570_v49  ;;  %7398 = vmatmul.mubr.msk.f32.gmra.mrb[22].mxu1 %vm1338_vm4, %v4727_v36  ;;  %v4711_v43 = vsel %vm4671_vm10, %v4651_v26, %v4691_v11  ;;  %vm5515_vm8 = vcmask 1046528   ;;  %vm5511_vm10 = vcmask 56320  }
 0x59e   : > { %v4709_v21 = vsel %vm4669_vm9, %v4649_v57, %v4689_v20  ;;  %v7368_v17 = vpop.f32.mrb[28].mxu0  ;;  %v4731_v14 = vmul.f32 %v4711_v43, %v8585_v4  ;;  %v10851_v4 = vld [vmem:[#allocation15_spill] sm:$0xff]  ;;  %v10856_v20 = vld [vmem:[#allocation20_spill] sm:$0xff]  ;;  %v10858_v43 = vld [vmem:[#allocation22_spill] sm:$0xff]  ;;  %vm8252_vm9 = vmmov 0  }
 0x59f   : > { %v4729_v47 = vmul.f32 %v4709_v21, %v8572_v51  ;;  %v4654_v33 = vadd.f32 %v7368_v17, %v9948_v60  ;;  %v4570_v53 = vpop.f32.mrb[29].mxu0  ;;  %7400 = vmatprep.mubr.msk.f32.mxu1 %vm1338_vm4, %v4728_v31 }
 0x5a0   : > { %v4652_v34 = vadd.f32 %v9948_v60, %v4570_v53  ;;  %v7369_v10 = vpop.f32.mrb[30].mxu0 }
 0x5a1   : > { %v4694_v59 = vmul.f32 0.01, %v4654_v33  ;;  %v4655_v49 = vadd.f32 %v7369_v10, %v9948_v60  ;;  %v4573_v58 = vpop.f32.mrb[31].mxu0  ;;  %7401 = vmatmul.mubr.msk.f32.gmra.mrb[24].mxu1 %vm1338_vm4, %v4729_v47  ;;  %vm4674_vm11 = vcmp.gt.f32.partialorder %v4654_v33, 0.0 }
 0x5a2   : > { %vm4672_vm12 = vcmp.gt.f32.partialorder %v4652_v34, 0.0  ;;  %v4692_v51 = vmul.f32 0.01, %v4652_v34  ;;  %v4653_v52 = vadd.f32 %v9948_v60, %v4573_v58  ;;  %7403 = vmatprep.mubr.msk.f32.mxu1 %vm1338_vm4, %v4730_v46 }
 0x5a3   : > { %v4695_v7 = vmul.f32 0.01, %v4655_v49  ;;  %v4714_v5 = vsel %vm4674_vm11, %v4654_v33, %v4694_v59  ;;  %vm4675_vm14 = vcmp.gt.f32.partialorder %v4655_v49, 0.0  ;;  %v10857_v33 = vld [vmem:[#allocation21_spill] sm:$0xff] }
 0x5a4   : > { %v4712_v0 = vsel %vm4672_vm12, %v4652_v34, %v4692_v51  ;;  %vm4673_vm13 = vcmp.gt.f32.partialorder %v4653_v52, 0.0  ;;  %v4693_v28 = vmul.f32 0.01, %v4653_v52  ;;  %v4734_v55 = vmul.f32 %v4714_v5, %v10851_v4  ;;  %v5510_v51 = vld [vmem:[%s10861_s14] sm:$0x7f]  ;;  %s6095_s14 = scalar_lea.sflag [#allocation4], %s770_s0 }
 0x5a5   : > { %v4732_v19 = vmul.f32 %v4712_v0, %v10800_v63  ;;  %7404 = vmatmul.mubr.msk.f32.gmra.mrb[26].mxu1 %vm1338_vm4, %v4731_v14  ;;  %v4715_v30 = vsel %vm4675_vm14, %v4655_v49, %v4695_v7  ;;  %v10860_v49 = vld [vmem:[#allocation12_spill] sm:$0xff]  ;;  %v5204_v14 = vld [vmem:[%s10027_s5] sm:$0x1]  ;;  %vm5682_vm12 = vcmask 122880  }
 0x5a6   : > { %v4713_v35 = vsel %vm4673_vm13, %v4653_v52, %v4693_v28  ;;  %v7372_v15 = vpop.f32.mrb[32].mxu0  ;;  %v4735_v9 = vmul.f32 %v4715_v30, %v10852_v41  ;;  %v8251_v52 = vmov 0.0   ;;  %v10036_v0 = vld [vmem:[%s10863_s10] ss:$0 sm:$0xff] }
 0x5a7   : > { %v4733_v38 = vmul.f32 %v4713_v35, %v10850_v24  ;;  %v4658_v27 = vadd.f32 %v7372_v15, %v9948_v60  ;;  %v4586_v40 = vpop.f32.mrb[33].mxu0  ;;  %7406 = vmatprep.mubr.msk.f32.mxu1 %vm1338_vm4, %v4732_v19  ;;  %7424 = vmatprep.subr.mxu0 %v8251_v52 }
 0x5a8   : > { %v4656_v16 = vadd.f32 %v9948_v60, %v4586_v40  ;;  %v7373_v56 = vpop.f32.mrb[34].mxu0  ;;  %7425 = vmatpush3.msk.msra.mxu0 %vm5515_vm8, %v5510_v51  ;;  %7426 = vmatprep.mubr.msk.f32.mxu0 %vm8252_vm9, %v8251_v52 }
 0x5a9   : > { %v4698_v48 = vmul.f32 0.01, %v4658_v27  ;;  %v4659_v63 = vadd.f32 %v7373_v56, %v9948_v60  ;;  %v4589_v54 = vpop.f32.mrb[35].mxu0  ;;  %7407 = vmatmul.mubr.msk.f32.gmra.mrb[28].mxu1 %vm1338_vm4, %v4733_v38  ;;  %vm4678_vm15 = vcmp.gt.f32.partialorder %v4658_v27, 0.0  ;;  %7427 = vmatmul.mubr.msk.f32.vlgmr.msra.gmra.mrb[40].mxu0 %vm5511_vm10, %v5204_v14 }
 0x5aa   : > { %vm4676_vm0 = vcmp.gt.f32.partialorder %v4656_v16, 0.0  ;;  %v4696_v2 = vmul.f32 0.01, %v4656_v16  ;;  %v4657_v29 = vadd.f32 %v9948_v60, %v4589_v54  ;;  %7409 = vmatprep.mubr.msk.f32.mxu1 %vm1338_vm4, %v4734_v55  ;;  %7501 = vmatprep.mubr.msk.f32.mxu0 %vm8252_vm9, %v8251_v52 }
 0x5ab   : > { %v4699_v50 = vmul.f32 0.01, %v4659_v63  ;;  %v4718_v22 = vsel %vm4678_vm15, %v4658_v27, %v4698_v48  ;;  %vm4679_vm6 = vcmp.gt.f32.partialorder %v4659_v63, 0.0 }
 0x5ac   : > { %v4716_v8 = vsel %vm4676_vm0, %v4656_v16, %v4696_v2  ;;  %vm4677_vm1 = vcmp.gt.f32.partialorder %v4657_v29, 0.0  ;;  %v4697_v39 = vmul.f32 0.01, %v4657_v29  ;;  %v4738_v3 = vmul.f32 %v4718_v22, %v10855_v23 }
 0x5ad   : > { %v4736_v37 = vmul.f32 %v4716_v8, %v10853_v12  ;;  %7410 = vmatmul.mubr.msk.f32.gmra.mrb[30].mxu1 %vm1338_vm4, %v4735_v9  ;;  %v4719_v18 = vsel %vm4679_vm6, %v4659_v63, %v4699_v50 }
 0x5ae   : > { %v4717_v25 = vsel %vm4677_vm1, %v4657_v29, %v4697_v39  ;;  %v7376_v32 = vpop.f32.mrb[36].mxu0  ;;  %v4739_v1 = vmul.f32 %v4719_v18, %v10856_v20 }
 0x5af   : > { %v4737_v6 = vmul.f32 %v4717_v25, %v10854_v62  ;;  %v4662_v13 = vadd.f32 %v7376_v32, %v9948_v60  ;;  %v4602_v61 = vpop.f32.mrb[37].mxu0  ;;  %7412 = vmatprep.mubr.msk.f32.mxu1 %vm1338_vm4, %v4736_v37 }
 0x5b0   : > { %v4660_v26 = vadd.f32 %v9948_v60, %v4602_v61  ;;  %v7377_v42 = vpop.f32.mrb[38].mxu0 }
 0x5b1   : > { %v4702_v44 = vmul.f32 0.01, %v4662_v13  ;;  %v4663_v57 = vadd.f32 %v7377_v42, %v9948_v60  ;;  %v4605_v36 = vpop.f32.mrb[39].mxu0  ;;  %7413 = vmatmul.mubr.msk.f32.gmra.mrb[32].mxu1 %vm1338_vm4, %v4737_v6  ;;  %vm4682_vm7 = vcmp.gt.f32.partialorder %v4662_v13, 0.0 }
 0x5b2   : > { %vm4680_vm2 = vcmp.gt.f32.partialorder %v4660_v26, 0.0  ;;  %v4700_v45 = vmul.f32 0.01, %v4660_v26  ;;  %v4661_v11 = vadd.f32 %v9948_v60, %v4605_v36  ;;  %7415 = vmatprep.mubr.msk.f32.mxu1 %vm1338_vm4, %v4738_v3  ;;  %v10859_v60 = vld [vmem:[#allocation11_spill] sm:$0xff] }
 0x5b3   : > { %v4703_v21 = vmul.f32 0.01, %v4663_v57  ;;  %v4722_v47 = vsel %vm4682_vm7, %v4662_v13, %v4702_v44  ;;  %vm4683_vm5 = vcmp.gt.f32.partialorder %v4663_v57, 0.0 }
 0x5b4   : > { %v4720_v31 = vsel %vm4680_vm2, %v4660_v26, %v4700_v45  ;;  %vm4681_vm3 = vcmp.gt.f32.partialorder %v4661_v11, 0.0  ;;  %v4701_v17 = vmul.f32 0.01, %v4661_v11  ;;  %v4742_v10 = vmul.f32 %v4722_v47, %v10859_v60 }
 0x5b5   : > { %v4740_v53 = vmul.f32 %v4720_v31, %v10857_v33  ;;  %7416 = vmatmul.mubr.msk.f32.gmra.mrb[34].mxu1 %vm1338_vm4, %v4739_v1  ;;  %v4723_v59 = vsel %vm4683_vm5, %v4663_v57, %v4703_v21 }
 0x5b6   : > { %v4721_v46 = vsel %vm4681_vm3, %v4661_v11, %v4701_v17  ;;  %v4743_v58 = vmul.f32 %v4723_v59, %v10860_v49 }
 0x5b7   : > { %v4741_v34 = vmul.f32 %v4721_v46, %v10858_v43  ;;  %7418 = vmatprep.mubr.msk.f32.mxu1 %vm1338_vm4, %v4740_v53 }
 0x5b9   : > { %7419 = vmatmul.mubr.msk.f32.gmra.mrb[36].mxu1 %vm1338_vm4, %v4741_v34 }
 0x5ba   : > { %7421 = vmatprep.mubr.msk.f32.mxu1 %vm1338_vm4, %v4742_v10 }
 0x5bd   : > { %7422 = vmatmul.mubr.msk.f32.gmra.mrb[38].mxu1 %vm1338_vm4, %v4743_v58 }
 0x5be   : > { %7461 = vmatprep.mubr.msk.f32.mxu1 %vm8252_vm9, %v8251_v52 }
 0x66c   : > { %v7396_v7 = vpop.f32.mrb[20].mxu1 }
 0x66d   : > { %v10039_v28 = vadd.f32 %v7396_v7, %v10036_v0  ;;  %v4885_v5 = vpop.f32.mrb[21].mxu1 }
 0x66e   : > { %v10042_v19 = vadd.f32 %v10036_v0, %v4885_v5 }
 0x66f   : > { %v5005_v35 = vand.u32 2147483647, %v10039_v28 }
 0x670   : > { %v5004_v15 = vand.u32 2147483647, %v10042_v19  ;;  %v7399_v24 = vpop.f32.mrb[22].mxu1 }
 0x671   : > { %v5025_v38 = vsub.f32 0.0, %v5005_v35  ;;  %v10047_v27 = vadd.f32 %v7399_v24, %v10036_v0  ;;  %v4895_v40 = vpop.f32.mrb[23].mxu1 }
 0x672   : > { %v5024_v4 = vsub.f32 0.0, %v5004_v15  ;;  %v10050_v55 = vadd.f32 %v10036_v0, %v4895_v40 }
 0x673   : > { %v5046_v30 = vmul.f32 1.442695, %v5025_v38  ;;  %v5007_v16 = vand.u32 2147483647, %v10047_v27 }
 0x674   : > { %v5044_v56 = vmul.f32 1.442695, %v5024_v4  ;;  %v5006_v48 = vand.u32 2147483647, %v10050_v55  ;;  %v7402_v63 = vpop.f32.mrb[24].mxu1 }
 0x675   : > { %8057 = vpow2.f32 %v5046_v30  ;;  %v5027_v54 = vsub.f32 0.0, %v5007_v16  ;;  %v10055_v2 = vadd.f32 %v7402_v63, %v10036_v0  ;;  %v4905_v29 = vpop.f32.mrb[25].mxu1 }
 0x676   : > { %8059 = vpow2.f32 %v5044_v56  ;;  %v5026_v41 = vsub.f32 0.0, %v5006_v48  ;;  %v10058_v9 = vadd.f32 %v10036_v0, %v4905_v29 }
 0x677   : > { %v5050_v8 = vmul.f32 1.442695, %v5027_v54  ;;  %v5009_v50 = vand.u32 2147483647, %v10055_v2 }
 0x678   : > { %v5048_v39 = vmul.f32 1.442695, %v5026_v41  ;;  %v5008_v22 = vand.u32 2147483647, %v10058_v9  ;;  %v7405_v12 = vpop.f32.mrb[26].mxu1 }
 0x679   : > { %8061 = vpow2.f32 %v5050_v8  ;;  %v5029_v37 = vsub.f32 0.0, %v5009_v50  ;;  %v10063_v25 = vadd.f32 %v7405_v12, %v10036_v0  ;;  %v4915_v32 = vpop.f32.mrb[27].mxu1  ;;  %v4985_v8 = vmax.f32 %v10039_v28, 0.0 }
 0x67a   : > { %8063 = vpow2.f32 %v5048_v39  ;;  %v5028_v62 = vsub.f32 0.0, %v5008_v22  ;;  %v10066_v6 = vadd.f32 %v10036_v0, %v4915_v32  ;;  %v4984_v39 = vmax.f32 %v10042_v19, 0.0 }
 0x67b   : > { %v5054_v13 = vmul.f32 1.442695, %v5029_v37  ;;  %v5011_v61 = vand.u32 2147483647, %v10063_v25 }
 0x67c   : > { %v5052_v23 = vmul.f32 1.442695, %v5028_v62  ;;  %v5010_v3 = vand.u32 2147483647, %v10066_v6  ;;  %v7408_v18 = vpop.f32.mrb[28].mxu1 }
 0x67d   : > { %8065 = vpow2.f32 %v5054_v13  ;;  %v5031_v26 = vsub.f32 0.0, %v5011_v61  ;;  %v10071_v42 = vadd.f32 %v7408_v18, %v10036_v0  ;;  %v4925_v44 = vpop.f32.mrb[29].mxu1 }
 0x67e   : > { %v5030_v57 = vsub.f32 0.0, %v5010_v3  ;;  %8067 = vpow2.f32 %v5052_v23  ;;  %v10075_v20 = vadd.f32 %v10036_v0, %v4925_v44 }
 0x67f   : > { %v8058_v36 = vpop.eup %8057  ;;  %v5058_v45 = vmul.f32 1.442695, %v5031_v26  ;;  %v5013_v11 = vand.u32 2147483647, %v10071_v42 }
 0x680   : > { %v8060_v1 = vpop.eup %8059  ;;  %v5085_v31 = vadd.f32 1.0, %v8058_v36  ;;  %v5056_v17 = vmul.f32 1.442695, %v5030_v57  ;;  %v7411_v47 = vpop.f32.mrb[30].mxu1  ;;  %v5012_v43 = vand.u32 2147483647, %v10075_v20 }
 0x681   : > { %v5084_v21 = vadd.f32 1.0, %v8060_v1  ;;  %8069 = vpow2.f32 %v5058_v45  ;;  %v5033_v33 = vsub.f32 0.0, %v5013_v11  ;;  %v4935_v53 = vpop.f32.mrb[31].mxu1  ;;  %v10079_v34 = vadd.f32 %v7411_v47, %v10036_v0 }
 0x682   : > { %8071 = vlog2.f32 %v5085_v31  ;;  %v5032_v7 = vsub.f32 0.0, %v5012_v43  ;;  %v10083_v35 = vadd.f32 %v10036_v0, %v4935_v53  ;;  %v4987_v1 = vmax.f32 %v10047_v27, 0.0 }
 0x683   : > { %v8062_v46 = vpop.eup %8061  ;;  %8073 = vlog2.f32 %v5084_v21  ;;  %v5062_v51 = vmul.f32 1.442695, %v5033_v33  ;;  %v5015_v5 = vand.u32 2147483647, %v10079_v34 }
 0x684   : > { %v8064_v60 = vpop.eup %8063  ;;  %v5087_v10 = vadd.f32 1.0, %v8062_v46  ;;  %v7414_v59 = vpop.f32.mrb[32].mxu1  ;;  %8075 = vpow2.f32 %v5056_v17  ;;  %v5060_v16 = vmul.f32 1.442695, %v5032_v7  ;;  %v5014_v48 = vand.u32 2147483647, %v10083_v35 }
 0x685   : > { %v5086_v49 = vadd.f32 1.0, %v8064_v60  ;;  %v4945_v58 = vpop.f32.mrb[33].mxu1  ;;  %v10086_v40 = vadd.f32 %v7414_v59, %v10036_v0  ;;  %v5035_v56 = vsub.f32 0.0, %v5015_v5  ;;  %v4986_v59 = vmax.f32 %v10050_v55, 0.0 }
 0x686   : > { %8077 = vlog2.f32 %v5087_v10  ;;  %v10093_v37 = vadd.f32 %v10036_v0, %v4945_v58  ;;  %v5034_v23 = vsub.f32 0.0, %v5014_v48 }
 0x687   : > { %v8066_v14 = vpop.eup %8065  ;;  %8079 = vlog2.f32 %v5086_v49  ;;  %v5017_v12 = vand.u32 2147483647, %v10086_v40  ;;  %v5066_v61 = vmul.f32 1.442695, %v5035_v56 }
 0x688   : > { %v5089_v15 = vadd.f32 1.0, %v8066_v14  ;;  %v7417_v24 = vpop.f32.mrb[34].mxu1  ;;  %v8068_v38 = vpop.eup %8067  ;;  %8081 = vpow2.f32 %v5062_v51  ;;  %v5064_v17 = vmul.f32 1.442695, %v5034_v23  ;;  %v5016_v47 = vand.u32 2147483647, %v10093_v37 }
 0x689   : > { %v4955_v4 = vpop.f32.mrb[35].mxu1  ;;  %v5088_v54 = vadd.f32 1.0, %v8068_v38  ;;  %v5037_v31 = vsub.f32 0.0, %v5017_v12  ;;  %v10104_v33 = vadd.f32 %v7417_v24, %v10036_v0 }
 0x68a   : > { %8083 = vlog2.f32 %v5089_v15  ;;  %v10108_v58 = vadd.f32 %v10036_v0, %v4955_v4  ;;  %v5036_v7 = vsub.f32 0.0, %v5016_v47 }
 0x68b   : > { %v8070_v30 = vpop.eup %8069  ;;  %8085 = vpow2.f32 %v5060_v16  ;;  %v5070_v49 = vmul.f32 1.442695, %v5037_v31  ;;  %v5019_v5 = vand.u32 2147483647, %v10104_v33  ;;  %v4989_v16 = vmax.f32 %v10055_v2, 0.0 }
 0x68c   : > { %v8072_v63 = vpop.eup %8071  ;;  %v7420_v29 = vpop.f32.mrb[36].mxu1  ;;  %8087 = vlog2.f32 %v5088_v54  ;;  %v5091_v26 = vadd.f32 1.0, %v8070_v30  ;;  %v5068_v48 = vmul.f32 1.442695, %v5036_v7  ;;  %v5018_v54 = vand.u32 2147483647, %v10108_v58 }
 0x68d   : > { %v8074_v41 = vpop.eup %8073  ;;  %v5107_v50 = vmul.f32 0.6931472, %v8072_v63  ;;  %v4965_v32 = vpop.f32.mrb[37].mxu1  ;;  %v10096_v45 = vadd.f32 %v7420_v29, %v10036_v0  ;;  %v5039_v63 = vsub.f32 0.0, %v5019_v5  ;;  %v10864_v5 = vmov 0  }
 0x68e   : > { %v5105_v22 = vmul.f32 0.6931472, %v8074_v41  ;;  %v8076_v62 = vpop.eup %8075  ;;  %v10100_v21 = vadd.f32 %v10036_v0, %v4965_v32  ;;  %v4988_v32 = vmax.f32 %v10058_v9, 0.0 }
 0x68f   : > { %v5145_v13 = vadd.f32 %v5107_v50, %v4985_v8  ;;  %v5090_v43 = vadd.f32 1.0, %v8076_v62  ;;  %v5074_v62 = vmul.f32 1.442695, %v5039_v63 }
 0x690   : > { %v8078_v3 = vpop.eup %8077  ;;  %v5144_v18 = vadd.f32 %v5105_v22, %v4984_v39  ;;  %v7423_v44 = vpop.f32.mrb[38].mxu1 }
 0x691   : > { %v8080_v57 = vpop.eup %8079  ;;  %8089 = vtanh.f32 %v5145_v13  ;;  %v5111_v36 = vmul.f32 0.6931472, %v8078_v3  ;;  %v4975_v11 = vpop.f32.mrb[39].mxu1  ;;  %v10111_v51 = vadd.f32 %v7423_v44, %v10036_v0  ;;  %v5038_v13 = vsub.f32 0.0, %v5018_v54 }
 0x692   : > { %8091 = vtanh.f32 %v5144_v18  ;;  %v8082_v53 = vpop.eup %8081  ;;  %v5109_v46 = vmul.f32 0.6931472, %v8080_v57  ;;  %v10116_v4 = vadd.f32 %v10036_v0, %v4975_v11  ;;  %v5020_v11 = vand.u32 2147483647, %v10100_v21 }
 0x693   : > { %8093 = vpow2.f32 %v5066_v61  ;;  %v5147_v60 = vadd.f32 %v5111_v36, %v4987_v1  ;;  %v5093_v14 = vadd.f32 1.0, %v8082_v53  ;;  %v5021_v61 = vand.u32 2147483647, %v10096_v45 }
 0x694   : > { %8095 = vlog2.f32 %v5091_v26  ;;  %v8084_v10 = vpop.eup %8083  ;;  %v5146_v15 = vadd.f32 %v5109_v46, %v4986_v59  ;;  %v4991_v26 = vmax.f32 %v10063_v25, 0.0  ;;  %v5072_v57 = vmul.f32 1.442695, %v5038_v13 }
 0x695   : > { %8097 = vpow2.f32 %v5064_v17  ;;  %v8086_v24 = vpop.eup %8085  ;;  %v5115_v38 = vmul.f32 0.6931472, %v8084_v10  ;;  %v5041_v36 = vsub.f32 0.0, %v5021_v61  ;;  %v8253_v1 = vmov 1  }
 0x696   : > { %8099 = vlog2.f32 %v5090_v43  ;;  %v8088_v30 = vpop.eup %8087  ;;  %v5092_v41 = vadd.f32 1.0, %v8086_v24  ;;  %v5023_v63 = vand.u32 2147483647, %v10111_v51 }
 0x697   : > { %8101 = vtanh.f32 %v5147_v60  ;;  %v5149_v50 = vadd.f32 %v5115_v38, %v4989_v16  ;;  %v5113_v39 = vmul.f32 0.6931472, %v8088_v30  ;;  %v4990_v60 = vmax.f32 %v10066_v6, 0.0 }
 0x698   : > { %8103 = vpow2.f32 %v5070_v49  ;;  %v5078_v59 = vmul.f32 1.442695, %v5041_v36  ;;  %v5040_v49 = vsub.f32 0.0, %v5020_v11 }
 0x699   : > { %8105 = vlog2.f32 %v5093_v14  ;;  %v5022_v14 = vand.u32 2147483647, %v10116_v4 }
 0x69a   : > { %8107 = vtanh.f32 %v5146_v15 }
 0x69b   : > { %v8090_v56 = vpop.eup %8089  ;;  %8109 = vpow2.f32 %v5068_v48  ;;  %v5076_v48 = vmul.f32 1.442695, %v5040_v49  ;;  %v5042_v54 = vsub.f32 0.0, %v5022_v14  ;;  %v4997_v14 = vmax.f32 %v10086_v40, 0.0 }
 0x69c   : > { %v8092_v29 = vpop.eup %8091  ;;  %v10120_v22 = vmul.f32 %v8090_v56, %v10039_v28  ;;  %8111 = vlog2.f32 %v5092_v41  ;;  %v5148_v28 = vadd.f32 %v5113_v39, %v4988_v32  ;;  %v4992_v32 = vmax.f32 %v10075_v20, 0.0 }
 0x69d   : > { %v8094_v8 = vpop.eup %8093  ;;  %v10123_v12 = vmul.f32 %v8092_v29, %v10042_v19  ;;  %8113 = vtanh.f32 %v5149_v50  ;;  %v5080_v13 = vmul.f32 1.442695, %v5042_v54 }
 0x69e   : > { %v8096_v0 = vpop.eup %8095  ;;  %5232 = vperm.xlu1 %7966, %v10120_v22   ;;  %v5095_v23 = vadd.f32 1.0, %v8094_v8  ;;  %8115 = vpow2.f32 %v5074_v62  ;;  %v5043_v62 = vsub.f32 0.0, %v5023_v63 }
 0x69f   : > { %5227 = vperm.xlu0 %7965, %v10123_v12   ;;  %v8098_v3 = vpop.eup %8097  ;;  %v5119_v18 = vmul.f32 0.6931472, %v8096_v0 }
 0x6a0   : > { %v8100_v19 = vpop.eup %8099  ;;  %8117 = vlog2.f32 %v5095_v23  ;;  %v5094_v17 = vadd.f32 1.0, %v8098_v3 }
 0x6a1   : > { %v8102_v44 = vpop.eup %8101  ;;  %8119 = vtanh.f32 %v5148_v28  ;;  %v5151_v53 = vadd.f32 %v5119_v18, %v4991_v26  ;;  %v5117_v46 = vmul.f32 0.6931472, %v8100_v19  ;;  %v4995_v26 = vmax.f32 %v10079_v34, 0.0 }
 0x6a2   : > { %7967 = vset.pattern.permute.xlu1 %v8253_v1  ;;  %v8104_v31 = vpop.eup %8103  ;;  %v10135_v10 = vmul.f32 %v8102_v44, %v10047_v27  ;;  %8121 = vpow2.f32 %v5072_v57  ;;  %v4993_v27 = vmax.f32 %v10071_v42, 0.0  ;;  %v5082_v44 = vmul.f32 1.442695, %v5043_v62 }
 0x6a3   : > { %7968 = vset.pattern.permute.xlu0 %v8253_v1  ;;  %5370 = vperm.xlu1 %7967, %v10120_v22   ;;  %v8106_v47 = vpop.eup %8105  ;;  %8123 = vlog2.f32 %v5094_v17  ;;  %v5097_v7 = vadd.f32 1.0, %v8104_v31  ;;  %v5150_v24 = vadd.f32 %v5117_v46, %v4990_v60 }
 0x6a4   : > { %5366 = vperm.xlu0 %7968, %v10123_v12   ;;  %v8108_v43 = vpop.eup %8107  ;;  %8125 = vtanh.f32 %v5151_v53  ;;  %v5123_v38 = vmul.f32 0.6931472, %v8106_v47  ;;  %v4994_v47 = vmax.f32 %v10083_v35, 0.0 }
 0x6a5   : > { %v8110_v15 = vpop.eup %8109  ;;  %v10143_v16 = vmul.f32 %v8108_v43, %v10050_v55  ;;  %8127 = vpow2.f32 %v5078_v59 }
 0x6a6   : > { %v8112_v30 = vpop.eup %8111  ;;  %8129 = vlog2.f32 %v5097_v7  ;;  %v5096_v29 = vadd.f32 1.0, %v8110_v15  ;;  %v5153_v8 = vadd.f32 %v5123_v38, %v4993_v27 }
 0x6a7   : > { %7969 = vset.pattern.permute.xlu1 %v10864_v5  ;;  %v8114_v56 = vpop.eup %8113  ;;  %8131 = vtanh.f32 %v5150_v24  ;;  %v5121_v50 = vmul.f32 0.6931472, %v8112_v30 }
 0x6a8   : > { %5378 = vperm.xlu0 %7968, %v10135_v10   ;;  %5242 = vperm.xlu1 %7969, %v10135_v10   ;;  %v8116_v41 = vpop.eup %8115  ;;  %v10149_v55 = vmul.f32 %v8114_v56, %v10055_v2  ;;  %8133 = vpow2.f32 %v5076_v48 }
 0x6a9   : > { %8135 = vlog2.f32 %v5096_v29  ;;  %v5099_v61 = vadd.f32 1.0, %v8116_v41  ;;  %v5152_v3 = vadd.f32 %v5121_v50, %v4992_v32 }
 0x6aa   : > { %v8118_v39 = vpop.eup %8117  ;;  %8137 = vtanh.f32 %v5153_v8 }
 0x6ab   : > { %v8120_v0 = vpop.eup %8119  ;;  %v5127_v28 = vmul.f32 0.6931472, %v8118_v39  ;;  %8139 = vpow2.f32 %v5080_v13 }
 0x6ac   : > { %5374 = vperm.xlu0 %7968, %v10143_v16   ;;  %5237 = vperm.xlu1 %7969, %v10143_v16   ;;  %v8122_v23 = vpop.eup %8121  ;;  %v10155_v2 = vmul.f32 %v8120_v0, %v10058_v9  ;;  %8141 = vlog2.f32 %v5099_v61 }
 0x6ad   : > { %v8124_v18 = vpop.eup %8123  ;;  %v5098_v57 = vadd.f32 1.0, %v8122_v23  ;;  %8143 = vtanh.f32 %v5152_v3  ;;  %v5155_v11 = vadd.f32 %v5127_v28, %v4995_v26 }
 0x6ae   : > { %v8126_v19 = vpop.eup %8125  ;;  %v5125_v1 = vmul.f32 0.6931472, %v8124_v18  ;;  %8145 = vpow2.f32 %v5082_v44 }
 0x6af   : > { %v8128_v36 = vpop.eup %8127  ;;  %v10161_v17 = vmul.f32 %v8126_v19, %v10063_v25  ;;  %8147 = vlog2.f32 %v5098_v57  ;;  %v5001_v19 = vmax.f32 %v10096_v45, 0.0 }
 0x6b0   : > { %5386 = vperm.xlu0 %7968, %v10149_v55   ;;  %5252 = vperm.xlu1 %7969, %v10149_v55   ;;  %v8130_v31 = vpop.eup %8129  ;;  %v5101_v53 = vadd.f32 1.0, %v8128_v36  ;;  %8149 = vtanh.f32 %v5155_v11  ;;  %v5154_v43 = vadd.f32 %v5125_v1, %v4994_v47  ;;  %v5000_v11 = vmax.f32 %v10100_v21, 0.0 }
 0x6b1   : > { %v8132_v9 = vpop.eup %8131  ;;  %v5131_v60 = vmul.f32 0.6931472, %v8130_v31 }
 0x6b2   : > { %v8134_v46 = vpop.eup %8133  ;;  %v10167_v49 = vmul.f32 %v8132_v9, %v10066_v6  ;;  %8151 = vlog2.f32 %v5101_v53  ;;  %v4996_v6 = vmax.f32 %v10093_v37, 0.0  ;;  %v5002_v53 = vmax.f32 %v10116_v4, 0.0 }
 0x6b3   : > { %v8136_v59 = vpop.eup %8135  ;;  %v5100_v7 = vadd.f32 1.0, %v8134_v46  ;;  %8153 = vtanh.f32 %v5154_v43  ;;  %v5157_v15 = vadd.f32 %v5131_v60, %v4997_v14 }
 0x6b4   : > { %5382 = vperm.xlu0 %7968, %v10155_v2   ;;  %5247 = vperm.xlu1 %7969, %v10155_v2   ;;  %v8138_v25 = vpop.eup %8137  ;;  %v5129_v24 = vmul.f32 0.6931472, %v8136_v59  ;;  %v5003_v59 = vmax.f32 %v10111_v51, 0.0 }
 0x6b5   : > { %v8140_v5 = vpop.eup %8139  ;;  %v10173_v30 = vmul.f32 %v8138_v25, %v10071_v42  ;;  %8155 = vlog2.f32 %v5100_v7  ;;  %v4999_v42 = vmax.f32 %v10104_v33, 0.0 }
 0x6b6   : > { %v8142_v38 = vpop.eup %8141  ;;  %v5102_v56 = vadd.f32 1.0, %v8140_v5  ;;  %8157 = vtanh.f32 %v5157_v15  ;;  %v5156_v63 = vadd.f32 %v5129_v24, %v4996_v6  ;;  %v5595_v5 = vld [vmem:[%s10865_s16] sm:$0xff]  ;;  %v8254_v24 = vmov 0.0|0.0   ;;  %v5598_v6 = vld [vmem:[%s10865_s16 + $0x18] sm:$0xff] }
 0x6b7   : > { %v8144_v27 = vpop.eup %8143  ;;  %v5135_v54 = vmul.f32 0.6931472, %v8142_v38  ;;  %7539 = vmatprep.subr.bf16.mxu1 %v8254_v24  ;;  %7563 = vmatprep.subr.bf16.mxu0 %v8254_v24 }
 0x6b8   : > { %5394 = vperm.xlu0 %7968, %v10161_v17   ;;  %5262 = vperm.xlu1 %7969, %v10161_v17   ;;  %v8146_v48 = vpop.eup %8145  ;;  %v10179_v41 = vmul.f32 %v8144_v27, %v10075_v20  ;;  %8159 = vlog2.f32 %v5102_v56  ;;  %v4998_v20 = vmax.f32 %v10108_v58, 0.0  ;;  %v5597_v27 = vld [vmem:[%s10865_s16 + $0x10] sm:$0xff] }
 0x6b9   : > { %v8148_v29 = vpop.eup %8147  ;;  %v5103_v50 = vadd.f32 1.0, %v8146_v48  ;;  %8161 = vtanh.f32 %v5156_v63  ;;  %v5159_v39 = vadd.f32 %v5135_v54, %v4999_v42  ;;  %v5599_v63 = vld [vmem:[%s10865_s16 + $0x20] sm:$0xff]  ;;  %v5600_v54 = vld [vmem:[%s10865_s16 + $0x28] sm:$0xff]  ;;  %v5601_v42 = vld [vmem:[%s10865_s16 + $0x30] sm:$0xff] }
 0x6ba   : > { %v8150_v8 = vpop.eup %8149  ;;  %v5133_v0 = vmul.f32 0.6931472, %v8148_v29 }
 0x6bb   : > { %v10185_v62 = vmul.f32 %v8150_v8, %v10079_v34  ;;  %8163 = vlog2.f32 %v5103_v50  ;;  %v7546_v8 = vpack.c.bf16 %v5600_v54, %v5599_v63  ;;  %v5209_v63 = vld [vmem:[%s10866_s11 + $0x20] sm:$0xff] }
 0x6bc   : > { %5390 = vperm.xlu0 %7968, %v10167_v49   ;;  %5257 = vperm.xlu1 %7969, %v10167_v49   ;;  %v8152_v32 = vpop.eup %8151  ;;  %8165 = vtanh.f32 %v5159_v39  ;;  %v5158_v61 = vadd.f32 %v5133_v0, %v4998_v20  ;;  %v5603_v39 = vld [vmem:[%s10865_s16 + $0x40] sm:$0xff]  ;;  %v5604_v0 = vld [vmem:[%s10865_s16 + $0x48] sm:$0xff] }
 0x6bd   : > { %v8154_v13 = vpop.eup %8153  ;;  %v5139_v23 = vmul.f32 0.6931472, %v8152_v32  ;;  %v5606_v32 = vld [vmem:[%s10865_s16 + $0x58] sm:$0xff] }
 0x6be   : > { %v10191_v28 = vmul.f32 %v8154_v13, %v10083_v35  ;;  %8167 = vtanh.f32 %v5158_v61  ;;  %v5608_v13 = vld [vmem:[%s10865_s16 + $0x68] sm:$0xff] }
 0x6bf   : > { %v8156_v3 = vpop.eup %8155  ;;  %v5161_v34 = vadd.f32 %v5139_v23, %v5001_v19  ;;  %v5919_v23 = vld [vmem:[%s10664_s20] sm:$0xff] }
 0x6c0   : > { %5402 = vperm.xlu0 %7968, %v10173_v30   ;;  %5272 = vperm.xlu1 %7969, %v10173_v30   ;;  %v8158_v18 = vpop.eup %8157  ;;  %v5137_v26 = vmul.f32 0.6931472, %v8156_v3  ;;  %v5921_v3 = vld [vmem:[%s10664_s20 + $0x10] sm:$0xff] }
 0x6c1   : > { %v10197_v57 = vmul.f32 %v8158_v18, %v10086_v40  ;;  %8169 = vtanh.f32 %v5161_v34  ;;  %v5922_v18 = vld [vmem:[%s10664_s20 + $0x18] sm:$0xff] }
 0x6c2   : > { %v8160_v44 = vpop.eup %8159  ;;  %v5160_v35 = vadd.f32 %v5137_v26, %v5000_v11  ;;  %v7567_v26 = vpack.c.bf16 %v5922_v18, %v5921_v3  ;;  %v5212_v18 = vld [vmem:[%s10866_s11 + $0x38] sm:$0xff] }
 0x6c3   : > { %v8162_v36 = vpop.eup %8161  ;;  %v5141_v1 = vmul.f32 0.6931472, %v8160_v44  ;;  %v5923_v44 = vld [vmem:[%s10664_s20 + $0x20] sm:$0xff] }
 0x6c4   : > { %5398 = vperm.xlu0 %7968, %v10179_v41   ;;  %5267 = vperm.xlu1 %7969, %v10179_v41   ;;  %v10203_v9 = vmul.f32 %v8162_v36, %v10093_v37  ;;  %8171 = vtanh.f32 %v5160_v35 }
 0x6c5   : > { %v8164_v31 = vpop.eup %8163  ;;  %v5162_v46 = vadd.f32 %v5141_v1, %v5002_v53  ;;  %v5346_v53 = vld [vmem:[%s10656_s12 + $0x8] sm:$0xff] }
 0x6c6   : > { %v8166_v47 = vpop.eup %8165  ;;  %v5143_v40 = vmul.f32 0.6931472, %v8164_v31 }
 0x6c7   : > { %v10209_v43 = vmul.f32 %v8166_v47, %v10104_v33  ;;  %8173 = vtanh.f32 %v5162_v46  ;;  %v5206_v46 = vld [vmem:[%s10866_s11 + $0x8] sm:$0xff] }
 0x6c8   : > { %5410 = vperm.xlu0 %7968, %v10185_v62   ;;  %5282 = vperm.xlu1 %7969, %v10185_v62   ;;  %v8168_v60 = vpop.eup %8167  ;;  %v5163_v37 = vadd.f32 %v5143_v40, %v5003_v59  ;;  %v5345_v40 = vld [vmem:[%s10656_s12] sm:$0xff] }
 0x6c9   : > { %v10215_v25 = vmul.f32 %v8168_v60, %v10108_v58  ;;  %v5596_v58 = vld [vmem:[%s10865_s16 + $0x8] sm:$0xff] }
 0x6ca   : > { %8175 = vtanh.f32 %v5163_v37 }
 0x6cb   : > { %v8170_v14 = vpop.eup %8169 }
 0x6cc   : > { %5406 = vperm.xlu0 %7968, %v10191_v28   ;;  %5277 = vperm.xlu1 %7969, %v10191_v28   ;;  %v10220_v33 = vmul.f32 %v8170_v14, %v10096_v45  ;;  %v7540_v45 = vpack.c.bf16 %v5596_v58, %v5595_v5  ;;  %v5347_v14 = vld [vmem:[%s10656_s12 + $0x10] sm:$0xff] }
 0x6ce   : > { %v8172_v7 = vpop.eup %8171  ;;  %7541 = vmatpush3.bf16.msra.mxu1 %v7540_v45 }
 0x6cf   : > { %v10231_v15 = vmul.f32 %v8172_v7, %v10100_v21  ;;  %v7543_v21 = vpack.c.bf16 %v5598_v6, %v5597_v27  ;;  %7542 = vmatprep.subr.bf16.mxu1 %v8254_v24 }
 0x6d0   : > { %5418 = vperm.xlu0 %7968, %v10197_v57   ;;  %5292 = vperm.xlu1 %7969, %v10197_v57  }
 0x6d1   : > { %v8174_v38 = vpop.eup %8173 }
 0x6d2   : > { %v5202_v56 = vmul.f32 %v8174_v38, %v10116_v4  ;;  %7544 = vmatpush3.bf16.msra.mxu1 %v7543_v21  ;;  %v8255_v4 = vmov 2   ;;  %v5208_v21 = vld [vmem:[%s10866_s11 + $0x18] sm:$0xff] }
 0x6d3   : > { %7545 = vmatprep.subr.bf16.mxu1 %v8254_v24 }
 0x6d4   : > { %5414 = vperm.xlu0 %7968, %v10203_v9   ;;  %5287 = vperm.xlu1 %7969, %v10203_v9   ;;  %v8176_v48 = vpop.eup %8175 }
 0x6d5   : > { %v5203_v29 = vmul.f32 %v8176_v48, %v10111_v51  ;;  %v5602_v51 = vld [vmem:[%s10865_s16 + $0x38] sm:$0xff]  ;;  %v5349_v48 = vld [vmem:[%s10656_s12 + $0x20] sm:$0xff] }
 0x6d6   : > { %7547 = vmatpush3.bf16.msra.mxu1 %v7546_v8  ;;  %v7549_v50 = vpack.c.bf16 %v5602_v51, %v5601_v42 }
 0x6d7   : > { %7548 = vmatprep.subr.bf16.mxu1 %v8254_v24 }
 0x6d8   : > { %5426 = vperm.xlu0 %7968, %v10209_v43   ;;  %5302 = vperm.xlu1 %7969, %v10209_v43  }
 0x6da   : > { %7550 = vmatpush3.bf16.msra.mxu1 %v7549_v50 }
 0x6db   : > { %7551 = vmatprep.subr.bf16.mxu1 %v8254_v24 }
 0x6dc   : > { %5422 = vperm.xlu0 %7968, %v10215_v25   ;;  %5297 = vperm.xlu1 %7969, %v10215_v25  }
 0x6e0   : > { %5434 = vperm.xlu0 %7968, %v10220_v33   ;;  %5312 = vperm.xlu1 %7969, %v10220_v33  }
 0x6e4   : > { %5430 = vperm.xlu0 %7968, %v10231_v15   ;;  %5307 = vperm.xlu1 %7969, %v10231_v15  }
 0x6e8   : > { %5438 = vperm.xlu0 %7968, %v5202_v56   ;;  %5317 = vperm.xlu1 %7969, %v5202_v56  }
 0x6ec   : > { %5442 = vperm.xlu0 %7968, %v5203_v29   ;;  %5322 = vperm.xlu1 %7969, %v5203_v29  }
 0x6f0   : > { %7971 = vset.pattern.permute.xlu0 %v8255_v4  ;;  %7970 = vset.pattern.permute.xlu1 %v8255_v4 }
 0x6f1   : > { %5721 = vperm.xlu0 %7971, %v10120_v22   ;;  %5717 = vperm.xlu1 %7970, %v10123_v12   ;;  %v7552_v22 = vpack.c.bf16 %v5604_v0, %v5603_v39  ;;  %v5605_v12 = vld [vmem:[%s10865_s16 + $0x50] sm:$0xff] }
 0x6f3   : > { %7553 = vmatpush3.bf16.msra.mxu1 %v7552_v22  ;;  %v5350_v22 = vld [vmem:[%s10656_s12 + $0x28] sm:$0xff] }
 0x6f4   : > { %7554 = vmatprep.subr.bf16.mxu1 %v8254_v24 }
 0x6f5   : > { %5733 = vperm.xlu0 %7971, %v10155_v2   ;;  %5725 = vperm.xlu1 %7970, %v10143_v16   ;;  %v7555_v2 = vpack.c.bf16 %v5606_v32, %v5605_v12  ;;  %v5607_v16 = vld [vmem:[%s10865_s16 + $0x60] sm:$0xff]  ;;  %v5210_v32 = vld [vmem:[%s10866_s11 + $0x28] sm:$0xff] }
 0x6f7   : > { %7556 = vmatpush3.bf16.msra.mxu1 %v7555_v2  ;;  %v5351_v2 = vld [vmem:[%s10656_s12 + $0x30] sm:$0xff] }
 0x6f8   : > { %7557 = vmatprep.subr.bf16.mxu1 %v8254_v24 }
 0x6f9   : > { %5741 = vperm.xlu0 %7971, %v10167_v49   ;;  %5729 = vperm.xlu1 %7970, %v10135_v10   ;;  %v7558_v49 = vpack.c.bf16 %v5608_v13, %v5607_v16  ;;  %v5609_v10 = vld [vmem:[%s10865_s16 + $0x70] sm:$0xff] }
 0x6fa   : > { %v5211_v16 = vld [vmem:[%s10866_s11 + $0x30] sm:$0xff] }
 0x6fb   : > { %7559 = vmatpush3.bf16.msra.mxu1 %v7558_v49 }
 0x6fc   : > { %7560 = vmatprep.subr.bf16.mxu1 %v8254_v24 }
 0x6fd   : > { %5749 = vperm.xlu0 %7971, %v10179_v41   ;;  %5737 = vperm.xlu1 %7970, %v10149_v55   ;;  %v5610_v41 = vld [vmem:[%s10865_s16 + $0x78] sm:$0xff] }
 0x6fe   : > { %v7561_v55 = vpack.c.bf16 %v5610_v41, %v5609_v10 }
 0x700   : > { %7562 = vmatpush3.bf16.msra.mxu1 %v7561_v55 }
 0x701   : > { %5757 = vperm.xlu0 %7971, %v10191_v28   ;;  %5745 = vperm.xlu1 %7970, %v10161_v17   ;;  %v10307_v17 = vpop.f32.mrb[40].mxu0 }
 0x702   : > { %7464 = vmatprep.subr.mxu1 %v8251_v52  ;;  %v7428_v61 = vpop.f32.mrb[41].mxu0 }
 0x705   : > { %5765 = vperm.xlu0 %7971, %v10203_v9   ;;  %5753 = vperm.xlu1 %7970, %v10173_v30  }
 0x709   : > { %5773 = vperm.xlu0 %7971, %v10215_v25   ;;  %5761 = vperm.xlu1 %7970, %v10185_v62   ;;  %v5920_v62 = vld [vmem:[%s10664_s20 + $0x8] sm:$0xff]  ;;  %v5207_v25 = vld [vmem:[%s10866_s11 + $0x10] sm:$0xff] }
 0x70a   : > { %v7564_v28 = vpack.c.bf16 %v5920_v62, %v5919_v23 }
 0x70c   : > { %7565 = vmatpush3.bf16.msra.mxu0 %v7564_v28  ;;  %v5352_v28 = vld [vmem:[%s10656_s12 + $0x38] sm:$0xff] }
 0x70d   : > { %5781 = vperm.xlu0 %7971, %v10231_v15   ;;  %5769 = vperm.xlu1 %7970, %v10197_v57   ;;  %v5924_v57 = vld [vmem:[%s10664_s20 + $0x28] sm:$0xff] }
 0x70e   : > { %7566 = vmatprep.subr.bf16.mxu0 %v8254_v24  ;;  %v7570_v11 = vpack.c.bf16 %v5924_v57, %v5923_v44 }
 0x710   : > { %7568 = vmatpush3.bf16.msra.mxu0 %v7567_v26 }
 0x711   : > { %5789 = vperm.xlu0 %7971, %v5202_v56   ;;  %5777 = vperm.xlu1 %7970, %v10209_v43   ;;  %v5205_v43 = vld [vmem:[%s10866_s11] sm:$0xff]  ;;  %v5348_v56 = vld [vmem:[%s10656_s12 + $0x18] sm:$0xff] }
 0x712   : > { %7569 = vmatprep.subr.bf16.mxu0 %v8254_v24 }
 0x714   : > { %7571 = vmatpush3.bf16.msra.mxu0 %v7570_v11 }
 0x715   : > { %5785 = vperm.xlu1 %7970, %v10220_v33   ;;  %7572 = vmatprep.subr.bf16.mxu0 %v8254_v24 }
 0x719   : > { %5793 = vperm.xlu1 %7970, %v5203_v29  }
 0x71d   : > { %v5233_v30 = vpop.permute.xlu1 %5232 }
 0x71e   : > { %v5228_v20 = vpop.permute.xlu0 %5227  ;;  %v5326_v7 = vmul.f32 %v5233_v30, %v5206_v46  ;;  %v5214_v46 = vld [vmem:[%s10866_s11 + $0x48] sm:$0xff] }
 0x71f   : > { %v5325_v5 = vmul.f32 %v5228_v20, %v5205_v43  ;;  %v5355_v43 = vld [vmem:[%s10656_s12 + $0x50] sm:$0xff] }
 0x722   : > { %v5371_v19 = vpop.permute.xlu1 %5370 }
 0x723   : > { %v5367_v34 = vpop.permute.xlu0 %5366  ;;  %v5446_v59 = vmul.f32 %v5371_v19, %v5346_v53  ;;  %v5353_v19 = vld [vmem:[%s10656_s12 + $0x40] sm:$0xff]  ;;  %v5354_v53 = vld [vmem:[%s10656_s12 + $0x48] sm:$0xff] }
 0x724   : > { %v5445_v37 = vmul.f32 %v5367_v34, %v5345_v40  ;;  %v5213_v34 = vld [vmem:[%s10866_s11 + $0x40] sm:$0xff] }
 0x725   : > { %v5466_v38 = vadd.f32 %v5446_v59, %v5326_v7 }
 0x726   : > { %v5465_v27 = vadd.f32 %v5445_v37, %v5325_v5 }
 0x727   : > { %v5379_v36 = vpop.permute.xlu0 %5378  ;;  %v5243_v35 = vpop.permute.xlu1 %5242 }
 0x728   : > { %v5485_v8 = vadd.f32 %v5466_v38, %v5465_v27  ;;  %v5328_v42 = vmul.f32 %v5243_v35, %v5208_v21  ;;  %v5448_v51 = vmul.f32 %v5379_v36, %v5348_v56  ;;  %v5356_v27 = vld [vmem:[%s10656_s12 + $0x58] sm:$0xff]  ;;  %v5357_v21 = vld [vmem:[%s10656_s12 + $0x60] sm:$0xff] }
 0x729   : > { %v5217_v56 = vld [vmem:[%s10866_s11 + $0x60] sm:$0xff] }
 0x72a   : > { %v5468_v49 = vadd.f32 %v5448_v51, %v5328_v42 }
 0x72b   : > { %v5375_v1 = vpop.permute.xlu0 %5374  ;;  %v5238_v31 = vpop.permute.xlu1 %5237 }
 0x72c   : > { %v5327_v58 = vmul.f32 %v5238_v31, %v5207_v25  ;;  %v5447_v15 = vmul.f32 %v5375_v1, %v5347_v14 }
 0x72e   : > { %v5467_v54 = vadd.f32 %v5447_v15, %v5327_v58 }
 0x72f   : > { %v5387_v9 = vpop.permute.xlu0 %5386  ;;  %v5253_v47 = vpop.permute.xlu1 %5252 }
 0x730   : > { %v5486_v0 = vadd.f32 %v5485_v8, %v5467_v54  ;;  %v5450_v41 = vmul.f32 %v5387_v9, %v5350_v22  ;;  %v5330_v55 = vmul.f32 %v5253_v47, %v5210_v32  ;;  %v5358_v22 = vld [vmem:[%s10656_s12 + $0x68] sm:$0xff] }
 0x732   : > { %v5487_v30 = vadd.f32 %v5486_v0, %v5468_v49  ;;  %v5470_v26 = vadd.f32 %v5450_v41, %v5330_v55  ;;  %v5219_v49 = vld [vmem:[%s10866_s11 + $0x70] sm:$0xff] }
 0x733   : > { %v5383_v60 = vpop.permute.xlu0 %5382  ;;  %v5248_v33 = vpop.permute.xlu1 %5247 }
 0x734   : > { %v5449_v50 = vmul.f32 %v5383_v60, %v5349_v48  ;;  %v5329_v39 = vmul.f32 %v5248_v33, %v5209_v63  ;;  %v5215_v60 = vld [vmem:[%s10866_s11 + $0x50] sm:$0xff] }
 0x736   : > { %v5469_v10 = vadd.f32 %v5449_v50, %v5329_v39 }
 0x737   : > { %v5395_v45 = vpop.permute.xlu0 %5394  ;;  %v5263_v6 = vpop.permute.xlu1 %5262 }
 0x738   : > { %v5488_v3 = vadd.f32 %v5487_v30, %v5469_v10  ;;  %v5452_v36 = vmul.f32 %v5395_v45, %v5352_v28  ;;  %v5332_v35 = vmul.f32 %v5263_v6, %v5212_v18  ;;  %v5216_v6 = vld [vmem:[%s10866_s11 + $0x58] sm:$0xff] }
 0x739   : > { %v5220_v28 = vld [vmem:[%s10866_s11 + $0x78] sm:$0xff] }
 0x73a   : > { %v5489_v1 = vadd.f32 %v5488_v3, %v5470_v26  ;;  %v5472_v37 = vadd.f32 %v5452_v36, %v5332_v35  ;;  %v5360_v3 = vld [vmem:[%s10656_s12 + $0x78] sm:$0xff]  ;;  %v5362_v35 = vld [vmem:[%s10656_s12 + $0x88] sm:$0xff] }
 0x73b   : > { %v5391_v29 = vpop.permute.xlu0 %5390  ;;  %v5258_v4 = vpop.permute.xlu1 %5257 }
 0x73c   : > { %v5451_v20 = vmul.f32 %v5391_v29, %v5351_v2  ;;  %v5331_v61 = vmul.f32 %v5258_v4, %v5211_v16 }
 0x73e   : > { %v5471_v44 = vadd.f32 %v5451_v20, %v5331_v61 }
 0x73f   : > { %v5403_v12 = vpop.permute.xlu0 %5402  ;;  %v5273_v13 = vpop.permute.xlu1 %5272 }
 0x740   : > { %v5490_v47 = vadd.f32 %v5489_v1, %v5471_v44  ;;  %v5454_v14 = vmul.f32 %v5403_v12, %v5354_v53  ;;  %v5334_v33 = vmul.f32 %v5273_v13, %v5214_v46  ;;  %v5218_v12 = vld [vmem:[%s10866_s11 + $0x68] sm:$0xff]  ;;  %v5359_v13 = vld [vmem:[%s10656_s12 + $0x70] sm:$0xff] }
 0x741   : > { %v5222_v1 = vld [vmem:[%s10866_s11 + $0x88] sm:$0xff] }
 0x742   : > { %v5491_v7 = vadd.f32 %v5490_v47, %v5472_v37  ;;  %v5474_v48 = vadd.f32 %v5454_v14, %v5334_v33  ;;  %v5363_v37 = vld [vmem:[%s10656_s12 + $0x90] sm:$0xff] }
 0x743   : > { %v5399_v23 = vpop.permute.xlu0 %5398  ;;  %v5268_v62 = vpop.permute.xlu1 %5267 }
 0x744   : > { %v5453_v31 = vmul.f32 %v5399_v23, %v5353_v19  ;;  %v5333_v9 = vmul.f32 %v5268_v62, %v5213_v34 }
 0x746   : > { %v5473_v25 = vadd.f32 %v5453_v31, %v5333_v9  ;;  %v5221_v31 = vld [vmem:[%s10866_s11 + $0x80] sm:$0xff] }
 0x747   : > { %v5411_v57 = vpop.permute.xlu0 %5410  ;;  %v5283_v11 = vpop.permute.xlu1 %5282 }
 0x748   : > { %v5492_v38 = vadd.f32 %v5491_v7, %v5473_v25  ;;  %v5456_v29 = vmul.f32 %v5411_v57, %v5356_v27  ;;  %v5336_v4 = vmul.f32 %v5283_v11, %v5216_v6  ;;  %v5361_v11 = vld [vmem:[%s10656_s12 + $0x80] sm:$0xff]  ;;  %v5223_v25 = vld [vmem:[%s10866_s11 + $0x90] sm:$0xff]  ;;  %v5364_v27 = vld [vmem:[%s10656_s12 + $0x98] sm:$0xff] }
 0x749   : > { %v5224_v6 = vld [vmem:[%s10866_s11 + $0x98] sm:$0xff]  ;;  %s8192_s11 = scalar_lea.vmem %s8191_s2, 32 }
 0x74a   : > { %v5493_v42 = vadd.f32 %v5492_v38, %v5474_v48  ;;  %v5476_v2 = vadd.f32 %v5456_v29, %v5336_v4 }
 0x74b   : > { %v5407_v40 = vpop.permute.xlu0 %5406  ;;  %v5278_v59 = vpop.permute.xlu1 %5277 }
 0x74c   : > { %v5455_v5 = vmul.f32 %v5407_v40, %v5355_v43  ;;  %v5335_v58 = vmul.f32 %v5278_v59, %v5215_v60 }
 0x74e   : > { %v5475_v63 = vadd.f32 %v5455_v5, %v5335_v58 }
 0x74f   : > { %v5419_v15 = vpop.permute.xlu0 %5418  ;;  %v5293_v45 = vpop.permute.xlu1 %5292 }
 0x750   : > { %v5494_v39 = vadd.f32 %v5493_v42, %v5475_v63  ;;  %v5458_v10 = vmul.f32 %v5419_v15, %v5358_v22  ;;  %v5338_v41 = vmul.f32 %v5293_v45, %v5218_v12 }
 0x752   : > { %v5495_v55 = vadd.f32 %v5494_v39, %v5476_v2  ;;  %v5478_v18 = vadd.f32 %v5458_v10, %v5338_v41  ;;  %v8185_v41 = vld [vmem:[%s10027_s5] sm:$0x1]  ;;  %s771_s5 = scalar_lea.vmem [#allocation3], %s770_s0 }
 0x753   : > { %v5415_v54 = vpop.permute.xlu0 %5414  ;;  %v5288_v8 = vpop.permute.xlu1 %5287  ;;  %s6110_s10 = sshll.u32 %s771_s5, 4  ;;  %s6111_s10 = int_to_ptr.vmem [resolvable:$true] %s6110_s10 }
 0x754   : > { %v5457_v51 = vmul.f32 %v5415_v54, %v5357_v21  ;;  %v5337_v50 = vmul.f32 %v5288_v8, %v5217_v56  ;;  %s8186_s16 = scalar_lea.vmem %s6111_s10, 16  ;;  %p8193_p1 = scmp.lt.s32.totalorder %s6111_s10, %s8191_s2 }
 0x755   : > { %p8187_p12 = scmp.ne.s32.totalorder %s6111_s10, %s8186_s16  ;;  %p8194_p2 = scmp.lt.s32.totalorder %s8192_s11, %s8186_s16 }
 0x756   : > { %v5477_v16 = vadd.f32 %v5457_v51, %v5337_v50 }
 0x757   : > { %v5427_v0 = vpop.permute.xlu0 %5426  ;;  %v5303_v32 = vpop.permute.xlu1 %5302  ;;  %p8188_p13 = pnand %p8187_p12, %p8428_p5  ;;  %p8195_p3 = por %p8194_p2, %p8193_p1 }
 0x758   : > { %v5496_v23 = vadd.f32 %v5495_v55, %v5477_v16  ;;  %v5460_v44 = vmul.f32 %v5427_v0, %v5360_v3  ;;  %v5340_v57 = vmul.f32 %v5303_v32, %v5220_v28  ;;  %v5590_v32 = vld [vmem:[%s10659_s15] sm:$0x1]  ;;  %v5926_v55 = vld [vmem:[%s10664_s20 + $0x38] sm:$0xff] }
 0x759   : > { %v5931_v28 = vld [vmem:[%s10664_s20 + $0x60] sm:$0xff]  ;;  %p8189_p0 = pneg %p8188_p13 }
 0x75a   : > { %v5497_v36 = vadd.f32 %v5496_v23, %v5478_v18  ;;  %v5480_v46 = vadd.f32 %v5460_v44, %v5340_v57  ;;  %v5932_v18 = vld [vmem:[%s10664_s20 + $0x68] sm:$0xff] }
 0x75b   : > { %v5423_v30 = vpop.permute.xlu0 %5422  ;;  %v5298_v61 = vpop.permute.xlu1 %5297  ;;  %p8196_p4 = pnand %p8195_p3, %p8189_p0 }
 0x75c   : > { %v5459_v20 = vmul.f32 %v5423_v30, %v5359_v13  ;;  %v5339_v62 = vmul.f32 %v5298_v61, %v5219_v49  ;;  %v5841_v49 = vld [vmem:[%s10662_s18] sm:$0x7f]  ;;  %v5929_v61 = vld [vmem:[%s10664_s20 + $0x50] sm:$0xff] }
 0x75e   : > { %v5479_v19 = vadd.f32 %v5459_v20, %v5339_v62  ;;  %v5927_v20 = vld [vmem:[%s10664_s20 + $0x40] sm:$0xff]  ;;  %v5930_v62 = vld [vmem:[%s10664_s20 + $0x58] sm:$0xff] }
 0x75f   : > { %v5435_v34 = vpop.permute.xlu0 %5434  ;;  %v5313_v26 = vpop.permute.xlu1 %5312  ;;  %v7579_v3 = vpack.c.bf16 %v5930_v62, %v5929_v61 }
 0x760   : > { %v5498_v9 = vadd.f32 %v5497_v36, %v5479_v19  ;;  %v5462_v43 = vmul.f32 %v5435_v34, %v5362_v35  ;;  %v5342_v60 = vmul.f32 %v5313_v26, %v5222_v1  ;;  %v7582_v19 = vpack.c.bf16 %v5932_v18, %v5931_v28  ;;  %v5933_v34 = vld [vmem:[%s10664_s20 + $0x70] sm:$0xff]  ;;  %v5934_v26 = vld [vmem:[%s10664_s20 + $0x78] sm:$0xff]  ;;  %v5696_v1 = vld [vmem:[%s10657_s13] sm:$0xff] }
 0x761   : > { %v7585_v44 = vpack.c.bf16 %v5934_v26, %v5933_v34  ;;  %v5711_v28 = vld [vmem:[%s10657_s13 + $0x78] sm:$0xff] }
 0x762   : > { %v5499_v14 = vadd.f32 %v5498_v9, %v5480_v46  ;;  %v5482_v15 = vadd.f32 %v5462_v43, %v5342_v60 }
 0x763   : > { %v5431_v47 = vpop.permute.xlu0 %5430  ;;  %v5308_v40 = vpop.permute.xlu1 %5307 }
 0x764   : > { %v5461_v53 = vmul.f32 %v5431_v47, %v5361_v11  ;;  %v5341_v59 = vmul.f32 %v5308_v40, %v5221_v31  ;;  %v5697_v11 = vld [vmem:[%s10657_s13 + $0x8] sm:$0xff]  ;;  %v5698_v31 = vld [vmem:[%s10657_s13 + $0x10] sm:$0xff] }
 0x766   : > { %v5481_v33 = vadd.f32 %v5461_v53, %v5341_v59  ;;  %v5699_v53 = vld [vmem:[%s10657_s13 + $0x18] sm:$0xff] }
 0x767   : > { %v5439_v7 = vpop.permute.xlu0 %5438  ;;  %v5318_v58 = vpop.permute.xlu1 %5317 }
 0x768   : > { %v5463_v5 = vmul.f32 %v5439_v7, %v5363_v37  ;;  %v5500_v45 = vadd.f32 %v5499_v14, %v5481_v33  ;;  %v5343_v38 = vmul.f32 %v5318_v58, %v5223_v25  ;;  %v5700_v37 = vld [vmem:[%s10657_s13 + $0x20] sm:$0xff]  ;;  %v5701_v33 = vld [vmem:[%s10657_s13 + $0x28] sm:$0xff] }
 0x76a   : > { %v5501_v21 = vadd.f32 %v5500_v45, %v5482_v15  ;;  %v5483_v56 = vadd.f32 %v5463_v5, %v5343_v38  ;;  %v5702_v45 = vld [vmem:[%s10657_s13 + $0x30] sm:$0xff] }
 0x76b   : > { %v5443_v48 = vpop.permute.xlu0 %5442  ;;  %v5323_v54 = vpop.permute.xlu1 %5322 }
 0x76c   : > { %v5464_v63 = vmul.f32 %v5443_v48, %v5364_v27  ;;  %v5344_v29 = vmul.f32 %v5323_v54, %v5224_v6  ;;  %v5502_v8 = vadd.f32 %v5501_v21, %v5483_v56  ;;  %v5703_v6 = vld [vmem:[%s10657_s13 + $0x38] sm:$0xff]  ;;  %v5704_v54 = vld [vmem:[%s10657_s13 + $0x40] sm:$0xff] }
 0x76e   : > { %v5484_v4 = vadd.f32 %v5464_v63, %v5344_v29 }
 0x770   : > { %v5503_v42 = vadd.f32 %v5502_v8, %v5484_v4  ;;  %v5718_v57 = vpop.permute.xlu1 %5717  ;;  %v5722_v35 = vpop.permute.xlu0 %5721  ;;  %v5705_v4 = vld [vmem:[%s10657_s13 + $0x48] sm:$0xff] }
 0x771   : > { %v5797_v9 = vmul.f32 %v5722_v35, %v5697_v11  ;;  %v5796_v47 = vmul.f32 %v5718_v57, %v5696_v1  ;;  %v5713_v11 = vld [vmem:[%s10657_s13 + $0x88] sm:$0xff] }
 0x772   : > { %v5504_v51 = vrot.slane %v5503_v42, 4 }
 0x773   : > { %v5816_v43 = vadd.f32 %v5797_v9, %v5796_v47  ;;  %v5714_v47 = vld [vmem:[%s10657_s13 + $0x90] sm:$0xff] }
 0x774   : > { %v5505_v50 = vadd.f32 %v5504_v51, %v5503_v42  ;;  %v5726_v36 = vpop.permute.xlu1 %5725  ;;  %v5734_v25 = vpop.permute.xlu0 %5733 }
 0x775   : > { %v5798_v46 = vmul.f32 %v5726_v36, %v5698_v31  ;;  %v5800_v5 = vmul.f32 %v5734_v25, %v5700_v37 }
 0x776   : > { %v5506_v39 = vrot.slane %v5505_v50, 2 }
 0x777   : > { %v5817_v59 = vadd.f32 %v5816_v43, %v5798_v46  ;;  %v5715_v46 = vld [vmem:[%s10657_s13 + $0x98] sm:$0xff] }
 0x778   : > { %v5507_v0 = vadd.f32 %v5506_v39, %v5505_v50  ;;  %v5730_v40 = vpop.permute.xlu1 %5729  ;;  %v5742_v38 = vpop.permute.xlu0 %5741 }
 0x779   : > { %v5799_v60 = vmul.f32 %v5730_v40, %v5699_v53  ;;  %v5802_v56 = vmul.f32 %v5742_v38, %v5702_v45 }
 0x77a   : > { %v5508_v22 = vrot.slane %v5507_v0, 1 }
 0x77b   : > { %v5818_v14 = vadd.f32 %v5817_v59, %v5799_v60 }
 0x77c   : > { %v5509_v12 = vadd.f32 %v5508_v22, %v5507_v0  ;;  %v5738_v7 = vpop.permute.xlu1 %5737  ;;  %v5750_v29 = vpop.permute.xlu0 %5749  ;;  %v5706_v0 = vld [vmem:[%s10657_s13 + $0x50] sm:$0xff] }
 0x77d   : > { %v5819_v58 = vadd.f32 %v5818_v14, %v5800_v5  ;;  %v5801_v15 = vmul.f32 %v5738_v7, %v5701_v33  ;;  %v5804_v51 = vmul.f32 %v5750_v29, %v5704_v54 }
 0x77e   : > { %v5589_v2 = vadd.f32 %v10307_v17, %v5509_v12  ;;  %v5925_v17 = vld [vmem:[%s10664_s20 + $0x30] sm:$0xff] }
 0x77f   : > { %v7573_v30 = vpack.c.bf16 %v5926_v55, %v5925_v17  ;;  %v5820_v27 = vadd.f32 %v5819_v58, %v5801_v15  ;;  %v5709_v55 = vld [vmem:[%s10657_s13 + $0x68] sm:$0xff]  ;;  %v5611_v58 = vld [vmem:[%s10661_s17] sm:$0x1] }
 0x780   : > { %v5591_v16 = vadd.f32 %v5590_v32, %v5589_v2  ;;  %v5746_v21 = vpop.permute.xlu1 %5745  ;;  %v5758_v22 = vpop.permute.xlu0 %5757  ;;  %v5707_v32 = vld [vmem:[%s10657_s13 + $0x58] sm:$0xff] }
 0x781   : > { %7574 = vmatpush3.bf16.msra.mxu0 %v7573_v30  ;;  %v5821_v48 = vadd.f32 %v5820_v27, %v5802_v56  ;;  %v5803_v63 = vmul.f32 %v5746_v21, %v5703_v6 }
 0x782   : > { %vm5592_vm11 = vcmp.gt.f32.partialorder %v5591_v16, 0.0  ;;  %v5593_v13 = vmul.f32 0.01, %v5591_v16  ;;  %7575 = vmatprep.subr.bf16.mxu0 %v8254_v24 }
 0x783   : > { %v5822_v8 = vadd.f32 %v5821_v48, %v5803_v63  ;;  %v5916_v48 = vld [vmem:[%s10663_s19] sm:$0x1] }
 0x784   : > { %v5594_v10 = vsel %vm5592_vm11, %v5591_v16, %v5593_v13  ;;  %v5754_v42 = vpop.permute.xlu1 %5753  ;;  %v5806_v16 = vmul.f32 %v5758_v22, %v5706_v0  ;;  %v6013_v22 = vld [vmem:[%s10666_s22 + $0x20] sm:$0xff] }
 0x785   : > { %7462 = vmatmul.mubr.f32.vlgmr.msra.gmra.mrb[40].mxu1 %v5594_v10  ;;  %v5823_v50 = vadd.f32 %v5822_v8, %v5804_v51  ;;  %v5805_v39 = vmul.f32 %v5754_v42, %v5705_v4  ;;  %v5708_v10 = vld [vmem:[%s10657_s13 + $0x60] sm:$0xff]  ;;  %v6010_v42 = vld [vmem:[%s10666_s22 + $0x8] sm:$0xff]  ;;  %v6011_v51 = vld [vmem:[%s10666_s22 + $0x10] sm:$0xff] }
 0x786   : > { %7465 = vmatpush3.msk.msra.mxu1 %vm5515_vm8, %v5841_v49  ;;  %7466 = vmatprep.mubr.msk.f32.mxu1 %vm8252_vm9, %v8251_v52  ;;  %v6009_v4 = vld [vmem:[%s10666_s22] sm:$0xff] }
 0x787   : > { %7587 = vmatprep.subr.bf16.mxu1 %v8254_v24  ;;  %v5824_v12 = vadd.f32 %v5823_v50, %v5805_v39  ;;  %v7588_v50 = vpack.c.bf16 %v6010_v42, %v6009_v4  ;;  %v6012_v39 = vld [vmem:[%s10666_s22 + $0x18] sm:$0xff] }
 0x788   : > { %v5762_v2 = vpop.permute.xlu1 %5761  ;;  %v7591_v0 = vpack.c.bf16 %v6012_v39, %v6011_v51 }
 0x789   : > { %7467 = vmatmul.mubr.msk.f32.vlgmr.msra.gmra.mrb[42].mxu1 %vm5511_vm10, %v8185_v41  ;;  %v5825_v13 = vadd.f32 %v5824_v12, %v5806_v16  ;;  %v5807_v49 = vmul.f32 %v5762_v2, %v5707_v32  ;;  %v5766_v41 = vpop.permute.xlu0 %5765  ;;  %v6014_v12 = vld [vmem:[%s10666_s22 + $0x28] sm:$0xff]  ;;  %v6015_v2 = vld [vmem:[%s10666_s22 + $0x30] sm:$0xff]  ;;  %v6016_v16 = vld [vmem:[%s10666_s22 + $0x38] sm:$0xff] }
 0x78a   : > { %7520 = vmatprep.mubr.msk.f32.mxu1 %vm8252_vm9, %v8251_v52  ;;  %v5928_v52 = vld [vmem:[%s10664_s20 + $0x48] sm:$0xff]  ;;  %7589 = vmatpush3.bf16.msra.mxu1 %v7588_v50  ;;  %v7594_v32 = vpack.c.bf16 %v6014_v12, %v6013_v22 }
 0x78b   : > { %v7576_v23 = vpack.c.bf16 %v5928_v52, %v5927_v20  ;;  %v5826_v17 = vadd.f32 %v5825_v13, %v5807_v49  ;;  %v5808_v20 = vmul.f32 %v5766_v41, %v5708_v10  ;;  %7590 = vmatprep.subr.bf16.mxu1 %v8254_v24  ;;  %v7597_v13 = vpack.c.bf16 %v6016_v16, %v6015_v2 }
 0x78c   : > { %v5770_v30 = vpop.permute.xlu1 %5769 }
 0x78d   : > { %7577 = vmatpush3.bf16.msra.mxu0 %v7576_v23  ;;  %v5827_v52 = vadd.f32 %v5826_v17, %v5808_v20  ;;  %v5809_v61 = vmul.f32 %v5770_v30, %v5709_v55  ;;  %v5710_v23 = vld [vmem:[%s10657_s13 + $0x70] sm:$0xff]  ;;  %v5774_v62 = vpop.permute.xlu0 %5773 }
 0x78e   : > { %7578 = vmatprep.subr.bf16.mxu0 %v8254_v24  ;;  %7592 = vmatpush3.bf16.msra.mxu1 %v7591_v0 }
 0x78f   : > { %7593 = vmatprep.subr.bf16.mxu1 %v8254_v24 }
 0x790   : > { %v5778_v18 = vpop.permute.xlu1 %5777 }
 0x791   : > { %7580 = vmatpush3.bf16.msra.mxu0 %v7579_v3  ;;  %v5828_v3 = vadd.f32 %v5827_v52, %v5809_v61  ;;  %v5811_v26 = vmul.f32 %v5778_v18, %v5711_v28  ;;  %v5782_v57 = vpop.permute.xlu0 %5781 }
 0x792   : > { %7581 = vmatprep.subr.bf16.mxu0 %v8254_v24  ;;  %7595 = vmatpush3.bf16.msra.mxu1 %v7594_v32 }
 0x793   : > { %7596 = vmatprep.subr.bf16.mxu1 %v8254_v24 }
 0x794   : > { %v5786_v35 = vpop.permute.xlu1 %5785 }
 0x795   : > { %7583 = vmatpush3.bf16.msra.mxu0 %v7582_v19  ;;  %v5810_v19 = vmul.f32 %v5774_v62, %v5710_v23  ;;  %v5813_v9 = vmul.f32 %v5786_v35, %v5713_v11  ;;  %v5790_v53 = vpop.permute.xlu0 %5789 }
 0x796   : > { %7584 = vmatprep.subr.bf16.mxu0 %v8254_v24  ;;  %v5814_v60 = vmul.f32 %v5790_v53, %v5714_v47  ;;  %7598 = vmatpush3.bf16.msra.mxu1 %v7597_v13  ;;  %v5935_v24 = vld [vmem:[%s10665_s21] sm:$0x1] }
 0x797   : > { %v5829_v34 = vadd.f32 %v5828_v3, %v5810_v19 }
 0x798   : > { %v5794_v43 = vpop.permute.xlu1 %5793 }
 0x799   : > { %7586 = vmatpush3.bf16.msra.mxu0 %v7585_v44  ;;  %v5712_v44 = vld [vmem:[%s10657_s13 + $0x80] sm:$0xff]  ;;  %v5830_v36 = vadd.f32 %v5829_v34, %v5811_v26  ;;  %v5815_v37 = vmul.f32 %v5794_v43, %v5715_v46 }
 0x79a   : > { %v5812_v1 = vmul.f32 %v5782_v57, %v5712_v44 }
 0x79c   : > { %v5831_v31 = vadd.f32 %v5830_v36, %v5812_v1 }
 0x79e   : > { %v5832_v40 = vadd.f32 %v5831_v31, %v5813_v9 }
 0x7a0   : > { %v5833_v59 = vadd.f32 %v5832_v40, %v5814_v60 }
 0x7a2   : > { %v5834_v25 = vadd.f32 %v5833_v59, %v5815_v37 }
 0x7a4   : > { %v5835_v14 = vrot.slane %v5834_v25, 4 }
 0x7a6   : > { %v5836_v33 = vadd.f32 %v5835_v14, %v5834_v25 }
 0x7a8   : > { %v5837_v7 = vrot.slane %v5836_v33, 2 }
 0x7aa   : > { %v5838_v5 = vadd.f32 %v5837_v7, %v5836_v33 }
 0x7ac   : > { %v5839_v15 = vrot.slane %v5838_v5, 1 }
 0x7ae   : > { %v5840_v21 = vadd.f32 %v5839_v15, %v5838_v5 }
 0x858   : > { %v5678_v45 = vpop.f32.mrb[40].mxu1 }
 0x859   : > { %v5679_v38 = vadd.f32 %v5678_v45, %v5611_v58  ;;  %v7463_v27 = vpop.f32.mrb[41].mxu1 }
 0x85b   : > { %v5683_v6 = vsel %vm5682_vm12, %v5679_v38, -inf }
 0x85c   : > { %5684 = vmax.xlane.f32.xlu0 %v5683_v6  ;;  %v5911_v56 = vpop.f32.mrb[42].mxu1 }
 0x85d   : > { %v5915_v63 = vadd.f32 %v5911_v56, %v5840_v21  ;;  %v7468_v54 = vpop.f32.mrb[43].mxu1 }
 0x85f   : > { %v5917_v29 = vadd.f32 %v5916_v48, %v5915_v63 }
 0x861   : > { %8177 = vtanh.f32 %v5917_v29 }
 0x86b   : > { %v8178_v8 = vpop.eup %8177 }
 0x86c   : > { %7502 = vmatmul.mubr.f32.vlgmr.msra.gmra.mrb[42].mxu0 %v8178_v8 }
 0x8e9   : > { %v5685_v49 = vpop.xlane.xlu0 %5684 }
 0x8ea   : > { %v5686_v10 = vsub.f32 %v5679_v38, %v5685_v49 }
 0x8ec   : > { %v5687_v41 = vmul.f32 1.442695, %v5686_v10 }
 0x8ee   : > { %8179 = vpow2.f32 %v5687_v41 }
 0x8f8   : > { %v8180_v17 = vpop.eup %8179 }
 0x8f9   : > { %v5689_v55 = vsel %vm5682_vm12, %v8180_v17, 0.0 }
 0x8fa   : > { %5690 = vadd.xlane.f32.xlu1 %v5689_v55 }
 0x93f   : > { %v6002_v30 = vpop.f32.mrb[42].mxu0 }
 0x940   : > { %v6003_v20 = vadd.f32 %v6002_v30, %v5935_v24  ;;  %v7503_v52 = vpop.f32.mrb[43].mxu0 }
 0x942   : > { %vm6006_vm13 = vcmp.gt.f32.partialorder %v6003_v20, 0.0  ;;  %v6007_v61 = vmul.f32 0.01, %v6003_v20 }
 0x944   : > { %v6008_v23 = vsel %vm6006_vm13, %v6003_v20, %v6007_v61 }
 0x945   : > { %7521 = vmatmul.mubr.msk.f32.vlgmr.msra.gmra.mrb[44].mxu1 %vm1338_vm4, %v6008_v23 }
 0x987   : > { %v5691_v62 = vpop.xlane.xlu1 %5690 }
 0x988   : > { %8181 = vlog2.f32 %v5691_v62 }
 0x992   : > { %v8182_v3 = vpop.eup %8181 }
 0x993   : > { %v5693_v28 = vmul.f32 0.6931472, %v8182_v3 }
 0x995   : > { %v5694_v18 = vsub.f32 %v5686_v10, %v5693_v28 }
 0x997   : > { %5695 = vst.msk [vmem:[%s771_s5] sm:$0x1] %vm5682_vm12, %v5694_v18 }
 0x998   : > { %8199 = shalt.err (!%p8196_p4)
}
 0x999   : > { %s8200_s23 = scalar_lea.hbm %s10604_s7, 16  ;;  %s8204_s1 = scalar_lea.hbm %s10668_s24, 32 }
 0x99a   : > { %p8201_p7 = scmp.ne.s32.totalorder %s10604_s7, %s8200_s23  ;;  %p8205_p10 = scmp.lt.u32.totalorder %s10604_s7, %s10668_s24 }
 0x99b   : > { %p8206_p11 = scmp.lt.u32.totalorder %s8204_s1, %s8200_s23  ;;  %p8208_p13 = scmp.lt.u32.totalorder %s8200_s23, %s10604_s7 }
 0x99c   : > { %p8202_p8 = pnand %p8201_p7, %p8428_p5 }
 0x99d   : > { %p8207_p12 = por %p8206_p11, %p8205_p10 }
 0x99e   : > { %p8203_p9 = pneg %p8202_p8 }
 0x99f   : > { %p8209_p0 = por %p8208_p13, %p8207_p12 }
 0x9a1   : > { %p8210_p1 = pnand %p8209_p0, %p8203_p9 }
 0x9a3   : > { %8213 = shalt.err (!%p8210_p1)
}
 0x9a4   : > { %7920 = dma.vmem_to_hbm [thread:$0]  (%p8428_p5), %s6111_s10, 16, %s10604_s7, %s6095_s14   ;;  %v6017_v19 = vld [vmem:[#allocation2] sm:$0x1]  ;;  %vm6092_vm4 = vcmask 0  }
 0x9a5   : > { %s788_s9 = scalar_lea.vmem %s10669_s25, %s10019_s6 }
 0xa18   : > { %v6087_v34 = vpop.f32.mrb[44].mxu1 }
 0xa19   : > { %v6088_v26 = vadd.f32 %v6087_v34, %v6017_v19  ;;  %v7522_v44 = vpop.f32.mrb[45].mxu1 }
 0xa1b   : > { %8183 = vtanh.f32 %v6088_v26 }
 0xa25   : > { %v8184_v57 = vpop.eup %8183 }
 0xa26   : > { %6093 = vst.msk [vmem:[%s788_s9] sm:$0x1] %vm6092_vm4, %v8184_v57 }
 0xa27 PF: > { %s10867_s2 = sld [smem:[#allocation6_spill]]  ;;  %p7926_p2 = scmp.ge.s32.totalorder %s8248_s3, 2 }
 0xa29   : > { %p7923_p5 = pnand %p7926_p2, %p8432_p6 }
 0xa2d   : > { %s6125_s28 = sand.u32 1, %s10867_s2  }
 0xa2e   : > { %s6126_s7 = scalar_lea.sflag [#allocation4], %s6125_s28 }
 0xa2f   : > { %8231 = dma.done.wait (!%p7923_p5), %s6126_s7, 16  }
 0xa30   : > { %8233 = vsyncadd (!%p7923_p5), %s6126_s7, 4294967280  ;;  %s10869_s3 = sld [smem:[#allocation8_spill]]  ;;  %s10870_s10 = sld [smem:[#allocation7_spill]] }
 0xa31   : > { %s10871_s7 = sld [smem:[#allocation9_spill]]  ;;  %s10872_s6 = smov %s8240_s30 }
 0xa36   : > { %p38_p3 = scmp.ge.s32.totalorder %s10869_s3, 4   ;;  %s10873_s30 = smov %s10870_s10 }
 0xa38   :  { %40 = sbr.rel (!%p38_p3) target bundleno = 18 (0x12), region = 166 }
 0xa3f   :  { %6136 = vsyncpa [#allocation4], 1 }
 0xa40   :  { %6138 = vsyncpa [#allocation4 + $0x1], 1 }

</bundles_post_ra>
